<compile_context>
chip_gen: v5e
topology: v5e:2x2
jax: 0.10.0
libtpu: 0.0.40
codegen_flags: <defaults>
</compile_context>

<pallas_src>
import functools
import math

import jax
import jax.numpy as jnp
from jax import lax
from jax.experimental import pallas as pl
from jax.experimental.pallas import tpu as pltpu


# ----------------------------------------------------------------------------
# Fused per-layer Pallas kernel
# ----------------------------------------------------------------------------
def _fused_layer_kernel(x_ref, wqkv_ref, bqkv_ref, wo_ref, bo_ref,
                        n1a_ref, n1b_ref, n1la_ref, n1lb_ref,
                        l1w_ref, l1b_ref, n2la_ref, n2lb_ref,
                        l2w_ref, l2b_ref, n2a_ref, n2b_ref,
                        ffw_ref, ffb_ref, o_ref, *, heads, eps):
    S = x_ref.shape[1]
    D = x_ref.shape[2]
    dk = D // heads
    scale = 1.0 / math.sqrt(dk)

    x = x_ref[0].astype(jnp.float32)                       # (S, D)

    def layer_norm(v, a_ref, b_ref):
        # torch: alpha * (v - mean) / (std + eps) + bias, std unbiased (N-1)
        n = v.shape[-1]
        mean = jnp.mean(v, axis=-1, keepdims=True)
        d = v - mean
        var = jnp.sum(d * d, axis=-1, keepdims=True) * (1.0 / (n - 1))
        inv = pl.reciprocal(jnp.sqrt(var) + eps, approx=True)   # EUP slot
        return a_ref[...] * d * inv + b_ref[...]

    # ---- Multi-head attention sublayer (pre-norm, residual) ----
    x2 = layer_norm(x, n1a_ref, n1b_ref)
    qkv = jnp.dot(x2, wqkv_ref[...],
                  preferred_element_type=jnp.float32) + bqkv_ref[...]   # (S, 3D)
    wo = wo_ref[...]                                                    # (D, D)

    attn = jnp.zeros((S, D), jnp.float32)
    for h in range(heads):                       # static unroll (heads is small)
        q = qkv[:, h * dk:(h + 1) * dk]
        k = qkv[:, D + h * dk:D + (h + 1) * dk]
        v = qkv[:, 2 * D + h * dk:2 * D + (h + 1) * dk]
        # q @ k^T without materializing the transpose: contract dk of both.
        s = lax.dot_general(q, k, (((1,), (1,)), ((), ())),
                            preferred_element_type=jnp.float32) * scale
        s = s - jnp.max(s, axis=-1, keepdims=True)
        p = jnp.exp(s)
        p = p * pl.reciprocal(jnp.sum(p, axis=-1, keepdims=True), approx=True)
        oh = jnp.dot(p, v, preferred_element_type=jnp.float32)          # (S, dk)
        # Fold output projection per head: concat(o_h) @ Wo == sum_h o_h @ Wo[h]
        attn = attn + jnp.dot(oh, wo[h * dk:(h + 1) * dk, :],
                              preferred_element_type=jnp.float32)
    x = x + attn + bo_ref[...]                   # residual + out-proj bias

    # ---- inner linear stack with its norms ----
    x = layer_norm(x, n1la_ref, n1lb_ref)
    x = jnp.dot(x, l1w_ref[...],
                preferred_element_type=jnp.float32) + l1b_ref[...]      # (S, 4D)
    x = layer_norm(x, n2la_ref, n2lb_ref)
    x = jnp.dot(x, l2w_ref[...],
                preferred_element_type=jnp.float32) + l2b_ref[...]      # (S, D)

    # ---- output FeedForward: relu(linear) ----
    x2 = layer_norm(x, n2a_ref, n2b_ref)
    y = jnp.dot(x2, ffw_ref[...],
                preferred_element_type=jnp.float32) + ffb_ref[...]      # (S, Dout)
    o_ref[0] = jnp.maximum(y, 0.0).astype(o_ref.dtype)


def encoder_layer(x, pp, heads, eps=1e-6):
    """One fused pallas_call for a whole Encoder_Decoder_Layer."""
    B, S, D = x.shape
    D3 = pp["wqkv"].shape[1]
    D4 = pp["l1w"].shape[1]
    Dout = pp["ffw"].shape[1]

    def full(shape):
        # Weight / parameter blocks: full-extent, resident across the grid
        # (index_map constant -> DMA'd once, not refetched per step).
        return pl.BlockSpec(shape, lambda b: (0,) * len(shape))

    in_specs = [
        pl.BlockSpec((1, S, D), lambda b: (b, 0, 0)),   # x
        full((D, D3)), full((1, D3)),                   # Wqkv, bqkv
        full((D, D)), full((1, D)),                     # Wo, bo
        full((1, D)), full((1, D)),                     # norm_1
        full((1, D)), full((1, D)),                     # norm_1_linear
        full((D, D4)), full((1, D4)),                   # linear_1
        full((1, D4)), full((1, D4)),                   # norm_2_linear
        full((D4, D)), full((1, D)),                    # linear_2
        full((1, D)), full((1, D)),                     # norm_2
        full((D, Dout)), full((1, Dout)),               # FeedForward linear
    ]

    return pl.pallas_call(
        functools.partial(_fused_layer_kernel, heads=heads, eps=eps),
        out_shape=jax.ShapeDtypeStruct((B, S, Dout), x.dtype),
        grid=(B,),
        in_specs=in_specs,
        out_specs=pl.BlockSpec((1, S, Dout), lambda b: (b, 0, 0)),
        compiler_params=pltpu.CompilerParams(
            dimension_semantics=("parallel",)),     # megacore: batch -> both TCs
    )(x, pp["wqkv"], pp["bqkv"], pp["wo"], pp["bo"],
      pp["n1a"], pp["n1b"], pp["n1la"], pp["n1lb"],
      pp["l1w"], pp["l1b"], pp["n2la"], pp["n2lb"],
      pp["l2w"], pp["l2b"], pp["n2a"], pp["n2b"],
      pp["ffw"], pp["ffb"])


def encoder(x, prepared_params, heads):
    for pp in prepared_params:
        x = encoder_layer(x, pp, heads)
    return x


# ----------------------------------------------------------------------------
# Deterministic parameter init (synthetic; matches torch module shapes)
# ----------------------------------------------------------------------------
def _init_linear(key, din, dout, scale=0.05):
    kw, kb = jax.random.split(key)
    w = scale * jax.random.normal(kw, (din, dout), jnp.float32)   # "W^T" vs torch
    b = scale * jax.random.normal(kb, (dout,), jnp.float32)
    return w, b


def init_layer_params(key, d_model, d_output):
    d4 = int(d_model * 4)
    keys = jax.random.split(key, 7)
    p = {}
    # Norms: alpha=ones, bias=zeros (as in torch Norm.__init__)
    for name, size in [("n1", d_model), ("n2", d_model),
                       ("n1l", d_model), ("n2l", d4)]:
        p[f"{name}_a"] = jnp.ones((size,), jnp.float32)
        p[f"{name}_b"] = jnp.zeros((size,), jnp.float32)
    p["wq"], p["bq"] = _init_linear(keys[0], d_model, d_model)
    p["wk"], p["bk"] = _init_linear(keys[1], d_model, d_model)
    p["wv"], p["bv"] = _init_linear(keys[2], d_model, d_model)
    p["wo"], p["bo"] = _init_linear(keys[3], d_model, d_model)
    p["l1_w"], p["l1_b"] = _init_linear(keys[4], d_model, d4)
    p["l2_w"], p["l2_b"] = _init_linear(keys[5], d4, d_model)
    p["ff_w"], p["ff_b"] = _init_linear(keys[6], d_model, d_output)
    return p


def prepare_layer_params(p):
    """One-time prep: fuse Q|K|V weights and reshape 1-D params to row vectors."""
    D = p["wq"].shape[0]
    return dict(
        wqkv=jnp.concatenate([p["wq"], p["wk"], p["wv"]], axis=1),
        bqkv=jnp.concatenate([p["bq"], p["bk"], p["bv"]]).reshape(1, 3 * D),
        wo=p["wo"], bo=p["bo"].reshape(1, -1),
        n1a=p["n1_a"].reshape(1, -1), n1b=p["n1_b"].reshape(1, -1),
        n1la=p["n1l_a"].reshape(1, -1), n1lb=p["n1l_b"].reshape(1, -1),
        l1w=p["l1_w"], l1b=p["l1_b"].reshape(1, -1),
        n2la=p["n2l_a"].reshape(1, -1), n2lb=p["n2l_b"].reshape(1, -1),
        l2w=p["l2_w"], l2b=p["l2_b"].reshape(1, -1),
        n2a=p["n2_a"].reshape(1, -1), n2b=p["n2_b"].reshape(1, -1),
        ffw=p["ff_w"], ffb=p["ff_b"].reshape(1, -1),
    )


if __name__ == "__main__":
    d_model, heads, d_output = 32, 2, 8
    B, S = 2, 8

    x = jax.random.normal(jax.random.PRNGKey(0), (B, S, d_model), jnp.float32)

    k1, k2, k3 = jax.random.split(jax.random.PRNGKey(42), 3)
    raw_params = [
        init_layer_params(k1, d_model, d_model // 2),        # layer1: 32 -> 16
        init_layer_params(k2, d_model // 2, d_model // 4),   # layer2: 16 -> 8
        init_layer_params(k3, d_model // 4, d_output),       # layer3: 8  -> 8
    ]
    params = [prepare_layer_params(p) for p in raw_params]

    out = jax.jit(lambda xx: encoder(xx, params, heads))(x)
    jax.block_until_ready(out)
    assert out.shape == (B, S, d_output), out.shape
    assert bool(jnp.all(jnp.isfinite(out)))
    print("KERNEL_OK")
</pallas_src>

<mosaic_0001>
module attributes {stable_mosaic.version = 11 : i64} {
  func.func @_fused_layer_kernel(%arg0: i32, %arg1: memref<1x8x32xf32, #tpu.memory_space<vmem>>, %arg2: memref<32x96xf32, #tpu.memory_space<vmem>>, %arg3: memref<1x96xf32, #tpu.memory_space<vmem>>, %arg4: memref<32x32xf32, #tpu.memory_space<vmem>>, %arg5: memref<1x32xf32, #tpu.memory_space<vmem>>, %arg6: memref<1x32xf32, #tpu.memory_space<vmem>>, %arg7: memref<1x32xf32, #tpu.memory_space<vmem>>, %arg8: memref<1x32xf32, #tpu.memory_space<vmem>>, %arg9: memref<1x32xf32, #tpu.memory_space<vmem>>, %arg10: memref<32x128xf32, #tpu.memory_space<vmem>>, %arg11: memref<1x128xf32, #tpu.memory_space<vmem>>, %arg12: memref<1x128xf32, #tpu.memory_space<vmem>>, %arg13: memref<1x128xf32, #tpu.memory_space<vmem>>, %arg14: memref<128x32xf32, #tpu.memory_space<vmem>>, %arg15: memref<1x32xf32, #tpu.memory_space<vmem>>, %arg16: memref<1x32xf32, #tpu.memory_space<vmem>>, %arg17: memref<1x32xf32, #tpu.memory_space<vmem>>, %arg18: memref<32x16xf32, #tpu.memory_space<vmem>>, %arg19: memref<1x16xf32, #tpu.memory_space<vmem>>, %arg20: memref<1x8x16xf32, #tpu.memory_space<vmem>>) attributes {dimension_semantics = [#tpu.dimension_semantics<parallel>], iteration_bounds = array<i64: 2>, scalar_prefetch = 0 : i64, scratch_operands = 0 : i64, tpu.core_type = #tpu.core_type<tc>, window_params = [{transform_indices = @transform_0, window_bounds = array<i64: 1, 8, 32>}, {pipeline_mode = #tpu.pipeline_mode<synchronous>, transform_indices = @transform_1, window_bounds = array<i64: 32, 96>}, {pipeline_mode = #tpu.pipeline_mode<synchronous>, transform_indices = @transform_2, window_bounds = array<i64: 1, 96>}, {pipeline_mode = #tpu.pipeline_mode<synchronous>, transform_indices = @transform_3, window_bounds = array<i64: 32, 32>}, {pipeline_mode = #tpu.pipeline_mode<synchronous>, transform_indices = @transform_4, window_bounds = array<i64: 1, 32>}, {pipeline_mode = #tpu.pipeline_mode<synchronous>, transform_indices = @transform_5, window_bounds = array<i64: 1, 32>}, {pipeline_mode = #tpu.pipeline_mode<synchronous>, transform_indices = @transform_6, window_bounds = array<i64: 1, 32>}, {pipeline_mode = #tpu.pipeline_mode<synchronous>, transform_indices = @transform_7, window_bounds = array<i64: 1, 32>}, {pipeline_mode = #tpu.pipeline_mode<synchronous>, transform_indices = @transform_8, window_bounds = array<i64: 1, 32>}, {pipeline_mode = #tpu.pipeline_mode<synchronous>, transform_indices = @transform_9, window_bounds = array<i64: 32, 128>}, {pipeline_mode = #tpu.pipeline_mode<synchronous>, transform_indices = @transform_10, window_bounds = array<i64: 1, 128>}, {pipeline_mode = #tpu.pipeline_mode<synchronous>, transform_indices = @transform_11, window_bounds = array<i64: 1, 128>}, {pipeline_mode = #tpu.pipeline_mode<synchronous>, transform_indices = @transform_12, window_bounds = array<i64: 1, 128>}, {pipeline_mode = #tpu.pipeline_mode<synchronous>, transform_indices = @transform_13, window_bounds = array<i64: 128, 32>}, {pipeline_mode = #tpu.pipeline_mode<synchronous>, transform_indices = @transform_14, window_bounds = array<i64: 1, 32>}, {pipeline_mode = #tpu.pipeline_mode<synchronous>, transform_indices = @transform_15, window_bounds = array<i64: 1, 32>}, {pipeline_mode = #tpu.pipeline_mode<synchronous>, transform_indices = @transform_16, window_bounds = array<i64: 1, 32>}, {pipeline_mode = #tpu.pipeline_mode<synchronous>, transform_indices = @transform_17, window_bounds = array<i64: 32, 16>}, {pipeline_mode = #tpu.pipeline_mode<synchronous>, transform_indices = @transform_18, window_bounds = array<i64: 1, 16>}, {transform_indices = @transform_19, window_bounds = array<i64: 1, 8, 16>}]} {
    %c0 = arith.constant 0 : index
    %c0_0 = arith.constant 0 : index
    %c0_1 = arith.constant 0 : index
    %0 = vector.load %arg1[%c0, %c0_0, %c0_1] : memref<1x8x32xf32, #tpu.memory_space<vmem>>, vector<1x8x32xf32>
    %1 = vector.shape_cast %0 : vector<1x8x32xf32> to vector<8x32xf32>
    %cst = arith.constant dense<0.000000e+00> : vector<8xf32>
    %2 = vector.multi_reduction <add>, %1, %cst [1] : vector<8x32xf32> to vector<8xf32>
    %3 = vector.shape_cast %2 : vector<8xf32> to vector<8x1xf32>
    %cst_2 = arith.constant 3.200000e+01 : f32
    %4 = vector.broadcast %cst_2 : f32 to vector<8x1xf32>
    %5 = arith.divf %3, %4 : vector<8x1xf32>
    %6 = vector.broadcast %5 : vector<8x1xf32> to vector<8x32xf32>
    %7 = arith.subf %1, %6 : vector<8x32xf32>
    %8 = arith.mulf %7, %7 : vector<8x32xf32>
    %cst_3 = arith.constant dense<0.000000e+00> : vector<8xf32>
    %9 = vector.multi_reduction <add>, %8, %cst_3 [1] : vector<8x32xf32> to vector<8xf32>
    %10 = vector.shape_cast %9 : vector<8xf32> to vector<8x1xf32>
    %cst_4 = arith.constant 0.0322580636 : f32
    %11 = vector.broadcast %cst_4 : f32 to vector<8x1xf32>
    %12 = arith.mulf %10, %11 : vector<8x1xf32>
    %13 = math.sqrt %12 : vector<8x1xf32>
    %cst_5 = arith.constant 9.99999997E-7 : f32
    %14 = vector.broadcast %cst_5 : f32 to vector<8x1xf32>
    %15 = arith.addf %13, %14 : vector<8x1xf32>
    %16 = tpu.reciprocal %15 {approx = true} : vector<8x1xf32> -> vector<8x1xf32>
    %c0_6 = arith.constant 0 : index
    %c0_7 = arith.constant 0 : index
    %17 = vector.load %arg6[%c0_6, %c0_7] : memref<1x32xf32, #tpu.memory_space<vmem>>, vector<1x32xf32>
    %18 = vector.broadcast %17 : vector<1x32xf32> to vector<8x32xf32>
    %19 = arith.mulf %18, %7 : vector<8x32xf32>
    %20 = vector.broadcast %16 : vector<8x1xf32> to vector<8x32xf32>
    %21 = arith.mulf %19, %20 : vector<8x32xf32>
    %c0_8 = arith.constant 0 : index
    %c0_9 = arith.constant 0 : index
    %22 = vector.load %arg7[%c0_8, %c0_9] : memref<1x32xf32, #tpu.memory_space<vmem>>, vector<1x32xf32>
    %23 = vector.broadcast %22 : vector<1x32xf32> to vector<8x32xf32>
    %24 = arith.addf %21, %23 : vector<8x32xf32>
    %c0_10 = arith.constant 0 : index
    %c0_11 = arith.constant 0 : index
    %25 = vector.load %arg2[%c0_10, %c0_11] : memref<32x96xf32, #tpu.memory_space<vmem>>, vector<32x96xf32>
    %cst_12 = arith.constant dense<0.000000e+00> : vector<8x96xf32>
    %26 = tpu.matmul %24, %25, %cst_12 {dimension_numbers = #tpu.dot_dimension_numbers<[1], [0], [0], [1], [0, 0, 1, 1], [], []>} : vector<8x32xf32>, vector<32x96xf32>, vector<8x96xf32> -> vector<8x96xf32>
    %c0_13 = arith.constant 0 : index
    %c0_14 = arith.constant 0 : index
    %27 = vector.load %arg3[%c0_13, %c0_14] : memref<1x96xf32, #tpu.memory_space<vmem>>, vector<1x96xf32>
    %28 = vector.broadcast %27 : vector<1x96xf32> to vector<8x96xf32>
    %29 = arith.addf %26, %28 : vector<8x96xf32>
    %c0_15 = arith.constant 0 : index
    %c0_16 = arith.constant 0 : index
    %30 = vector.load %arg4[%c0_15, %c0_16] : memref<32x32xf32, #tpu.memory_space<vmem>>, vector<32x32xf32>
    %cst_17 = arith.constant 0.000000e+00 : f32
    %31 = vector.broadcast %cst_17 : f32 to vector<8x32xf32>
    %32 = vector.extract_strided_slice %29 {offsets = [0, 0], sizes = [8, 16], strides = [1, 1]} : vector<8x96xf32> to vector<8x16xf32>
    %33 = vector.extract_strided_slice %29 {offsets = [0, 32], sizes = [8, 16], strides = [1, 1]} : vector<8x96xf32> to vector<8x16xf32>
    %34 = vector.extract_strided_slice %29 {offsets = [0, 64], sizes = [8, 16], strides = [1, 1]} : vector<8x96xf32> to vector<8x16xf32>
    %cst_18 = arith.constant dense<0.000000e+00> : vector<8x8xf32>
    %35 = tpu.matmul %32, %33, %cst_18 {dimension_numbers = #tpu.dot_dimension_numbers<[1], [1], [0], [0], [0, 0, 1, 0], [], []>} : vector<8x16xf32>, vector<8x16xf32>, vector<8x8xf32> -> vector<8x8xf32>
    %cst_19 = arith.constant 2.500000e-01 : f32
    %36 = vector.broadcast %cst_19 : f32 to vector<8x8xf32>
    %37 = arith.mulf %35, %36 : vector<8x8xf32>
    %cst_20 = arith.constant dense<0xFF800000> : vector<8xf32>
    %38 = vector.multi_reduction <maximumf>, %37, %cst_20 [1] : vector<8x8xf32> to vector<8xf32>
    %39 = vector.shape_cast %38 : vector<8xf32> to vector<8x1xf32>
    %40 = vector.broadcast %39 : vector<8x1xf32> to vector<8x8xf32>
    %41 = arith.subf %37, %40 : vector<8x8xf32>
    %42 = math.exp %41 : vector<8x8xf32>
    %cst_21 = arith.constant dense<0.000000e+00> : vector<8xf32>
    %43 = vector.multi_reduction <add>, %42, %cst_21 [1] : vector<8x8xf32> to vector<8xf32>
    %44 = vector.shape_cast %43 : vector<8xf32> to vector<8x1xf32>
    %45 = tpu.reciprocal %44 {approx = true} : vector<8x1xf32> -> vector<8x1xf32>
    %46 = vector.broadcast %45 : vector<8x1xf32> to vector<8x8xf32>
    %47 = arith.mulf %42, %46 : vector<8x8xf32>
    %cst_22 = arith.constant dense<0.000000e+00> : vector<8x16xf32>
    %48 = tpu.matmul %47, %34, %cst_22 {dimension_numbers = #tpu.dot_dimension_numbers<[1], [0], [0], [1], [0, 0, 1, 1], [], []>} : vector<8x8xf32>, vector<8x16xf32>, vector<8x16xf32> -> vector<8x16xf32>
    %49 = vector.extract_strided_slice %30 {offsets = [0, 0], sizes = [16, 32], strides = [1, 1]} : vector<32x32xf32> to vector<16x32xf32>
    %cst_23 = arith.constant dense<0.000000e+00> : vector<8x32xf32>
    %50 = tpu.matmul %48, %49, %cst_23 {dimension_numbers = #tpu.dot_dimension_numbers<[1], [0], [0], [1], [0, 0, 1, 1], [], []>} : vector<8x16xf32>, vector<16x32xf32>, vector<8x32xf32> -> vector<8x32xf32>
    %51 = arith.addf %31, %50 : vector<8x32xf32>
    %52 = vector.extract_strided_slice %29 {offsets = [0, 16], sizes = [8, 16], strides = [1, 1]} : vector<8x96xf32> to vector<8x16xf32>
    %53 = vector.extract_strided_slice %29 {offsets = [0, 48], sizes = [8, 16], strides = [1, 1]} : vector<8x96xf32> to vector<8x16xf32>
    %54 = vector.extract_strided_slice %29 {offsets = [0, 80], sizes = [8, 16], strides = [1, 1]} : vector<8x96xf32> to vector<8x16xf32>
    %cst_24 = arith.constant dense<0.000000e+00> : vector<8x8xf32>
    %55 = tpu.matmul %52, %53, %cst_24 {dimension_numbers = #tpu.dot_dimension_numbers<[1], [1], [0], [0], [0, 0, 1, 0], [], []>} : vector<8x16xf32>, vector<8x16xf32>, vector<8x8xf32> -> vector<8x8xf32>
    %cst_25 = arith.constant 2.500000e-01 : f32
    %56 = vector.broadcast %cst_25 : f32 to vector<8x8xf32>
    %57 = arith.mulf %55, %56 : vector<8x8xf32>
    %cst_26 = arith.constant dense<0xFF800000> : vector<8xf32>
    %58 = vector.multi_reduction <maximumf>, %57, %cst_26 [1] : vector<8x8xf32> to vector<8xf32>
    %59 = vector.shape_cast %58 : vector<8xf32> to vector<8x1xf32>
    %60 = vector.broadcast %59 : vector<8x1xf32> to vector<8x8xf32>
    %61 = arith.subf %57, %60 : vector<8x8xf32>
    %62 = math.exp %61 : vector<8x8xf32>
    %cst_27 = arith.constant dense<0.000000e+00> : vector<8xf32>
    %63 = vector.multi_reduction <add>, %62, %cst_27 [1] : vector<8x8xf32> to vector<8xf32>
    %64 = vector.shape_cast %63 : vector<8xf32> to vector<8x1xf32>
    %65 = tpu.reciprocal %64 {approx = true} : vector<8x1xf32> -> vector<8x1xf32>
    %66 = vector.broadcast %65 : vector<8x1xf32> to vector<8x8xf32>
    %67 = arith.mulf %62, %66 : vector<8x8xf32>
    %cst_28 = arith.constant dense<0.000000e+00> : vector<8x16xf32>
    %68 = tpu.matmul %67, %54, %cst_28 {dimension_numbers = #tpu.dot_dimension_numbers<[1], [0], [0], [1], [0, 0, 1, 1], [], []>} : vector<8x8xf32>, vector<8x16xf32>, vector<8x16xf32> -> vector<8x16xf32>
    %69 = vector.extract_strided_slice %30 {offsets = [16, 0], sizes = [16, 32], strides = [1, 1]} : vector<32x32xf32> to vector<16x32xf32>
    %cst_29 = arith.constant dense<0.000000e+00> : vector<8x32xf32>
    %70 = tpu.matmul %68, %69, %cst_29 {dimension_numbers = #tpu.dot_dimension_numbers<[1], [0], [0], [1], [0, 0, 1, 1], [], []>} : vector<8x16xf32>, vector<16x32xf32>, vector<8x32xf32> -> vector<8x32xf32>
    %71 = arith.addf %51, %70 : vector<8x32xf32>
    %72 = arith.addf %1, %71 : vector<8x32xf32>
    %c0_30 = arith.constant 0 : index
    %c0_31 = arith.constant 0 : index
    %73 = vector.load %arg5[%c0_30, %c0_31] : memref<1x32xf32, #tpu.memory_space<vmem>>, vector<1x32xf32>
    %74 = vector.broadcast %73 : vector<1x32xf32> to vector<8x32xf32>
    %75 = arith.addf %72, %74 : vector<8x32xf32>
    %cst_32 = arith.constant dense<0.000000e+00> : vector<8xf32>
    %76 = vector.multi_reduction <add>, %75, %cst_32 [1] : vector<8x32xf32> to vector<8xf32>
    %77 = vector.shape_cast %76 : vector<8xf32> to vector<8x1xf32>
    %cst_33 = arith.constant 3.200000e+01 : f32
    %78 = vector.broadcast %cst_33 : f32 to vector<8x1xf32>
    %79 = arith.divf %77, %78 : vector<8x1xf32>
    %80 = vector.broadcast %79 : vector<8x1xf32> to vector<8x32xf32>
    %81 = arith.subf %75, %80 : vector<8x32xf32>
    %82 = arith.mulf %81, %81 : vector<8x32xf32>
    %cst_34 = arith.constant dense<0.000000e+00> : vector<8xf32>
    %83 = vector.multi_reduction <add>, %82, %cst_34 [1] : vector<8x32xf32> to vector<8xf32>
    %84 = vector.shape_cast %83 : vector<8xf32> to vector<8x1xf32>
    %cst_35 = arith.constant 0.0322580636 : f32
    %85 = vector.broadcast %cst_35 : f32 to vector<8x1xf32>
    %86 = arith.mulf %84, %85 : vector<8x1xf32>
    %87 = math.sqrt %86 : vector<8x1xf32>
    %cst_36 = arith.constant 9.99999997E-7 : f32
    %88 = vector.broadcast %cst_36 : f32 to vector<8x1xf32>
    %89 = arith.addf %87, %88 : vector<8x1xf32>
    %90 = tpu.reciprocal %89 {approx = true} : vector<8x1xf32> -> vector<8x1xf32>
    %c0_37 = arith.constant 0 : index
    %c0_38 = arith.constant 0 : index
    %91 = vector.load %arg8[%c0_37, %c0_38] : memref<1x32xf32, #tpu.memory_space<vmem>>, vector<1x32xf32>
    %92 = vector.broadcast %91 : vector<1x32xf32> to vector<8x32xf32>
    %93 = arith.mulf %92, %81 : vector<8x32xf32>
    %94 = vector.broadcast %90 : vector<8x1xf32> to vector<8x32xf32>
    %95 = arith.mulf %93, %94 : vector<8x32xf32>
    %c0_39 = arith.constant 0 : index
    %c0_40 = arith.constant 0 : index
    %96 = vector.load %arg9[%c0_39, %c0_40] : memref<1x32xf32, #tpu.memory_space<vmem>>, vector<1x32xf32>
    %97 = vector.broadcast %96 : vector<1x32xf32> to vector<8x32xf32>
    %98 = arith.addf %95, %97 : vector<8x32xf32>
    %c0_41 = arith.constant 0 : index
    %c0_42 = arith.constant 0 : index
    %99 = vector.load %arg10[%c0_41, %c0_42] : memref<32x128xf32, #tpu.memory_space<vmem>>, vector<32x128xf32>
    %cst_43 = arith.constant dense<0.000000e+00> : vector<8x128xf32>
    %100 = tpu.matmul %98, %99, %cst_43 {dimension_numbers = #tpu.dot_dimension_numbers<[1], [0], [0], [1], [0, 0, 1, 1], [], []>} : vector<8x32xf32>, vector<32x128xf32>, vector<8x128xf32> -> vector<8x128xf32>
    %c0_44 = arith.constant 0 : index
    %c0_45 = arith.constant 0 : index
    %101 = vector.load %arg11[%c0_44, %c0_45] : memref<1x128xf32, #tpu.memory_space<vmem>>, vector<1x128xf32>
    %102 = vector.broadcast %101 : vector<1x128xf32> to vector<8x128xf32>
    %103 = arith.addf %100, %102 : vector<8x128xf32>
    %cst_46 = arith.constant dense<0.000000e+00> : vector<8xf32>
    %104 = vector.multi_reduction <add>, %103, %cst_46 [1] : vector<8x128xf32> to vector<8xf32>
    %105 = vector.shape_cast %104 : vector<8xf32> to vector<8x1xf32>
    %cst_47 = arith.constant 1.280000e+02 : f32
    %106 = vector.broadcast %cst_47 : f32 to vector<8x1xf32>
    %107 = arith.divf %105, %106 : vector<8x1xf32>
    %108 = vector.broadcast %107 : vector<8x1xf32> to vector<8x128xf32>
    %109 = arith.subf %103, %108 : vector<8x128xf32>
    %110 = arith.mulf %109, %109 : vector<8x128xf32>
    %cst_48 = arith.constant dense<0.000000e+00> : vector<8xf32>
    %111 = vector.multi_reduction <add>, %110, %cst_48 [1] : vector<8x128xf32> to vector<8xf32>
    %112 = vector.shape_cast %111 : vector<8xf32> to vector<8x1xf32>
    %cst_49 = arith.constant 0.00787401571 : f32
    %113 = vector.broadcast %cst_49 : f32 to vector<8x1xf32>
    %114 = arith.mulf %112, %113 : vector<8x1xf32>
    %115 = math.sqrt %114 : vector<8x1xf32>
    %cst_50 = arith.constant 9.99999997E-7 : f32
    %116 = vector.broadcast %cst_50 : f32 to vector<8x1xf32>
    %117 = arith.addf %115, %116 : vector<8x1xf32>
    %118 = tpu.reciprocal %117 {approx = true} : vector<8x1xf32> -> vector<8x1xf32>
    %c0_51 = arith.constant 0 : index
    %c0_52 = arith.constant 0 : index
    %119 = vector.load %arg12[%c0_51, %c0_52] : memref<1x128xf32, #tpu.memory_space<vmem>>, vector<1x128xf32>
    %120 = vector.broadcast %119 : vector<1x128xf32> to vector<8x128xf32>
    %121 = arith.mulf %120, %109 : vector<8x128xf32>
    %122 = vector.broadcast %118 : vector<8x1xf32> to vector<8x128xf32>
    %123 = arith.mulf %121, %122 : vector<8x128xf32>
    %c0_53 = arith.constant 0 : index
    %c0_54 = arith.constant 0 : index
    %124 = vector.load %arg13[%c0_53, %c0_54] : memref<1x128xf32, #tpu.memory_space<vmem>>, vector<1x128xf32>
    %125 = vector.broadcast %124 : vector<1x128xf32> to vector<8x128xf32>
    %126 = arith.addf %123, %125 : vector<8x128xf32>
    %c0_55 = arith.constant 0 : index
    %c0_56 = arith.constant 0 : index
    %127 = vector.load %arg14[%c0_55, %c0_56] : memref<128x32xf32, #tpu.memory_space<vmem>>, vector<128x32xf32>
    %cst_57 = arith.constant dense<0.000000e+00> : vector<8x32xf32>
    %128 = tpu.matmul %126, %127, %cst_57 {dimension_numbers = #tpu.dot_dimension_numbers<[1], [0], [0], [1], [0, 0, 1, 1], [], []>} : vector<8x128xf32>, vector<128x32xf32>, vector<8x32xf32> -> vector<8x32xf32>
    %c0_58 = arith.constant 0 : index
    %c0_59 = arith.constant 0 : index
    %129 = vector.load %arg15[%c0_58, %c0_59] : memref<1x32xf32, #tpu.memory_space<vmem>>, vector<1x32xf32>
    %130 = vector.broadcast %129 : vector<1x32xf32> to vector<8x32xf32>
    %131 = arith.addf %128, %130 : vector<8x32xf32>
    %cst_60 = arith.constant dense<0.000000e+00> : vector<8xf32>
    %132 = vector.multi_reduction <add>, %131, %cst_60 [1] : vector<8x32xf32> to vector<8xf32>
    %133 = vector.shape_cast %132 : vector<8xf32> to vector<8x1xf32>
    %cst_61 = arith.constant 3.200000e+01 : f32
    %134 = vector.broadcast %cst_61 : f32 to vector<8x1xf32>
    %135 = arith.divf %133, %134 : vector<8x1xf32>
    %136 = vector.broadcast %135 : vector<8x1xf32> to vector<8x32xf32>
    %137 = arith.subf %131, %136 : vector<8x32xf32>
    %138 = arith.mulf %137, %137 : vector<8x32xf32>
    %cst_62 = arith.constant dense<0.000000e+00> : vector<8xf32>
    %139 = vector.multi_reduction <add>, %138, %cst_62 [1] : vector<8x32xf32> to vector<8xf32>
    %140 = vector.shape_cast %139 : vector<8xf32> to vector<8x1xf32>
    %cst_63 = arith.constant 0.0322580636 : f32
    %141 = vector.broadcast %cst_63 : f32 to vector<8x1xf32>
    %142 = arith.mulf %140, %141 : vector<8x1xf32>
    %143 = math.sqrt %142 : vector<8x1xf32>
    %cst_64 = arith.constant 9.99999997E-7 : f32
    %144 = vector.broadcast %cst_64 : f32 to vector<8x1xf32>
    %145 = arith.addf %143, %144 : vector<8x1xf32>
    %146 = tpu.reciprocal %145 {approx = true} : vector<8x1xf32> -> vector<8x1xf32>
    %c0_65 = arith.constant 0 : index
    %c0_66 = arith.constant 0 : index
    %147 = vector.load %arg16[%c0_65, %c0_66] : memref<1x32xf32, #tpu.memory_space<vmem>>, vector<1x32xf32>
    %148 = vector.broadcast %147 : vector<1x32xf32> to vector<8x32xf32>
    %149 = arith.mulf %148, %137 : vector<8x32xf32>
    %150 = vector.broadcast %146 : vector<8x1xf32> to vector<8x32xf32>
    %151 = arith.mulf %149, %150 : vector<8x32xf32>
    %c0_67 = arith.constant 0 : index
    %c0_68 = arith.constant 0 : index
    %152 = vector.load %arg17[%c0_67, %c0_68] : memref<1x32xf32, #tpu.memory_space<vmem>>, vector<1x32xf32>
    %153 = vector.broadcast %152 : vector<1x32xf32> to vector<8x32xf32>
    %154 = arith.addf %151, %153 : vector<8x32xf32>
    %c0_69 = arith.constant 0 : index
    %c0_70 = arith.constant 0 : index
    %155 = vector.load %arg18[%c0_69, %c0_70] : memref<32x16xf32, #tpu.memory_space<vmem>>, vector<32x16xf32>
    %cst_71 = arith.constant dense<0.000000e+00> : vector<8x16xf32>
    %156 = tpu.matmul %154, %155, %cst_71 {dimension_numbers = #tpu.dot_dimension_numbers<[1], [0], [0], [1], [0, 0, 1, 1], [], []>} : vector<8x32xf32>, vector<32x16xf32>, vector<8x16xf32> -> vector<8x16xf32>
    %c0_72 = arith.constant 0 : index
    %c0_73 = arith.constant 0 : index
    %157 = vector.load %arg19[%c0_72, %c0_73] : memref<1x16xf32, #tpu.memory_space<vmem>>, vector<1x16xf32>
    %158 = vector.broadcast %157 : vector<1x16xf32> to vector<8x16xf32>
    %159 = arith.addf %156, %158 : vector<8x16xf32>
    %cst_74 = arith.constant 0.000000e+00 : f32
    %160 = vector.broadcast %cst_74 : f32 to vector<8x16xf32>
    %161 = arith.maximumf %159, %160 : vector<8x16xf32>
    %c0_75 = arith.constant 0 : index
    %c0_76 = arith.constant 0 : index
    %c0_77 = arith.constant 0 : index
    %162 = vector.load %arg20[%c0_75, %c0_76, %c0_77] : memref<1x8x16xf32, #tpu.memory_space<vmem>>, vector<1x8x16xf32>
    %163 = vector.shape_cast %162 : vector<1x8x16xf32> to vector<8x16xf32>
    %164 = vector.shape_cast %161 : vector<8x16xf32> to vector<1x8x16xf32>
    tpu.vector_store %arg20[%c0_75, %c0_76, %c0_77], %164 {strides = array<i32>} : memref<1x8x16xf32, #tpu.memory_space<vmem>>, vector<1x8x16xf32>,
    return
  }
  func.func @transform_0(%arg0: i32) -> (i32, i32, i32) {
    %c0_i32 = arith.constant 0 : i32
    %c0_i32_0 = arith.constant 0 : i32
    %c0_i32_1 = arith.constant 0 : i32
    return %arg0, %c0_i32, %c0_i32_0 : i32, i32, i32
  }
  func.func @transform_1(%arg0: i32) -> (i32, i32) {
    %c0_i32 = arith.constant 0 : i32
    %c0_i32_0 = arith.constant 0 : i32
    %c0_i32_1 = arith.constant 0 : i32
    return %c0_i32, %c0_i32_0 : i32, i32
  }
  func.func @transform_2(%arg0: i32) -> (i32, i32) {
    %c0_i32 = arith.constant 0 : i32
    %c0_i32_0 = arith.constant 0 : i32
    %c0_i32_1 = arith.constant 0 : i32
    return %c0_i32, %c0_i32_0 : i32, i32
  }
  func.func @transform_3(%arg0: i32) -> (i32, i32) {
    %c0_i32 = arith.constant 0 : i32
    %c0_i32_0 = arith.constant 0 : i32
    %c0_i32_1 = arith.constant 0 : i32
    return %c0_i32, %c0_i32_0 : i32, i32
  }
  func.func @transform_4(%arg0: i32) -> (i32, i32) {
    %c0_i32 = arith.constant 0 : i32
    %c0_i32_0 = arith.constant 0 : i32
    %c0_i32_1 = arith.constant 0 : i32
    return %c0_i32, %c0_i32_0 : i32, i32
  }
  func.func @transform_5(%arg0: i32) -> (i32, i32) {
    %c0_i32 = arith.constant 0 : i32
    %c0_i32_0 = arith.constant 0 : i32
    %c0_i32_1 = arith.constant 0 : i32
    return %c0_i32, %c0_i32_0 : i32, i32
  }
  func.func @transform_6(%arg0: i32) -> (i32, i32) {
    %c0_i32 = arith.constant 0 : i32
    %c0_i32_0 = arith.constant 0 : i32
    %c0_i32_1 = arith.constant 0 : i32
    return %c0_i32, %c0_i32_0 : i32, i32
  }
  func.func @transform_7(%arg0: i32) -> (i32, i32) {
    %c0_i32 = arith.constant 0 : i32
    %c0_i32_0 = arith.constant 0 : i32
    %c0_i32_1 = arith.constant 0 : i32
    return %c0_i32, %c0_i32_0 : i32, i32
  }
  func.func @transform_8(%arg0: i32) -> (i32, i32) {
    %c0_i32 = arith.constant 0 : i32
    %c0_i32_0 = arith.constant 0 : i32
    %c0_i32_1 = arith.constant 0 : i32
    return %c0_i32, %c0_i32_0 : i32, i32
  }
  func.func @transform_9(%arg0: i32) -> (i32, i32) {
    %c0_i32 = arith.constant 0 : i32
    %c0_i32_0 = arith.constant 0 : i32
    %c0_i32_1 = arith.constant 0 : i32
    return %c0_i32, %c0_i32_0 : i32, i32
  }
  func.func @transform_10(%arg0: i32) -> (i32, i32) {
    %c0_i32 = arith.constant 0 : i32
    %c0_i32_0 = arith.constant 0 : i32
    %c0_i32_1 = arith.constant 0 : i32
    return %c0_i32, %c0_i32_0 : i32, i32
  }
  func.func @transform_11(%arg0: i32) -> (i32, i32) {
    %c0_i32 = arith.constant 0 : i32
    %c0_i32_0 = arith.constant 0 : i32
    %c0_i32_1 = arith.constant 0 : i32
    return %c0_i32, %c0_i32_0 : i32, i32
  }
  func.func @transform_12(%arg0: i32) -> (i32, i32) {
    %c0_i32 = arith.constant 0 : i32
    %c0_i32_0 = arith.constant 0 : i32
    %c0_i32_1 = arith.constant 0 : i32
    return %c0_i32, %c0_i32_0 : i32, i32
  }
  func.func @transform_13(%arg0: i32) -> (i32, i32) {
    %c0_i32 = arith.constant 0 : i32
    %c0_i32_0 = arith.constant 0 : i32
    %c0_i32_1 = arith.constant 0 : i32
    return %c0_i32, %c0_i32_0 : i32, i32
  }
  func.func @transform_14(%arg0: i32) -> (i32, i32) {
    %c0_i32 = arith.constant 0 : i32
    %c0_i32_0 = arith.constant 0 : i32
    %c0_i32_1 = arith.constant 0 : i32
    return %c0_i32, %c0_i32_0 : i32, i32
  }
  func.func @transform_15(%arg0: i32) -> (i32, i32) {
    %c0_i32 = arith.constant 0 : i32
    %c0_i32_0 = arith.constant 0 : i32
    %c0_i32_1 = arith.constant 0 : i32
    return %c0_i32, %c0_i32_0 : i32, i32
  }
  func.func @transform_16(%arg0: i32) -> (i32, i32) {
    %c0_i32 = arith.constant 0 : i32
    %c0_i32_0 = arith.constant 0 : i32
    %c0_i32_1 = arith.constant 0 : i32
    return %c0_i32, %c0_i32_0 : i32, i32
  }
  func.func @transform_17(%arg0: i32) -> (i32, i32) {
    %c0_i32 = arith.constant 0 : i32
    %c0_i32_0 = arith.constant 0 : i32
    %c0_i32_1 = arith.constant 0 : i32
    return %c0_i32, %c0_i32_0 : i32, i32
  }
  func.func @transform_18(%arg0: i32) -> (i32, i32) {
    %c0_i32 = arith.constant 0 : i32
    %c0_i32_0 = arith.constant 0 : i32
    %c0_i32_1 = arith.constant 0 : i32
    return %c0_i32, %c0_i32_0 : i32, i32
  }
  func.func @transform_19(%arg0: i32) -> (i32, i32, i32) {
    %c0_i32 = arith.constant 0 : i32
    %c0_i32_0 = arith.constant 0 : i32
    %c0_i32_1 = arith.constant 0 : i32
    return %arg0, %c0_i32, %c0_i32_0 : i32, i32, i32
  }
}

module attributes {stable_mosaic.version = 11 : i64} {
  func.func @_fused_layer_kernel(%arg0: i32, %arg1: memref<1x8x8xf32, #tpu.memory_space<vmem>>, %arg2: memref<8x24xf32, #tpu.memory_space<vmem>>, %arg3: memref<1x24xf32, #tpu.memory_space<vmem>>, %arg4: memref<8x8xf32, #tpu.memory_space<vmem>>, %arg5: memref<1x8xf32, #tpu.memory_space<vmem>>, %arg6: memref<1x8xf32, #tpu.memory_space<vmem>>, %arg7: memref<1x8xf32, #tpu.memory_space<vmem>>, %arg8: memref<1x8xf32, #tpu.memory_space<vmem>>, %arg9: memref<1x8xf32, #tpu.memory_space<vmem>>, %arg10: memref<8x32xf32, #tpu.memory_space<vmem>>, %arg11: memref<1x32xf32, #tpu.memory_space<vmem>>, %arg12: memref<1x32xf32, #tpu.memory_space<vmem>>, %arg13: memref<1x32xf32, #tpu.memory_space<vmem>>, %arg14: memref<32x8xf32, #tpu.memory_space<vmem>>, %arg15: memref<1x8xf32, #tpu.memory_space<vmem>>, %arg16: memref<1x8xf32, #tpu.memory_space<vmem>>, %arg17: memref<1x8xf32, #tpu.memory_space<vmem>>, %arg18: memref<8x8xf32, #tpu.memory_space<vmem>>, %arg19: memref<1x8xf32, #tpu.memory_space<vmem>>, %arg20: memref<1x8x8xf32, #tpu.memory_space<vmem>>) attributes {dimension_semantics = [#tpu.dimension_semantics<parallel>], iteration_bounds = array<i64: 2>, scalar_prefetch = 0 : i64, scratch_operands = 0 : i64, tpu.core_type = #tpu.core_type<tc>, window_params = [{transform_indices = @transform_0, window_bounds = array<i64: 1, 8, 8>}, {pipeline_mode = #tpu.pipeline_mode<synchronous>, transform_indices = @transform_1, window_bounds = array<i64: 8, 24>}, {pipeline_mode = #tpu.pipeline_mode<synchronous>, transform_indices = @transform_2, window_bounds = array<i64: 1, 24>}, {pipeline_mode = #tpu.pipeline_mode<synchronous>, transform_indices = @transform_3, window_bounds = array<i64: 8, 8>}, {pipeline_mode = #tpu.pipeline_mode<synchronous>, transform_indices = @transform_4, window_bounds = array<i64: 1, 8>}, {pipeline_mode = #tpu.pipeline_mode<synchronous>, transform_indices = @transform_5, window_bounds = array<i64: 1, 8>}, {pipeline_mode = #tpu.pipeline_mode<synchronous>, transform_indices = @transform_6, window_bounds = array<i64: 1, 8>}, {pipeline_mode = #tpu.pipeline_mode<synchronous>, transform_indices = @transform_7, window_bounds = array<i64: 1, 8>}, {pipeline_mode = #tpu.pipeline_mode<synchronous>, transform_indices = @transform_8, window_bounds = array<i64: 1, 8>}, {pipeline_mode = #tpu.pipeline_mode<synchronous>, transform_indices = @transform_9, window_bounds = array<i64: 8, 32>}, {pipeline_mode = #tpu.pipeline_mode<synchronous>, transform_indices = @transform_10, window_bounds = array<i64: 1, 32>}, {pipeline_mode = #tpu.pipeline_mode<synchronous>, transform_indices = @transform_11, window_bounds = array<i64: 1, 32>}, {pipeline_mode = #tpu.pipeline_mode<synchronous>, transform_indices = @transform_12, window_bounds = array<i64: 1, 32>}, {pipeline_mode = #tpu.pipeline_mode<synchronous>, transform_indices = @transform_13, window_bounds = array<i64: 32, 8>}, {pipeline_mode = #tpu.pipeline_mode<synchronous>, transform_indices = @transform_14, window_bounds = array<i64: 1, 8>}, {pipeline_mode = #tpu.pipeline_mode<synchronous>, transform_indices = @transform_15, window_bounds = array<i64: 1, 8>}, {pipeline_mode = #tpu.pipeline_mode<synchronous>, transform_indices = @transform_16, window_bounds = array<i64: 1, 8>}, {pipeline_mode = #tpu.pipeline_mode<synchronous>, transform_indices = @transform_17, window_bounds = array<i64: 8, 8>}, {pipeline_mode = #tpu.pipeline_mode<synchronous>, transform_indices = @transform_18, window_bounds = array<i64: 1, 8>}, {transform_indices = @transform_19, window_bounds = array<i64: 1, 8, 8>}]} {
    %c0 = arith.constant 0 : index
    %c0_0 = arith.constant 0 : index
    %c0_1 = arith.constant 0 : index
    %0 = vector.load %arg1[%c0, %c0_0, %c0_1] : memref<1x8x8xf32, #tpu.memory_space<vmem>>, vector<1x8x8xf32>
    %1 = vector.shape_cast %0 : vector<1x8x8xf32> to vector<8x8xf32>
    %cst = arith.constant dense<0.000000e+00> : vector<8xf32>
    %2 = vector.multi_reduction <add>, %1, %cst [1] : vector<8x8xf32> to vector<8xf32>
    %3 = vector.shape_cast %2 : vector<8xf32> to vector<8x1xf32>
    %cst_2 = arith.constant 8.000000e+00 : f32
    %4 = vector.broadcast %cst_2 : f32 to vector<8x1xf32>
    %5 = arith.divf %3, %4 : vector<8x1xf32>
    %6 = vector.broadcast %5 : vector<8x1xf32> to vector<8x8xf32>
    %7 = arith.subf %1, %6 : vector<8x8xf32>
    %8 = arith.mulf %7, %7 : vector<8x8xf32>
    %cst_3 = arith.constant dense<0.000000e+00> : vector<8xf32>
    %9 = vector.multi_reduction <add>, %8, %cst_3 [1] : vector<8x8xf32> to vector<8xf32>
    %10 = vector.shape_cast %9 : vector<8xf32> to vector<8x1xf32>
    %cst_4 = arith.constant 0.142857149 : f32
    %11 = vector.broadcast %cst_4 : f32 to vector<8x1xf32>
    %12 = arith.mulf %10, %11 : vector<8x1xf32>
    %13 = math.sqrt %12 : vector<8x1xf32>
    %cst_5 = arith.constant 9.99999997E-7 : f32
    %14 = vector.broadcast %cst_5 : f32 to vector<8x1xf32>
    %15 = arith.addf %13, %14 : vector<8x1xf32>
    %16 = tpu.reciprocal %15 {approx = true} : vector<8x1xf32> -> vector<8x1xf32>
    %c0_6 = arith.constant 0 : index
    %c0_7 = arith.constant 0 : index
    %17 = vector.load %arg6[%c0_6, %c0_7] : memref<1x8xf32, #tpu.memory_space<vmem>>, vector<1x8xf32>
    %18 = vector.broadcast %17 : vector<1x8xf32> to vector<8x8xf32>
    %19 = arith.mulf %18, %7 : vector<8x8xf32>
    %20 = vector.broadcast %16 : vector<8x1xf32> to vector<8x8xf32>
    %21 = arith.mulf %19, %20 : vector<8x8xf32>
    %c0_8 = arith.constant 0 : index
    %c0_9 = arith.constant 0 : index
    %22 = vector.load %arg7[%c0_8, %c0_9] : memref<1x8xf32, #tpu.memory_space<vmem>>, vector<1x8xf32>
    %23 = vector.broadcast %22 : vector<1x8xf32> to vector<8x8xf32>
    %24 = arith.addf %21, %23 : vector<8x8xf32>
    %c0_10 = arith.constant 0 : index
    %c0_11 = arith.constant 0 : index
    %25 = vector.load %arg2[%c0_10, %c0_11] : memref<8x24xf32, #tpu.memory_space<vmem>>, vector<8x24xf32>
    %cst_12 = arith.constant dense<0.000000e+00> : vector<8x24xf32>
    %26 = tpu.matmul %24, %25, %cst_12 {dimension_numbers = #tpu.dot_dimension_numbers<[1], [0], [0], [1], [0, 0, 1, 1], [], []>} : vector<8x8xf32>, vector<8x24xf32>, vector<8x24xf32> -> vector<8x24xf32>
    %c0_13 = arith.constant 0 : index
    %c0_14 = arith.constant 0 : index
    %27 = vector.load %arg3[%c0_13, %c0_14] : memref<1x24xf32, #tpu.memory_space<vmem>>, vector<1x24xf32>
    %28 = vector.broadcast %27 : vector<1x24xf32> to vector<8x24xf32>
    %29 = arith.addf %26, %28 : vector<8x24xf32>
    %c0_15 = arith.constant 0 : index
    %c0_16 = arith.constant 0 : index
    %30 = vector.load %arg4[%c0_15, %c0_16] : memref<8x8xf32, #tpu.memory_space<vmem>>, vector<8x8xf32>
    %cst_17 = arith.constant 0.000000e+00 : f32
    %31 = vector.broadcast %cst_17 : f32 to vector<8x8xf32>
    %32 = vector.extract_strided_slice %29 {offsets = [0, 0], sizes = [8, 4], strides = [1, 1]} : vector<8x24xf32> to vector<8x4xf32>
    %33 = vector.extract_strided_slice %29 {offsets = [0, 8], sizes = [8, 4], strides = [1, 1]} : vector<8x24xf32> to vector<8x4xf32>
    %34 = vector.extract_strided_slice %29 {offsets = [0, 16], sizes = [8, 4], strides = [1, 1]} : vector<8x24xf32> to vector<8x4xf32>
    %cst_18 = arith.constant dense<0.000000e+00> : vector<8x8xf32>
    %35 = tpu.matmul %32, %33, %cst_18 {dimension_numbers = #tpu.dot_dimension_numbers<[1], [1], [0], [0], [0, 0, 1, 0], [], []>} : vector<8x4xf32>, vector<8x4xf32>, vector<8x8xf32> -> vector<8x8xf32>
    %cst_19 = arith.constant 5.000000e-01 : f32
    %36 = vector.broadcast %cst_19 : f32 to vector<8x8xf32>
    %37 = arith.mulf %35, %36 : vector<8x8xf32>
    %cst_20 = arith.constant dense<0xFF800000> : vector<8xf32>
    %38 = vector.multi_reduction <maximumf>, %37, %cst_20 [1] : vector<8x8xf32> to vector<8xf32>
    %39 = vector.shape_cast %38 : vector<8xf32> to vector<8x1xf32>
    %40 = vector.broadcast %39 : vector<8x1xf32> to vector<8x8xf32>
    %41 = arith.subf %37, %40 : vector<8x8xf32>
    %42 = math.exp %41 : vector<8x8xf32>
    %cst_21 = arith.constant dense<0.000000e+00> : vector<8xf32>
    %43 = vector.multi_reduction <add>, %42, %cst_21 [1] : vector<8x8xf32> to vector<8xf32>
    %44 = vector.shape_cast %43 : vector<8xf32> to vector<8x1xf32>
    %45 = tpu.reciprocal %44 {approx = true} : vector<8x1xf32> -> vector<8x1xf32>
    %46 = vector.broadcast %45 : vector<8x1xf32> to vector<8x8xf32>
    %47 = arith.mulf %42, %46 : vector<8x8xf32>
    %cst_22 = arith.constant dense<0.000000e+00> : vector<8x4xf32>
    %48 = tpu.matmul %47, %34, %cst_22 {dimension_numbers = #tpu.dot_dimension_numbers<[1], [0], [0], [1], [0, 0, 1, 1], [], []>} : vector<8x8xf32>, vector<8x4xf32>, vector<8x4xf32> -> vector<8x4xf32>
    %49 = vector.extract_strided_slice %30 {offsets = [0, 0], sizes = [4, 8], strides = [1, 1]} : vector<8x8xf32> to vector<4x8xf32>
    %cst_23 = arith.constant dense<0.000000e+00> : vector<8x8xf32>
    %50 = tpu.matmul %48, %49, %cst_23 {dimension_numbers = #tpu.dot_dimension_numbers<[1], [0], [0], [1], [0, 0, 1, 1], [], []>} : vector<8x4xf32>, vector<4x8xf32>, vector<8x8xf32> -> vector<8x8xf32>
    %51 = arith.addf %31, %50 : vector<8x8xf32>
    %52 = vector.extract_strided_slice %29 {offsets = [0, 4], sizes = [8, 4], strides = [1, 1]} : vector<8x24xf32> to vector<8x4xf32>
    %53 = vector.extract_strided_slice %29 {offsets = [0, 12], sizes = [8, 4], strides = [1, 1]} : vector<8x24xf32> to vector<8x4xf32>
    %54 = vector.extract_strided_slice %29 {offsets = [0, 20], sizes = [8, 4], strides = [1, 1]} : vector<8x24xf32> to vector<8x4xf32>
    %cst_24 = arith.constant dense<0.000000e+00> : vector<8x8xf32>
    %55 = tpu.matmul %52, %53, %cst_24 {dimension_numbers = #tpu.dot_dimension_numbers<[1], [1], [0], [0], [0, 0, 1, 0], [], []>} : vector<8x4xf32>, vector<8x4xf32>, vector<8x8xf32> -> vector<8x8xf32>
    %cst_25 = arith.constant 5.000000e-01 : f32
    %56 = vector.broadcast %cst_25 : f32 to vector<8x8xf32>
    %57 = arith.mulf %55, %56 : vector<8x8xf32>
    %cst_26 = arith.constant dense<0xFF800000> : vector<8xf32>
    %58 = vector.multi_reduction <maximumf>, %57, %cst_26 [1] : vector<8x8xf32> to vector<8xf32>
    %59 = vector.shape_cast %58 : vector<8xf32> to vector<8x1xf32>
    %60 = vector.broadcast %59 : vector<8x1xf32> to vector<8x8xf32>
    %61 = arith.subf %57, %60 : vector<8x8xf32>
    %62 = math.exp %61 : vector<8x8xf32>
    %cst_27 = arith.constant dense<0.000000e+00> : vector<8xf32>
    %63 = vector.multi_reduction <add>, %62, %cst_27 [1] : vector<8x8xf32> to vector<8xf32>
    %64 = vector.shape_cast %63 : vector<8xf32> to vector<8x1xf32>
    %65 = tpu.reciprocal %64 {approx = true} : vector<8x1xf32> -> vector<8x1xf32>
    %66 = vector.broadcast %65 : vector<8x1xf32> to vector<8x8xf32>
    %67 = arith.mulf %62, %66 : vector<8x8xf32>
    %cst_28 = arith.constant dense<0.000000e+00> : vector<8x4xf32>
    %68 = tpu.matmul %67, %54, %cst_28 {dimension_numbers = #tpu.dot_dimension_numbers<[1], [0], [0], [1], [0, 0, 1, 1], [], []>} : vector<8x8xf32>, vector<8x4xf32>, vector<8x4xf32> -> vector<8x4xf32>
    %69 = vector.extract_strided_slice %30 {offsets = [4, 0], sizes = [4, 8], strides = [1, 1]} : vector<8x8xf32> to vector<4x8xf32>
    %cst_29 = arith.constant dense<0.000000e+00> : vector<8x8xf32>
    %70 = tpu.matmul %68, %69, %cst_29 {dimension_numbers = #tpu.dot_dimension_numbers<[1], [0], [0], [1], [0, 0, 1, 1], [], []>} : vector<8x4xf32>, vector<4x8xf32>, vector<8x8xf32> -> vector<8x8xf32>
    %71 = arith.addf %51, %70 : vector<8x8xf32>
    %72 = arith.addf %1, %71 : vector<8x8xf32>
    %c0_30 = arith.constant 0 : index
    %c0_31 = arith.constant 0 : index
    %73 = vector.load %arg5[%c0_30, %c0_31] : memref<1x8xf32, #tpu.memory_space<vmem>>, vector<1x8xf32>
    %74 = vector.broadcast %73 : vector<1x8xf32> to vector<8x8xf32>
    %75 = arith.addf %72, %74 : vector<8x8xf32>
    %cst_32 = arith.constant dense<0.000000e+00> : vector<8xf32>
    %76 = vector.multi_reduction <add>, %75, %cst_32 [1] : vector<8x8xf32> to vector<8xf32>
    %77 = vector.shape_cast %76 : vector<8xf32> to vector<8x1xf32>
    %cst_33 = arith.constant 8.000000e+00 : f32
    %78 = vector.broadcast %cst_33 : f32 to vector<8x1xf32>
    %79 = arith.divf %77, %78 : vector<8x1xf32>
    %80 = vector.broadcast %79 : vector<8x1xf32> to vector<8x8xf32>
    %81 = arith.subf %75, %80 : vector<8x8xf32>
    %82 = arith.mulf %81, %81 : vector<8x8xf32>
    %cst_34 = arith.constant dense<0.000000e+00> : vector<8xf32>
    %83 = vector.multi_reduction <add>, %82, %cst_34 [1] : vector<8x8xf32> to vector<8xf32>
    %84 = vector.shape_cast %83 : vector<8xf32> to vector<8x1xf32>
    %cst_35 = arith.constant 0.142857149 : f32
    %85 = vector.broadcast %cst_35 : f32 to vector<8x1xf32>
    %86 = arith.mulf %84, %85 : vector<8x1xf32>
    %87 = math.sqrt %86 : vector<8x1xf32>
    %cst_36 = arith.constant 9.99999997E-7 : f32
    %88 = vector.broadcast %cst_36 : f32 to vector<8x1xf32>
    %89 = arith.addf %87, %88 : vector<8x1xf32>
    %90 = tpu.reciprocal %89 {approx = true} : vector<8x1xf32> -> vector<8x1xf32>
    %c0_37 = arith.constant 0 : index
    %c0_38 = arith.constant 0 : index
    %91 = vector.load %arg8[%c0_37, %c0_38] : memref<1x8xf32, #tpu.memory_space<vmem>>, vector<1x8xf32>
    %92 = vector.broadcast %91 : vector<1x8xf32> to vector<8x8xf32>
    %93 = arith.mulf %92, %81 : vector<8x8xf32>
    %94 = vector.broadcast %90 : vector<8x1xf32> to vector<8x8xf32>
    %95 = arith.mulf %93, %94 : vector<8x8xf32>
    %c0_39 = arith.constant 0 : index
    %c0_40 = arith.constant 0 : index
    %96 = vector.load %arg9[%c0_39, %c0_40] : memref<1x8xf32, #tpu.memory_space<vmem>>, vector<1x8xf32>
    %97 = vector.broadcast %96 : vector<1x8xf32> to vector<8x8xf32>
    %98 = arith.addf %95, %97 : vector<8x8xf32>
    %c0_41 = arith.constant 0 : index
    %c0_42 = arith.constant 0 : index
    %99 = vector.load %arg10[%c0_41, %c0_42] : memref<8x32xf32, #tpu.memory_space<vmem>>, vector<8x32xf32>
    %cst_43 = arith.constant dense<0.000000e+00> : vector<8x32xf32>
    %100 = tpu.matmul %98, %99, %cst_43 {dimension_numbers = #tpu.dot_dimension_numbers<[1], [0], [0], [1], [0, 0, 1, 1], [], []>} : vector<8x8xf32>, vector<8x32xf32>, vector<8x32xf32> -> vector<8x32xf32>
    %c0_44 = arith.constant 0 : index
    %c0_45 = arith.constant 0 : index
    %101 = vector.load %arg11[%c0_44, %c0_45] : memref<1x32xf32, #tpu.memory_space<vmem>>, vector<1x32xf32>
    %102 = vector.broadcast %101 : vector<1x32xf32> to vector<8x32xf32>
    %103 = arith.addf %100, %102 : vector<8x32xf32>
    %cst_46 = arith.constant dense<0.000000e+00> : vector<8xf32>
    %104 = vector.multi_reduction <add>, %103, %cst_46 [1] : vector<8x32xf32> to vector<8xf32>
    %105 = vector.shape_cast %104 : vector<8xf32> to vector<8x1xf32>
    %cst_47 = arith.constant 3.200000e+01 : f32
    %106 = vector.broadcast %cst_47 : f32 to vector<8x1xf32>
    %107 = arith.divf %105, %106 : vector<8x1xf32>
    %108 = vector.broadcast %107 : vector<8x1xf32> to vector<8x32xf32>
    %109 = arith.subf %103, %108 : vector<8x32xf32>
    %110 = arith.mulf %109, %109 : vector<8x32xf32>
    %cst_48 = arith.constant dense<0.000000e+00> : vector<8xf32>
    %111 = vector.multi_reduction <add>, %110, %cst_48 [1] : vector<8x32xf32> to vector<8xf32>
    %112 = vector.shape_cast %111 : vector<8xf32> to vector<8x1xf32>
    %cst_49 = arith.constant 0.0322580636 : f32
    %113 = vector.broadcast %cst_49 : f32 to vector<8x1xf32>
    %114 = arith.mulf %112, %113 : vector<8x1xf32>
    %115 = math.sqrt %114 : vector<8x1xf32>
    %cst_50 = arith.constant 9.99999997E-7 : f32
    %116 = vector.broadcast %cst_50 : f32 to vector<8x1xf32>
    %117 = arith.addf %115, %116 : vector<8x1xf32>
    %118 = tpu.reciprocal %117 {approx = true} : vector<8x1xf32> -> vector<8x1xf32>
    %c0_51 = arith.constant 0 : index
    %c0_52 = arith.constant 0 : index
    %119 = vector.load %arg12[%c0_51, %c0_52] : memref<1x32xf32, #tpu.memory_space<vmem>>, vector<1x32xf32>
    %120 = vector.broadcast %119 : vector<1x32xf32> to vector<8x32xf32>
    %121 = arith.mulf %120, %109 : vector<8x32xf32>
    %122 = vector.broadcast %118 : vector<8x1xf32> to vector<8x32xf32>
    %123 = arith.mulf %121, %122 : vector<8x32xf32>
    %c0_53 = arith.constant 0 : index
    %c0_54 = arith.constant 0 : index
    %124 = vector.load %arg13[%c0_53, %c0_54] : memref<1x32xf32, #tpu.memory_space<vmem>>, vector<1x32xf32>
    %125 = vector.broadcast %124 : vector<1x32xf32> to vector<8x32xf32>
    %126 = arith.addf %123, %125 : vector<8x32xf32>
    %c0_55 = arith.constant 0 : index
    %c0_56 = arith.constant 0 : index
    %127 = vector.load %arg14[%c0_55, %c0_56] : memref<32x8xf32, #tpu.memory_space<vmem>>, vector<32x8xf32>
    %cst_57 = arith.constant dense<0.000000e+00> : vector<8x8xf32>
    %128 = tpu.matmul %126, %127, %cst_57 {dimension_numbers = #tpu.dot_dimension_numbers<[1], [0], [0], [1], [0, 0, 1, 1], [], []>} : vector<8x32xf32>, vector<32x8xf32>, vector<8x8xf32> -> vector<8x8xf32>
    %c0_58 = arith.constant 0 : index
    %c0_59 = arith.constant 0 : index
    %129 = vector.load %arg15[%c0_58, %c0_59] : memref<1x8xf32, #tpu.memory_space<vmem>>, vector<1x8xf32>
    %130 = vector.broadcast %129 : vector<1x8xf32> to vector<8x8xf32>
    %131 = arith.addf %128, %130 : vector<8x8xf32>
    %cst_60 = arith.constant dense<0.000000e+00> : vector<8xf32>
    %132 = vector.multi_reduction <add>, %131, %cst_60 [1] : vector<8x8xf32> to vector<8xf32>
    %133 = vector.shape_cast %132 : vector<8xf32> to vector<8x1xf32>
    %cst_61 = arith.constant 8.000000e+00 : f32
    %134 = vector.broadcast %cst_61 : f32 to vector<8x1xf32>
    %135 = arith.divf %133, %134 : vector<8x1xf32>
    %136 = vector.broadcast %135 : vector<8x1xf32> to vector<8x8xf32>
    %137 = arith.subf %131, %136 : vector<8x8xf32>
    %138 = arith.mulf %137, %137 : vector<8x8xf32>
    %cst_62 = arith.constant dense<0.000000e+00> : vector<8xf32>
    %139 = vector.multi_reduction <add>, %138, %cst_62 [1] : vector<8x8xf32> to vector<8xf32>
    %140 = vector.shape_cast %139 : vector<8xf32> to vector<8x1xf32>
    %cst_63 = arith.constant 0.142857149 : f32
    %141 = vector.broadcast %cst_63 : f32 to vector<8x1xf32>
    %142 = arith.mulf %140, %141 : vector<8x1xf32>
    %143 = math.sqrt %142 : vector<8x1xf32>
    %cst_64 = arith.constant 9.99999997E-7 : f32
    %144 = vector.broadcast %cst_64 : f32 to vector<8x1xf32>
    %145 = arith.addf %143, %144 : vector<8x1xf32>
    %146 = tpu.reciprocal %145 {approx = true} : vector<8x1xf32> -> vector<8x1xf32>
    %c0_65 = arith.constant 0 : index
    %c0_66 = arith.constant 0 : index
    %147 = vector.load %arg16[%c0_65, %c0_66] : memref<1x8xf32, #tpu.memory_space<vmem>>, vector<1x8xf32>
    %148 = vector.broadcast %147 : vector<1x8xf32> to vector<8x8xf32>
    %149 = arith.mulf %148, %137 : vector<8x8xf32>
    %150 = vector.broadcast %146 : vector<8x1xf32> to vector<8x8xf32>
    %151 = arith.mulf %149, %150 : vector<8x8xf32>
    %c0_67 = arith.constant 0 : index
    %c0_68 = arith.constant 0 : index
    %152 = vector.load %arg17[%c0_67, %c0_68] : memref<1x8xf32, #tpu.memory_space<vmem>>, vector<1x8xf32>
    %153 = vector.broadcast %152 : vector<1x8xf32> to vector<8x8xf32>
    %154 = arith.addf %151, %153 : vector<8x8xf32>
    %c0_69 = arith.constant 0 : index
    %c0_70 = arith.constant 0 : index
    %155 = vector.load %arg18[%c0_69, %c0_70] : memref<8x8xf32, #tpu.memory_space<vmem>>, vector<8x8xf32>
    %cst_71 = arith.constant dense<0.000000e+00> : vector<8x8xf32>
    %156 = tpu.matmul %154, %155, %cst_71 {dimension_numbers = #tpu.dot_dimension_numbers<[1], [0], [0], [1], [0, 0, 1, 1], [], []>} : vector<8x8xf32>, vector<8x8xf32>, vector<8x8xf32> -> vector<8x8xf32>
    %c0_72 = arith.constant 0 : index
    %c0_73 = arith.constant 0 : index
    %157 = vector.load %arg19[%c0_72, %c0_73] : memref<1x8xf32, #tpu.memory_space<vmem>>, vector<1x8xf32>
    %158 = vector.broadcast %157 : vector<1x8xf32> to vector<8x8xf32>
    %159 = arith.addf %156, %158 : vector<8x8xf32>
    %cst_74 = arith.constant 0.000000e+00 : f32
    %160 = vector.broadcast %cst_74 : f32 to vector<8x8xf32>
    %161 = arith.maximumf %159, %160 : vector<8x8xf32>
    %c0_75 = arith.constant 0 : index
    %c0_76 = arith.constant 0 : index
    %c0_77 = arith.constant 0 : index
    %162 = vector.load %arg20[%c0_75, %c0_76, %c0_77] : memref<1x8x8xf32, #tpu.memory_space<vmem>>, vector<1x8x8xf32>
    %163 = vector.shape_cast %162 : vector<1x8x8xf32> to vector<8x8xf32>
    %164 = vector.shape_cast %161 : vector<8x8xf32> to vector<1x8x8xf32>
    tpu.vector_store %arg20[%c0_75, %c0_76, %c0_77], %164 {strides = array<i32>} : memref<1x8x8xf32, #tpu.memory_space<vmem>>, vector<1x8x8xf32>,
    return
  }
  func.func @transform_0(%arg0: i32) -> (i32, i32, i32) {
    %c0_i32 = arith.constant 0 : i32
    %c0_i32_0 = arith.constant 0 : i32
    %c0_i32_1 = arith.constant 0 : i32
    return %arg0, %c0_i32, %c0_i32_0 : i32, i32, i32
  }
  func.func @transform_1(%arg0: i32) -> (i32, i32) {
    %c0_i32 = arith.constant 0 : i32
    %c0_i32_0 = arith.constant 0 : i32
    %c0_i32_1 = arith.constant 0 : i32
    return %c0_i32, %c0_i32_0 : i32, i32
  }
  func.func @transform_2(%arg0: i32) -> (i32, i32) {
    %c0_i32 = arith.constant 0 : i32
    %c0_i32_0 = arith.constant 0 : i32
    %c0_i32_1 = arith.constant 0 : i32
    return %c0_i32, %c0_i32_0 : i32, i32
  }
  func.func @transform_3(%arg0: i32) -> (i32, i32) {
    %c0_i32 = arith.constant 0 : i32
    %c0_i32_0 = arith.constant 0 : i32
    %c0_i32_1 = arith.constant 0 : i32
    return %c0_i32, %c0_i32_0 : i32, i32
  }
  func.func @transform_4(%arg0: i32) -> (i32, i32) {
    %c0_i32 = arith.constant 0 : i32
    %c0_i32_0 = arith.constant 0 : i32
    %c0_i32_1 = arith.constant 0 : i32
    return %c0_i32, %c0_i32_0 : i32, i32
  }
  func.func @transform_5(%arg0: i32) -> (i32, i32) {
    %c0_i32 = arith.constant 0 : i32
    %c0_i32_0 = arith.constant 0 : i32
    %c0_i32_1 = arith.constant 0 : i32
    return %c0_i32, %c0_i32_0 : i32, i32
  }
  func.func @transform_6(%arg0: i32) -> (i32, i32) {
    %c0_i32 = arith.constant 0 : i32
    %c0_i32_0 = arith.constant 0 : i32
    %c0_i32_1 = arith.constant 0 : i32
    return %c0_i32, %c0_i32_0 : i32, i32
  }
  func.func @transform_7(%arg0: i32) -> (i32, i32) {
    %c0_i32 = arith.constant 0 : i32
    %c0_i32_0 = arith.constant 0 : i32
    %c0_i32_1 = arith.constant 0 : i32
    return %c0_i32, %c0_i32_0 : i32, i32
  }
  func.func @transform_8(%arg0: i32) -> (i32, i32) {
    %c0_i32 = arith.constant 0 : i32
    %c0_i32_0 = arith.constant 0 : i32
    %c0_i32_1 = arith.constant 0 : i32
    return %c0_i32, %c0_i32_0 : i32, i32
  }
  func.func @transform_9(%arg0: i32) -> (i32, i32) {
    %c0_i32 = arith.constant 0 : i32
    %c0_i32_0 = arith.constant 0 : i32
    %c0_i32_1 = arith.constant 0 : i32
    return %c0_i32, %c0_i32_0 : i32, i32
  }
  func.func @transform_10(%arg0: i32) -> (i32, i32) {
    %c0_i32 = arith.constant 0 : i32
    %c0_i32_0 = arith.constant 0 : i32
    %c0_i32_1 = arith.constant 0 : i32
    return %c0_i32, %c0_i32_0 : i32, i32
  }
  func.func @transform_11(%arg0: i32) -> (i32, i32) {
    %c0_i32 = arith.constant 0 : i32
    %c0_i32_0 = arith.constant 0 : i32
    %c0_i32_1 = arith.constant 0 : i32
    return %c0_i32, %c0_i32_0 : i32, i32
  }
  func.func @transform_12(%arg0: i32) -> (i32, i32) {
    %c0_i32 = arith.constant 0 : i32
    %c0_i32_0 = arith.constant 0 : i32
    %c0_i32_1 = arith.constant 0 : i32
    return %c0_i32, %c0_i32_0 : i32, i32
  }
  func.func @transform_13(%arg0: i32) -> (i32, i32) {
    %c0_i32 = arith.constant 0 : i32
    %c0_i32_0 = arith.constant 0 : i32
    %c0_i32_1 = arith.constant 0 : i32
    return %c0_i32, %c0_i32_0 : i32, i32
  }
  func.func @transform_14(%arg0: i32) -> (i32, i32) {
    %c0_i32 = arith.constant 0 : i32
    %c0_i32_0 = arith.constant 0 : i32
    %c0_i32_1 = arith.constant 0 : i32
    return %c0_i32, %c0_i32_0 : i32, i32
  }
  func.func @transform_15(%arg0: i32) -> (i32, i32) {
    %c0_i32 = arith.constant 0 : i32
    %c0_i32_0 = arith.constant 0 : i32
    %c0_i32_1 = arith.constant 0 : i32
    return %c0_i32, %c0_i32_0 : i32, i32
  }
  func.func @transform_16(%arg0: i32) -> (i32, i32) {
    %c0_i32 = arith.constant 0 : i32
    %c0_i32_0 = arith.constant 0 : i32
    %c0_i32_1 = arith.constant 0 : i32
    return %c0_i32, %c0_i32_0 : i32, i32
  }
  func.func @transform_17(%arg0: i32) -> (i32, i32) {
    %c0_i32 = arith.constant 0 : i32
    %c0_i32_0 = arith.constant 0 : i32
    %c0_i32_1 = arith.constant 0 : i32
    return %c0_i32, %c0_i32_0 : i32, i32
  }
  func.func @transform_18(%arg0: i32) -> (i32, i32) {
    %c0_i32 = arith.constant 0 : i32
    %c0_i32_0 = arith.constant 0 : i32
    %c0_i32_1 = arith.constant 0 : i32
    return %c0_i32, %c0_i32_0 : i32, i32
  }
  func.func @transform_19(%arg0: i32) -> (i32, i32, i32) {
    %c0_i32 = arith.constant 0 : i32
    %c0_i32_0 = arith.constant 0 : i32
    %c0_i32_1 = arith.constant 0 : i32
    return %arg0, %c0_i32, %c0_i32_0 : i32, i32, i32
  }
}

module attributes {stable_mosaic.version = 11 : i64} {
  func.func @_fused_layer_kernel(%arg0: i32, %arg1: memref<1x8x16xf32, #tpu.memory_space<vmem>>, %arg2: memref<16x48xf32, #tpu.memory_space<vmem>>, %arg3: memref<1x48xf32, #tpu.memory_space<vmem>>, %arg4: memref<16x16xf32, #tpu.memory_space<vmem>>, %arg5: memref<1x16xf32, #tpu.memory_space<vmem>>, %arg6: memref<1x16xf32, #tpu.memory_space<vmem>>, %arg7: memref<1x16xf32, #tpu.memory_space<vmem>>, %arg8: memref<1x16xf32, #tpu.memory_space<vmem>>, %arg9: memref<1x16xf32, #tpu.memory_space<vmem>>, %arg10: memref<16x64xf32, #tpu.memory_space<vmem>>, %arg11: memref<1x64xf32, #tpu.memory_space<vmem>>, %arg12: memref<1x64xf32, #tpu.memory_space<vmem>>, %arg13: memref<1x64xf32, #tpu.memory_space<vmem>>, %arg14: memref<64x16xf32, #tpu.memory_space<vmem>>, %arg15: memref<1x16xf32, #tpu.memory_space<vmem>>, %arg16: memref<1x16xf32, #tpu.memory_space<vmem>>, %arg17: memref<1x16xf32, #tpu.memory_space<vmem>>, %arg18: memref<16x8xf32, #tpu.memory_space<vmem>>, %arg19: memref<1x8xf32, #tpu.memory_space<vmem>>, %arg20: memref<1x8x8xf32, #tpu.memory_space<vmem>>) attributes {dimension_semantics = [#tpu.dimension_semantics<parallel>], iteration_bounds = array<i64: 2>, scalar_prefetch = 0 : i64, scratch_operands = 0 : i64, tpu.core_type = #tpu.core_type<tc>, window_params = [{transform_indices = @transform_0, window_bounds = array<i64: 1, 8, 16>}, {pipeline_mode = #tpu.pipeline_mode<synchronous>, transform_indices = @transform_1, window_bounds = array<i64: 16, 48>}, {pipeline_mode = #tpu.pipeline_mode<synchronous>, transform_indices = @transform_2, window_bounds = array<i64: 1, 48>}, {pipeline_mode = #tpu.pipeline_mode<synchronous>, transform_indices = @transform_3, window_bounds = array<i64: 16, 16>}, {pipeline_mode = #tpu.pipeline_mode<synchronous>, transform_indices = @transform_4, window_bounds = array<i64: 1, 16>}, {pipeline_mode = #tpu.pipeline_mode<synchronous>, transform_indices = @transform_5, window_bounds = array<i64: 1, 16>}, {pipeline_mode = #tpu.pipeline_mode<synchronous>, transform_indices = @transform_6, window_bounds = array<i64: 1, 16>}, {pipeline_mode = #tpu.pipeline_mode<synchronous>, transform_indices = @transform_7, window_bounds = array<i64: 1, 16>}, {pipeline_mode = #tpu.pipeline_mode<synchronous>, transform_indices = @transform_8, window_bounds = array<i64: 1, 16>}, {pipeline_mode = #tpu.pipeline_mode<synchronous>, transform_indices = @transform_9, window_bounds = array<i64: 16, 64>}, {pipeline_mode = #tpu.pipeline_mode<synchronous>, transform_indices = @transform_10, window_bounds = array<i64: 1, 64>}, {pipeline_mode = #tpu.pipeline_mode<synchronous>, transform_indices = @transform_11, window_bounds = array<i64: 1, 64>}, {pipeline_mode = #tpu.pipeline_mode<synchronous>, transform_indices = @transform_12, window_bounds = array<i64: 1, 64>}, {pipeline_mode = #tpu.pipeline_mode<synchronous>, transform_indices = @transform_13, window_bounds = array<i64: 64, 16>}, {pipeline_mode = #tpu.pipeline_mode<synchronous>, transform_indices = @transform_14, window_bounds = array<i64: 1, 16>}, {pipeline_mode = #tpu.pipeline_mode<synchronous>, transform_indices = @transform_15, window_bounds = array<i64: 1, 16>}, {pipeline_mode = #tpu.pipeline_mode<synchronous>, transform_indices = @transform_16, window_bounds = array<i64: 1, 16>}, {pipeline_mode = #tpu.pipeline_mode<synchronous>, transform_indices = @transform_17, window_bounds = array<i64: 16, 8>}, {pipeline_mode = #tpu.pipeline_mode<synchronous>, transform_indices = @transform_18, window_bounds = array<i64: 1, 8>}, {transform_indices = @transform_19, window_bounds = array<i64: 1, 8, 8>}]} {
    %c0 = arith.constant 0 : index
    %c0_0 = arith.constant 0 : index
    %c0_1 = arith.constant 0 : index
    %0 = vector.load %arg1[%c0, %c0_0, %c0_1] : memref<1x8x16xf32, #tpu.memory_space<vmem>>, vector<1x8x16xf32>
    %1 = vector.shape_cast %0 : vector<1x8x16xf32> to vector<8x16xf32>
    %cst = arith.constant dense<0.000000e+00> : vector<8xf32>
    %2 = vector.multi_reduction <add>, %1, %cst [1] : vector<8x16xf32> to vector<8xf32>
    %3 = vector.shape_cast %2 : vector<8xf32> to vector<8x1xf32>
    %cst_2 = arith.constant 1.600000e+01 : f32
    %4 = vector.broadcast %cst_2 : f32 to vector<8x1xf32>
    %5 = arith.divf %3, %4 : vector<8x1xf32>
    %6 = vector.broadcast %5 : vector<8x1xf32> to vector<8x16xf32>
    %7 = arith.subf %1, %6 : vector<8x16xf32>
    %8 = arith.mulf %7, %7 : vector<8x16xf32>
    %cst_3 = arith.constant dense<0.000000e+00> : vector<8xf32>
    %9 = vector.multi_reduction <add>, %8, %cst_3 [1] : vector<8x16xf32> to vector<8xf32>
    %10 = vector.shape_cast %9 : vector<8xf32> to vector<8x1xf32>
    %cst_4 = arith.constant 0.0666666701 : f32
    %11 = vector.broadcast %cst_4 : f32 to vector<8x1xf32>
    %12 = arith.mulf %10, %11 : vector<8x1xf32>
    %13 = math.sqrt %12 : vector<8x1xf32>
    %cst_5 = arith.constant 9.99999997E-7 : f32
    %14 = vector.broadcast %cst_5 : f32 to vector<8x1xf32>
    %15 = arith.addf %13, %14 : vector<8x1xf32>
    %16 = tpu.reciprocal %15 {approx = true} : vector<8x1xf32> -> vector<8x1xf32>
    %c0_6 = arith.constant 0 : index
    %c0_7 = arith.constant 0 : index
    %17 = vector.load %arg6[%c0_6, %c0_7] : memref<1x16xf32, #tpu.memory_space<vmem>>, vector<1x16xf32>
    %18 = vector.broadcast %17 : vector<1x16xf32> to vector<8x16xf32>
    %19 = arith.mulf %18, %7 : vector<8x16xf32>
    %20 = vector.broadcast %16 : vector<8x1xf32> to vector<8x16xf32>
    %21 = arith.mulf %19, %20 : vector<8x16xf32>
    %c0_8 = arith.constant 0 : index
    %c0_9 = arith.constant 0 : index
    %22 = vector.load %arg7[%c0_8, %c0_9] : memref<1x16xf32, #tpu.memory_space<vmem>>, vector<1x16xf32>
    %23 = vector.broadcast %22 : vector<1x16xf32> to vector<8x16xf32>
    %24 = arith.addf %21, %23 : vector<8x16xf32>
    %c0_10 = arith.constant 0 : index
    %c0_11 = arith.constant 0 : index
    %25 = vector.load %arg2[%c0_10, %c0_11] : memref<16x48xf32, #tpu.memory_space<vmem>>, vector<16x48xf32>
    %cst_12 = arith.constant dense<0.000000e+00> : vector<8x48xf32>
    %26 = tpu.matmul %24, %25, %cst_12 {dimension_numbers = #tpu.dot_dimension_numbers<[1], [0], [0], [1], [0, 0, 1, 1], [], []>} : vector<8x16xf32>, vector<16x48xf32>, vector<8x48xf32> -> vector<8x48xf32>
    %c0_13 = arith.constant 0 : index
    %c0_14 = arith.constant 0 : index
    %27 = vector.load %arg3[%c0_13, %c0_14] : memref<1x48xf32, #tpu.memory_space<vmem>>, vector<1x48xf32>
    %28 = vector.broadcast %27 : vector<1x48xf32> to vector<8x48xf32>
    %29 = arith.addf %26, %28 : vector<8x48xf32>
    %c0_15 = arith.constant 0 : index
    %c0_16 = arith.constant 0 : index
    %30 = vector.load %arg4[%c0_15, %c0_16] : memref<16x16xf32, #tpu.memory_space<vmem>>, vector<16x16xf32>
    %cst_17 = arith.constant 0.000000e+00 : f32
    %31 = vector.broadcast %cst_17 : f32 to vector<8x16xf32>
    %32 = vector.extract_strided_slice %29 {offsets = [0, 0], sizes = [8, 8], strides = [1, 1]} : vector<8x48xf32> to vector<8x8xf32>
    %33 = vector.extract_strided_slice %29 {offsets = [0, 16], sizes = [8, 8], strides = [1, 1]} : vector<8x48xf32> to vector<8x8xf32>
    %34 = vector.extract_strided_slice %29 {offsets = [0, 32], sizes = [8, 8], strides = [1, 1]} : vector<8x48xf32> to vector<8x8xf32>
    %cst_18 = arith.constant dense<0.000000e+00> : vector<8x8xf32>
    %35 = tpu.matmul %32, %33, %cst_18 {dimension_numbers = #tpu.dot_dimension_numbers<[1], [1], [0], [0], [0, 0, 1, 0], [], []>} : vector<8x8xf32>, vector<8x8xf32>, vector<8x8xf32> -> vector<8x8xf32>
    %cst_19 = arith.constant 0.353553385 : f32
    %36 = vector.broadcast %cst_19 : f32 to vector<8x8xf32>
    %37 = arith.mulf %35, %36 : vector<8x8xf32>
    %cst_20 = arith.constant dense<0xFF800000> : vector<8xf32>
    %38 = vector.multi_reduction <maximumf>, %37, %cst_20 [1] : vector<8x8xf32> to vector<8xf32>
    %39 = vector.shape_cast %38 : vector<8xf32> to vector<8x1xf32>
    %40 = vector.broadcast %39 : vector<8x1xf32> to vector<8x8xf32>
    %41 = arith.subf %37, %40 : vector<8x8xf32>
    %42 = math.exp %41 : vector<8x8xf32>
    %cst_21 = arith.constant dense<0.000000e+00> : vector<8xf32>
    %43 = vector.multi_reduction <add>, %42, %cst_21 [1] : vector<8x8xf32> to vector<8xf32>
    %44 = vector.shape_cast %43 : vector<8xf32> to vector<8x1xf32>
    %45 = tpu.reciprocal %44 {approx = true} : vector<8x1xf32> -> vector<8x1xf32>
    %46 = vector.broadcast %45 : vector<8x1xf32> to vector<8x8xf32>
    %47 = arith.mulf %42, %46 : vector<8x8xf32>
    %cst_22 = arith.constant dense<0.000000e+00> : vector<8x8xf32>
    %48 = tpu.matmul %47, %34, %cst_22 {dimension_numbers = #tpu.dot_dimension_numbers<[1], [0], [0], [1], [0, 0, 1, 1], [], []>} : vector<8x8xf32>, vector<8x8xf32>, vector<8x8xf32> -> vector<8x8xf32>
    %49 = vector.extract_strided_slice %30 {offsets = [0, 0], sizes = [8, 16], strides = [1, 1]} : vector<16x16xf32> to vector<8x16xf32>
    %cst_23 = arith.constant dense<0.000000e+00> : vector<8x16xf32>
    %50 = tpu.matmul %48, %49, %cst_23 {dimension_numbers = #tpu.dot_dimension_numbers<[1], [0], [0], [1], [0, 0, 1, 1], [], []>} : vector<8x8xf32>, vector<8x16xf32>, vector<8x16xf32> -> vector<8x16xf32>
    %51 = arith.addf %31, %50 : vector<8x16xf32>
    %52 = vector.extract_strided_slice %29 {offsets = [0, 8], sizes = [8, 8], strides = [1, 1]} : vector<8x48xf32> to vector<8x8xf32>
    %53 = vector.extract_strided_slice %29 {offsets = [0, 24], sizes = [8, 8], strides = [1, 1]} : vector<8x48xf32> to vector<8x8xf32>
    %54 = vector.extract_strided_slice %29 {offsets = [0, 40], sizes = [8, 8], strides = [1, 1]} : vector<8x48xf32> to vector<8x8xf32>
    %cst_24 = arith.constant dense<0.000000e+00> : vector<8x8xf32>
    %55 = tpu.matmul %52, %53, %cst_24 {dimension_numbers = #tpu.dot_dimension_numbers<[1], [1], [0], [0], [0, 0, 1, 0], [], []>} : vector<8x8xf32>, vector<8x8xf32>, vector<8x8xf32> -> vector<8x8xf32>
    %cst_25 = arith.constant 0.353553385 : f32
    %56 = vector.broadcast %cst_25 : f32 to vector<8x8xf32>
    %57 = arith.mulf %55, %56 : vector<8x8xf32>
    %cst_26 = arith.constant dense<0xFF800000> : vector<8xf32>
    %58 = vector.multi_reduction <maximumf>, %57, %cst_26 [1] : vector<8x8xf32> to vector<8xf32>
    %59 = vector.shape_cast %58 : vector<8xf32> to vector<8x1xf32>
    %60 = vector.broadcast %59 : vector<8x1xf32> to vector<8x8xf32>
    %61 = arith.subf %57, %60 : vector<8x8xf32>
    %62 = math.exp %61 : vector<8x8xf32>
    %cst_27 = arith.constant dense<0.000000e+00> : vector<8xf32>
    %63 = vector.multi_reduction <add>, %62, %cst_27 [1] : vector<8x8xf32> to vector<8xf32>
    %64 = vector.shape_cast %63 : vector<8xf32> to vector<8x1xf32>
    %65 = tpu.reciprocal %64 {approx = true} : vector<8x1xf32> -> vector<8x1xf32>
    %66 = vector.broadcast %65 : vector<8x1xf32> to vector<8x8xf32>
    %67 = arith.mulf %62, %66 : vector<8x8xf32>
    %cst_28 = arith.constant dense<0.000000e+00> : vector<8x8xf32>
    %68 = tpu.matmul %67, %54, %cst_28 {dimension_numbers = #tpu.dot_dimension_numbers<[1], [0], [0], [1], [0, 0, 1, 1], [], []>} : vector<8x8xf32>, vector<8x8xf32>, vector<8x8xf32> -> vector<8x8xf32>
    %69 = vector.extract_strided_slice %30 {offsets = [8, 0], sizes = [8, 16], strides = [1, 1]} : vector<16x16xf32> to vector<8x16xf32>
    %cst_29 = arith.constant dense<0.000000e+00> : vector<8x16xf32>
    %70 = tpu.matmul %68, %69, %cst_29 {dimension_numbers = #tpu.dot_dimension_numbers<[1], [0], [0], [1], [0, 0, 1, 1], [], []>} : vector<8x8xf32>, vector<8x16xf32>, vector<8x16xf32> -> vector<8x16xf32>
    %71 = arith.addf %51, %70 : vector<8x16xf32>
    %72 = arith.addf %1, %71 : vector<8x16xf32>
    %c0_30 = arith.constant 0 : index
    %c0_31 = arith.constant 0 : index
    %73 = vector.load %arg5[%c0_30, %c0_31] : memref<1x16xf32, #tpu.memory_space<vmem>>, vector<1x16xf32>
    %74 = vector.broadcast %73 : vector<1x16xf32> to vector<8x16xf32>
    %75 = arith.addf %72, %74 : vector<8x16xf32>
    %cst_32 = arith.constant dense<0.000000e+00> : vector<8xf32>
    %76 = vector.multi_reduction <add>, %75, %cst_32 [1] : vector<8x16xf32> to vector<8xf32>
    %77 = vector.shape_cast %76 : vector<8xf32> to vector<8x1xf32>
    %cst_33 = arith.constant 1.600000e+01 : f32
    %78 = vector.broadcast %cst_33 : f32 to vector<8x1xf32>
    %79 = arith.divf %77, %78 : vector<8x1xf32>
    %80 = vector.broadcast %79 : vector<8x1xf32> to vector<8x16xf32>
    %81 = arith.subf %75, %80 : vector<8x16xf32>
    %82 = arith.mulf %81, %81 : vector<8x16xf32>
    %cst_34 = arith.constant dense<0.000000e+00> : vector<8xf32>
    %83 = vector.multi_reduction <add>, %82, %cst_34 [1] : vector<8x16xf32> to vector<8xf32>
    %84 = vector.shape_cast %83 : vector<8xf32> to vector<8x1xf32>
    %cst_35 = arith.constant 0.0666666701 : f32
    %85 = vector.broadcast %cst_35 : f32 to vector<8x1xf32>
    %86 = arith.mulf %84, %85 : vector<8x1xf32>
    %87 = math.sqrt %86 : vector<8x1xf32>
    %cst_36 = arith.constant 9.99999997E-7 : f32
    %88 = vector.broadcast %cst_36 : f32 to vector<8x1xf32>
    %89 = arith.addf %87, %88 : vector<8x1xf32>
    %90 = tpu.reciprocal %89 {approx = true} : vector<8x1xf32> -> vector<8x1xf32>
    %c0_37 = arith.constant 0 : index
    %c0_38 = arith.constant 0 : index
    %91 = vector.load %arg8[%c0_37, %c0_38] : memref<1x16xf32, #tpu.memory_space<vmem>>, vector<1x16xf32>
    %92 = vector.broadcast %91 : vector<1x16xf32> to vector<8x16xf32>
    %93 = arith.mulf %92, %81 : vector<8x16xf32>
    %94 = vector.broadcast %90 : vector<8x1xf32> to vector<8x16xf32>
    %95 = arith.mulf %93, %94 : vector<8x16xf32>
    %c0_39 = arith.constant 0 : index
    %c0_40 = arith.constant 0 : index
    %96 = vector.load %arg9[%c0_39, %c0_40] : memref<1x16xf32, #tpu.memory_space<vmem>>, vector<1x16xf32>
    %97 = vector.broadcast %96 : vector<1x16xf32> to vector<8x16xf32>
    %98 = arith.addf %95, %97 : vector<8x16xf32>
    %c0_41 = arith.constant 0 : index
    %c0_42 = arith.constant 0 : index
    %99 = vector.load %arg10[%c0_41, %c0_42] : memref<16x64xf32, #tpu.memory_space<vmem>>, vector<16x64xf32>
    %cst_43 = arith.constant dense<0.000000e+00> : vector<8x64xf32>
    %100 = tpu.matmul %98, %99, %cst_43 {dimension_numbers = #tpu.dot_dimension_numbers<[1], [0], [0], [1], [0, 0, 1, 1], [], []>} : vector<8x16xf32>, vector<16x64xf32>, vector<8x64xf32> -> vector<8x64xf32>
    %c0_44 = arith.constant 0 : index
    %c0_45 = arith.constant 0 : index
    %101 = vector.load %arg11[%c0_44, %c0_45] : memref<1x64xf32, #tpu.memory_space<vmem>>, vector<1x64xf32>
    %102 = vector.broadcast %101 : vector<1x64xf32> to vector<8x64xf32>
    %103 = arith.addf %100, %102 : vector<8x64xf32>
    %cst_46 = arith.constant dense<0.000000e+00> : vector<8xf32>
    %104 = vector.multi_reduction <add>, %103, %cst_46 [1] : vector<8x64xf32> to vector<8xf32>
    %105 = vector.shape_cast %104 : vector<8xf32> to vector<8x1xf32>
    %cst_47 = arith.constant 6.400000e+01 : f32
    %106 = vector.broadcast %cst_47 : f32 to vector<8x1xf32>
    %107 = arith.divf %105, %106 : vector<8x1xf32>
    %108 = vector.broadcast %107 : vector<8x1xf32> to vector<8x64xf32>
    %109 = arith.subf %103, %108 : vector<8x64xf32>
    %110 = arith.mulf %109, %109 : vector<8x64xf32>
    %cst_48 = arith.constant dense<0.000000e+00> : vector<8xf32>
    %111 = vector.multi_reduction <add>, %110, %cst_48 [1] : vector<8x64xf32> to vector<8xf32>
    %112 = vector.shape_cast %111 : vector<8xf32> to vector<8x1xf32>
    %cst_49 = arith.constant 0.0158730168 : f32
    %113 = vector.broadcast %cst_49 : f32 to vector<8x1xf32>
    %114 = arith.mulf %112, %113 : vector<8x1xf32>
    %115 = math.sqrt %114 : vector<8x1xf32>
    %cst_50 = arith.constant 9.99999997E-7 : f32
    %116 = vector.broadcast %cst_50 : f32 to vector<8x1xf32>
    %117 = arith.addf %115, %116 : vector<8x1xf32>
    %118 = tpu.reciprocal %117 {approx = true} : vector<8x1xf32> -> vector<8x1xf32>
    %c0_51 = arith.constant 0 : index
    %c0_52 = arith.constant 0 : index
    %119 = vector.load %arg12[%c0_51, %c0_52] : memref<1x64xf32, #tpu.memory_space<vmem>>, vector<1x64xf32>
    %120 = vector.broadcast %119 : vector<1x64xf32> to vector<8x64xf32>
    %121 = arith.mulf %120, %109 : vector<8x64xf32>
    %122 = vector.broadcast %118 : vector<8x1xf32> to vector<8x64xf32>
    %123 = arith.mulf %121, %122 : vector<8x64xf32>
    %c0_53 = arith.constant 0 : index
    %c0_54 = arith.constant 0 : index
    %124 = vector.load %arg13[%c0_53, %c0_54] : memref<1x64xf32, #tpu.memory_space<vmem>>, vector<1x64xf32>
    %125 = vector.broadcast %124 : vector<1x64xf32> to vector<8x64xf32>
    %126 = arith.addf %123, %125 : vector<8x64xf32>
    %c0_55 = arith.constant 0 : index
    %c0_56 = arith.constant 0 : index
    %127 = vector.load %arg14[%c0_55, %c0_56] : memref<64x16xf32, #tpu.memory_space<vmem>>, vector<64x16xf32>
    %cst_57 = arith.constant dense<0.000000e+00> : vector<8x16xf32>
    %128 = tpu.matmul %126, %127, %cst_57 {dimension_numbers = #tpu.dot_dimension_numbers<[1], [0], [0], [1], [0, 0, 1, 1], [], []>} : vector<8x64xf32>, vector<64x16xf32>, vector<8x16xf32> -> vector<8x16xf32>
    %c0_58 = arith.constant 0 : index
    %c0_59 = arith.constant 0 : index
    %129 = vector.load %arg15[%c0_58, %c0_59] : memref<1x16xf32, #tpu.memory_space<vmem>>, vector<1x16xf32>
    %130 = vector.broadcast %129 : vector<1x16xf32> to vector<8x16xf32>
    %131 = arith.addf %128, %130 : vector<8x16xf32>
    %cst_60 = arith.constant dense<0.000000e+00> : vector<8xf32>
    %132 = vector.multi_reduction <add>, %131, %cst_60 [1] : vector<8x16xf32> to vector<8xf32>
    %133 = vector.shape_cast %132 : vector<8xf32> to vector<8x1xf32>
    %cst_61 = arith.constant 1.600000e+01 : f32
    %134 = vector.broadcast %cst_61 : f32 to vector<8x1xf32>
    %135 = arith.divf %133, %134 : vector<8x1xf32>
    %136 = vector.broadcast %135 : vector<8x1xf32> to vector<8x16xf32>
    %137 = arith.subf %131, %136 : vector<8x16xf32>
    %138 = arith.mulf %137, %137 : vector<8x16xf32>
    %cst_62 = arith.constant dense<0.000000e+00> : vector<8xf32>
    %139 = vector.multi_reduction <add>, %138, %cst_62 [1] : vector<8x16xf32> to vector<8xf32>
    %140 = vector.shape_cast %139 : vector<8xf32> to vector<8x1xf32>
    %cst_63 = arith.constant 0.0666666701 : f32
    %141 = vector.broadcast %cst_63 : f32 to vector<8x1xf32>
    %142 = arith.mulf %140, %141 : vector<8x1xf32>
    %143 = math.sqrt %142 : vector<8x1xf32>
    %cst_64 = arith.constant 9.99999997E-7 : f32
    %144 = vector.broadcast %cst_64 : f32 to vector<8x1xf32>
    %145 = arith.addf %143, %144 : vector<8x1xf32>
    %146 = tpu.reciprocal %145 {approx = true} : vector<8x1xf32> -> vector<8x1xf32>
    %c0_65 = arith.constant 0 : index
    %c0_66 = arith.constant 0 : index
    %147 = vector.load %arg16[%c0_65, %c0_66] : memref<1x16xf32, #tpu.memory_space<vmem>>, vector<1x16xf32>
    %148 = vector.broadcast %147 : vector<1x16xf32> to vector<8x16xf32>
    %149 = arith.mulf %148, %137 : vector<8x16xf32>
    %150 = vector.broadcast %146 : vector<8x1xf32> to vector<8x16xf32>
    %151 = arith.mulf %149, %150 : vector<8x16xf32>
    %c0_67 = arith.constant 0 : index
    %c0_68 = arith.constant 0 : index
    %152 = vector.load %arg17[%c0_67, %c0_68] : memref<1x16xf32, #tpu.memory_space<vmem>>, vector<1x16xf32>
    %153 = vector.broadcast %152 : vector<1x16xf32> to vector<8x16xf32>
    %154 = arith.addf %151, %153 : vector<8x16xf32>
    %c0_69 = arith.constant 0 : index
    %c0_70 = arith.constant 0 : index
    %155 = vector.load %arg18[%c0_69, %c0_70] : memref<16x8xf32, #tpu.memory_space<vmem>>, vector<16x8xf32>
    %cst_71 = arith.constant dense<0.000000e+00> : vector<8x8xf32>
    %156 = tpu.matmul %154, %155, %cst_71 {dimension_numbers = #tpu.dot_dimension_numbers<[1], [0], [0], [1], [0, 0, 1, 1], [], []>} : vector<8x16xf32>, vector<16x8xf32>, vector<8x8xf32> -> vector<8x8xf32>
    %c0_72 = arith.constant 0 : index
    %c0_73 = arith.constant 0 : index
    %157 = vector.load %arg19[%c0_72, %c0_73] : memref<1x8xf32, #tpu.memory_space<vmem>>, vector<1x8xf32>
    %158 = vector.broadcast %157 : vector<1x8xf32> to vector<8x8xf32>
    %159 = arith.addf %156, %158 : vector<8x8xf32>
    %cst_74 = arith.constant 0.000000e+00 : f32
    %160 = vector.broadcast %cst_74 : f32 to vector<8x8xf32>
    %161 = arith.maximumf %159, %160 : vector<8x8xf32>
    %c0_75 = arith.constant 0 : index
    %c0_76 = arith.constant 0 : index
    %c0_77 = arith.constant 0 : index
    %162 = vector.load %arg20[%c0_75, %c0_76, %c0_77] : memref<1x8x8xf32, #tpu.memory_space<vmem>>, vector<1x8x8xf32>
    %163 = vector.shape_cast %162 : vector<1x8x8xf32> to vector<8x8xf32>
    %164 = vector.shape_cast %161 : vector<8x8xf32> to vector<1x8x8xf32>
    tpu.vector_store %arg20[%c0_75, %c0_76, %c0_77], %164 {strides = array<i32>} : memref<1x8x8xf32, #tpu.memory_space<vmem>>, vector<1x8x8xf32>,
    return
  }
  func.func @transform_0(%arg0: i32) -> (i32, i32, i32) {
    %c0_i32 = arith.constant 0 : i32
    %c0_i32_0 = arith.constant 0 : i32
    %c0_i32_1 = arith.constant 0 : i32
    return %arg0, %c0_i32, %c0_i32_0 : i32, i32, i32
  }
  func.func @transform_1(%arg0: i32) -> (i32, i32) {
    %c0_i32 = arith.constant 0 : i32
    %c0_i32_0 = arith.constant 0 : i32
    %c0_i32_1 = arith.constant 0 : i32
    return %c0_i32, %c0_i32_0 : i32, i32
  }
  func.func @transform_2(%arg0: i32) -> (i32, i32) {
    %c0_i32 = arith.constant 0 : i32
    %c0_i32_0 = arith.constant 0 : i32
    %c0_i32_1 = arith.constant 0 : i32
    return %c0_i32, %c0_i32_0 : i32, i32
  }
  func.func @transform_3(%arg0: i32) -> (i32, i32) {
    %c0_i32 = arith.constant 0 : i32
    %c0_i32_0 = arith.constant 0 : i32
    %c0_i32_1 = arith.constant 0 : i32
    return %c0_i32, %c0_i32_0 : i32, i32
  }
  func.func @transform_4(%arg0: i32) -> (i32, i32) {
    %c0_i32 = arith.constant 0 : i32
    %c0_i32_0 = arith.constant 0 : i32
    %c0_i32_1 = arith.constant 0 : i32
    return %c0_i32, %c0_i32_0 : i32, i32
  }
  func.func @transform_5(%arg0: i32) -> (i32, i32) {
    %c0_i32 = arith.constant 0 : i32
    %c0_i32_0 = arith.constant 0 : i32
    %c0_i32_1 = arith.constant 0 : i32
    return %c0_i32, %c0_i32_0 : i32, i32
  }
  func.func @transform_6(%arg0: i32) -> (i32, i32) {
    %c0_i32 = arith.constant 0 : i32
    %c0_i32_0 = arith.constant 0 : i32
    %c0_i32_1 = arith.constant 0 : i32
    return %c0_i32, %c0_i32_0 : i32, i32
  }
  func.func @transform_7(%arg0: i32) -> (i32, i32) {
    %c0_i32 = arith.constant 0 : i32
    %c0_i32_0 = arith.constant 0 : i32
    %c0_i32_1 = arith.constant 0 : i32
    return %c0_i32, %c0_i32_0 : i32, i32
  }
  func.func @transform_8(%arg0: i32) -> (i32, i32) {
    %c0_i32 = arith.constant 0 : i32
    %c0_i32_0 = arith.constant 0 : i32
    %c0_i32_1 = arith.constant 0 : i32
    return %c0_i32, %c0_i32_0 : i32, i32
  }
  func.func @transform_9(%arg0: i32) -> (i32, i32) {
    %c0_i32 = arith.constant 0 : i32
    %c0_i32_0 = arith.constant 0 : i32
    %c0_i32_1 = arith.constant 0 : i32
    return %c0_i32, %c0_i32_0 : i32, i32
  }
  func.func @transform_10(%arg0: i32) -> (i32, i32) {
    %c0_i32 = arith.constant 0 : i32
    %c0_i32_0 = arith.constant 0 : i32
    %c0_i32_1 = arith.constant 0 : i32
    return %c0_i32, %c0_i32_0 : i32, i32
  }
  func.func @transform_11(%arg0: i32) -> (i32, i32) {
    %c0_i32 = arith.constant 0 : i32
    %c0_i32_0 = arith.constant 0 : i32
    %c0_i32_1 = arith.constant 0 : i32
    return %c0_i32, %c0_i32_0 : i32, i32
  }
  func.func @transform_12(%arg0: i32) -> (i32, i32) {
    %c0_i32 = arith.constant 0 : i32
    %c0_i32_0 = arith.constant 0 : i32
    %c0_i32_1 = arith.constant 0 : i32
    return %c0_i32, %c0_i32_0 : i32, i32
  }
  func.func @transform_13(%arg0: i32) -> (i32, i32) {
    %c0_i32 = arith.constant 0 : i32
    %c0_i32_0 = arith.constant 0 : i32
    %c0_i32_1 = arith.constant 0 : i32
    return %c0_i32, %c0_i32_0 : i32, i32
  }
  func.func @transform_14(%arg0: i32) -> (i32, i32) {
    %c0_i32 = arith.constant 0 : i32
    %c0_i32_0 = arith.constant 0 : i32
    %c0_i32_1 = arith.constant 0 : i32
    return %c0_i32, %c0_i32_0 : i32, i32
  }
  func.func @transform_15(%arg0: i32) -> (i32, i32) {
    %c0_i32 = arith.constant 0 : i32
    %c0_i32_0 = arith.constant 0 : i32
    %c0_i32_1 = arith.constant 0 : i32
    return %c0_i32, %c0_i32_0 : i32, i32
  }
  func.func @transform_16(%arg0: i32) -> (i32, i32) {
    %c0_i32 = arith.constant 0 : i32
    %c0_i32_0 = arith.constant 0 : i32
    %c0_i32_1 = arith.constant 0 : i32
    return %c0_i32, %c0_i32_0 : i32, i32
  }
  func.func @transform_17(%arg0: i32) -> (i32, i32) {
    %c0_i32 = arith.constant 0 : i32
    %c0_i32_0 = arith.constant 0 : i32
    %c0_i32_1 = arith.constant 0 : i32
    return %c0_i32, %c0_i32_0 : i32, i32
  }
  func.func @transform_18(%arg0: i32) -> (i32, i32) {
    %c0_i32 = arith.constant 0 : i32
    %c0_i32_0 = arith.constant 0 : i32
    %c0_i32_1 = arith.constant 0 : i32
    return %c0_i32, %c0_i32_0 : i32, i32
  }
  func.func @transform_19(%arg0: i32) -> (i32, i32, i32) {
    %c0_i32 = arith.constant 0 : i32
    %c0_i32_0 = arith.constant 0 : i32
    %c0_i32_1 = arith.constant 0 : i32
    return %arg0, %c0_i32, %c0_i32_0 : i32, i32, i32
  }
}

</mosaic_0001>

<bundles_post_ra>
// kernel: _lambda_.4
= control target key start
LH: loop header
LB: loop body
LE: loop exit
PB: predicated region body
PF: predicated region fallthrough
CT: control target
= control target key end

     0   :  { %s2214_s0 = inlined_call_operand.vmem [shape: f32[2,8,16], index: 0, kind: input, shape index: {}]   ;;  %s2215_s1 = inlined_call_operand.hbm [shape: f32[16,48], index: 1, kind: input, shape index: {}]   ;;  %s2216_s2 = inlined_call_operand.hbm [shape: f32[1,48], index: 2, kind: input, shape index: {}]   ;;  %s2217_s3 = inlined_call_operand.hbm [shape: f32[16,16], index: 3, kind: input, shape index: {}]   ;;  %s2218_s4 = inlined_call_operand.hbm [shape: f32[1,16], index: 4, kind: input, shape index: {}]   ;;  %s2219_s5 = inlined_call_operand.vmem [shape: f32[1,16], index: 5, kind: input, shape index: {}, may-alias: {5,7,15}]   ;;  %s2220_s6 = inlined_call_operand.vmem [shape: f32[1,16], index: 6, kind: input, shape index: {}, may-alias: {6,8,16}]   ;;  %s2221_s7 = inlined_call_operand.vmem [shape: f32[1,16], index: 7, kind: input, shape index: {}, may-alias: {5,7,15}]   ;;  %s2222_s8 = inlined_call_operand.vmem [shape: f32[1,16], index: 8, kind: input, shape index: {}, may-alias: {6,8,16}]   ;;  %s2223_s9 = inlined_call_operand.hbm [shape: f32[16,64], index: 9, kind: input, shape index: {}]   ;;  %s2224_s10 = inlined_call_operand.hbm [shape: f32[1,64], index: 10, kind: input, shape index: {}]   ;;  %s2225_s11 = inlined_call_operand.vmem [shape: f32[1,64], index: 11, kind: input, shape index: {}]   ;;  %s2226_s12 = inlined_call_operand.vmem [shape: f32[1,64], index: 12, kind: input, shape index: {}]   ;;  %s2227_s13 = inlined_call_operand.hbm [shape: f32[64,16], index: 13, kind: input, shape index: {}]   ;;  %s2228_s14 = inlined_call_operand.hbm [shape: f32[1,16], index: 14, kind: input, shape index: {}]   ;;  %s2229_s15 = inlined_call_operand.vmem [shape: f32[1,16], index: 15, kind: input, shape index: {}, may-alias: {5,7,15}]   ;;  %s2230_s16 = inlined_call_operand.vmem [shape: f32[1,16], index: 16, kind: input, shape index: {}, may-alias: {6,8,16}]   ;;  %s2231_s17 = inlined_call_operand.hbm [shape: f32[16,8], index: 17, kind: input, shape index: {}]   ;;  %s2232_s18 = inlined_call_operand.hbm [shape: f32[1,8], index: 18, kind: input, shape index: {}]   ;;  %s2233_s19 = inlined_call_operand.vmem [shape: f32[2,8,8], index: 19, kind: output, shape index: {}]  }
   0x1   :  { %2235 = sst [smem:[#allocation25_spill]] %s2214_s0 }
   0x2   :  { %2236 = sst [smem:[#allocation26_spill]] %s2215_s1 }
   0x3   :  { %2237 = sst [smem:[#allocation27_spill]] %s2216_s2 }
   0x4   :  { %2238 = sst [smem:[#allocation28_spill]] %s2217_s3 }
   0x5   :  { %2239 = sst [smem:[#allocation29_spill]] %s2218_s4 }
   0x6   :  { %2240 = sst [smem:[#allocation30_spill]] %s2224_s10 }
   0x7   :  { %2241 = sst [smem:[#allocation31_spill]] %s2230_s16 }
   0x8   :  { %2242 = sst [smem:[#allocation32_spill]] %s2233_s19 }
   0x9   :  { %24 = vsyncpa [#allocation3], 0 }
   0xa   :  { %25 = vsyncpa [#allocation5], 0 }
   0xb   :  { %26 = vsyncpa [#allocation8], 0 }
   0xc   :  { %27 = vsyncpa [#allocation11], 0 }
   0xd   :  { %28 = vsyncpa [#allocation14], 0 }
   0xe   :  { %29 = vsyncpa [#allocation17], 0  ;;  %s2023_s0 = smov 0  }
   0xf LB: > { %2243 = sst [smem:[#allocation24_spill]] %s1902_s0  ;;  %s2032_s22 = sadd.s32 4294967295, %s1902_s0   ;;  %s1902_s0 = sphi %s2023_s0, %s35_s0  }
  0x10   : > { %s2244_s21 = sld [smem:[#allocation27_spill]]  ;;  %p1374_p0 = scmp.ge.s32.totalorder %s1902_s0, 1 }
  0x11   : > { %p470_p1 = scmp.lt.s32.totalorder %s1902_s0, 3  ;;  %p1484_p2 = scmp.eq.s32.totalorder %s2032_s22, 0 }
  0x12   : > { %s1904_s23 = smov [#allocation4]   ;;  %s2246_s4 = sld [smem:[#allocation29_spill]] }
  0x13   : > { %p2037_p3 = pnand %p1374_p0, %p470_p1  ;;  %s498_s24 = sshll.u32 %s1904_s23, 4  ;;  %s499_s24 = int_to_ptr.vmem [resolvable:$true] %s498_s24 }
  0x14   : > { %s2247_s10 = sld [smem:[#allocation30_spill]]  ;;  %s1905_s20 = smov [#allocation7]  }
  0x15   : > { %p1453_p4 = pneg %p2037_p3  ;;  %s1906_s23 = smov [#allocation10]  }
  0x16   : > { %s496_s1 = sshll.u32 %s2244_s21, 4  ;;  %s524_s21 = sshll.u32 %s1905_s20, 4  ;;  %s497_s1 = int_to_ptr.hbm [resolvable:$true] %s496_s1  ;;  %s525_s21 = int_to_ptr.vmem [resolvable:$true] %s524_s21 }
  0x17   : > { %p2051_p5 = pnand %p1484_p2, %p1453_p4  ;;  %s562_s25 = sshll.u32 %s1906_s23, 4  ;;  %s563_s25 = int_to_ptr.vmem [resolvable:$true] %s562_s25 }
  0x18   : > { %s522_s26 = sshll.u32 %s2246_s4, 4  ;;  %s592_s28 = sshll.u32 %s2228_s14, 4  ;;  %s523_s26 = int_to_ptr.hbm [resolvable:$true] %s522_s26  ;;  %s593_s28 = int_to_ptr.hbm [resolvable:$true] %s592_s28 }
  0x19   : > { %1459 = dma.hbm_to_vmem [thread:$0]  (!%p2051_p5), %s497_s1, 16, %s499_s24, [#allocation5]  }
  0x1a   : > { %s560_s29 = sshll.u32 %s2247_s10, 4  ;;  %s2249_s10 = sld [smem:[#allocation26_spill]]  ;;  %s561_s29 = int_to_ptr.hbm [resolvable:$true] %s560_s29 }
  0x1b   : > { %1465 = dma.hbm_to_vmem [thread:$0]  (!%p2051_p5), %s523_s26, 16, %s525_s21, [#allocation8]  }
  0x1c   : > { %1471 = dma.hbm_to_vmem [thread:$0]  (!%p2051_p5), %s561_s29, 16, %s563_s25, [#allocation11]  }
  0x1d   : > { %s1907_s19 = smov [#allocation13]   ;;  %s1908_s1 = smov [#allocation2]  }
  0x1e   : > { %s594_s16 = sshll.u32 %s1907_s19, 4  ;;  %s483_s24 = sshll.u32 %s1908_s1, 4  ;;  %s595_s16 = int_to_ptr.vmem [resolvable:$true] %s594_s16  ;;  %s484_s24 = int_to_ptr.vmem [resolvable:$true] %s483_s24 }
  0x1f   : > { %1477 = dma.hbm_to_vmem [thread:$0]  (!%p2051_p5), %s593_s28, 16, %s595_s16, [#allocation14]  }
  0x20   : > { %s481_s0 = sshll.u32 %s2249_s10, 4  ;;  %s1909_s26 = smov 128   ;;  %s482_s0 = int_to_ptr.hbm [resolvable:$true] %s481_s0 }
  0x21   : > { %s1910_s21 = smov 8   ;;  %s2250_s29 = sld [smem:[#allocation28_spill]] }
  0x22   : > { %1456 = dma.hbm_to_vmem [thread:$0]  (!%p2051_p5), %s482_s0, 256, %s484_s24, [#allocation3], %s1909_s26, %s1909_s26, %s1910_s21  }
  0x23   : > { %s1911_s23 = smov [#allocation6]   ;;  %s545_s27 = sshll.u32 %s2223_s9, 4  ;;  %s546_s27 = int_to_ptr.hbm [resolvable:$true] %s545_s27 }
  0x24   : > { %s509_s25 = sshll.u32 %s1911_s23, 4  ;;  %s1912_s0 = smov [#allocation9]   ;;  %s510_s25 = int_to_ptr.vmem [resolvable:$true] %s509_s25 }
  0x25   : > { %s547_s28 = sshll.u32 %s1912_s0, 4  ;;  %s577_s24 = sshll.u32 %s2227_s13, 4  ;;  %s548_s28 = int_to_ptr.vmem [resolvable:$true] %s547_s28  ;;  %s578_s24 = int_to_ptr.hbm [resolvable:$true] %s577_s24 }
  0x26   : > { %1468 = dma.hbm_to_vmem [thread:$0]  (!%p2051_p5), %s546_s27, 256, %s548_s28, [#allocation8], %s1909_s26, %s1909_s26, %s1910_s21  }
  0x27   : > { %s507_s19 = sshll.u32 %s2250_s29, 4  ;;  %s609_s29 = sshll.u32 %s2231_s17, 4  ;;  %s508_s19 = int_to_ptr.hbm [resolvable:$true] %s507_s19  ;;  %s610_s29 = int_to_ptr.hbm [resolvable:$true] %s609_s29 }
  0x28   : > { %1462 = dma.hbm_to_vmem [thread:$0]  (!%p2051_p5), %s508_s19, 256, %s510_s25, [#allocation5], %s1909_s26, %s1909_s26, %s1910_s21  }
  0x29   : > { %s1913_s19 = smov [#allocation12]   ;;  %s1914_s25 = smov [#allocation15]  }
  0x2a   : > { %s579_s23 = sshll.u32 %s1913_s19, 4  ;;  %s611_s16 = sshll.u32 %s1914_s25, 4  ;;  %s580_s23 = int_to_ptr.vmem [resolvable:$true] %s579_s23  ;;  %s612_s16 = int_to_ptr.vmem [resolvable:$true] %s611_s16 }
  0x2b   : > { %1474 = dma.hbm_to_vmem [thread:$0]  (!%p2051_p5), %s578_s24, 1024, %s580_s23, [#allocation11], %s1909_s26, %s1909_s26, %s1910_s21  }
  0x2c   : > { %s624_s27 = sshll.u32 %s2232_s18, 4  ;;  %s1915_s28 = smov [#allocation16]   ;;  %s625_s27 = int_to_ptr.hbm [resolvable:$true] %s624_s27 }
  0x2d   : > { %1480 = dma.hbm_to_vmem [thread:$0]  (!%p2051_p5), %s610_s29, 256, %s612_s16, [#allocation14], %s1909_s26, %s1909_s26, %s1910_s21  }
  0x2e   : > { %s626_s20 = sshll.u32 %s1915_s28, 4  ;;  %646 = sbr.rel (%p2037_p3) target bundleno = 2476 (0x9ac), region = 96  ;;  %s627_s20 = int_to_ptr.vmem [resolvable:$true] %s626_s20 }
  0x2f   : > { %1483 = dma.hbm_to_vmem [thread:$0]  (!%p2051_p5), %s625_s27, 16, %s627_s20, [#allocation17]  }
  0x33   : > { %1877 = dma.done.wait (%p1484_p2), [#allocation3], 256  }
  0x34   : > { %1879 = vsyncadd (%p1484_p2), [#allocation3], 4294967040 }
  0x35   : > { %1881 = dma.done.wait (%p1484_p2), [#allocation5], 272  }
  0x36   : > { %1883 = vsyncadd (%p1484_p2), [#allocation5], 4294967024 }
  0x37   : > { %1885 = dma.done.wait (%p1484_p2), [#allocation8], 272  }
  0x38   : > { %1887 = vsyncadd (%p1484_p2), [#allocation8], 4294967024 }
  0x39   : > { %1889 = dma.done.wait (%p1484_p2), [#allocation11], 1040  }
  0x3a   : > { %1891 = vsyncadd (%p1484_p2), [#allocation11], 4294966256 }
  0x3b   : > { %1893 = dma.done.wait (%p1484_p2), [#allocation14], 272  }
  0x3c   : > { %1895 = vsyncadd (%p1484_p2), [#allocation14], 4294967024 }
  0x3d   : > { %1897 = dma.done.wait (%p1484_p2), [#allocation17], 16  }
  0x3e   : > { %1899 = vsyncadd (%p1484_p2), [#allocation17], 4294967280  ;;  %p746_p6 = scmp.lt.s32.totalorder %s2032_s22, 1  ;;  %s2251_s21 = sld [smem:[#allocation25_spill]]  ;;  %vm755_vm0 = vcmask 130048   ;;  %v1916_v2 = vmov 16.0  }
  0x3f   : > { %1544 = vrcp.f32 %v1916_v2  ;;  %v799_v14 = vld [vmem:[#allocation2 + $0x8] sm:$0xff]  ;;  %v798_v15 = vld [vmem:[#allocation2] sm:$0xff]  ;;  %v1533_v35 = vld [vmem:[#allocation4] ss:$0 sm:$0xff]  ;;  %s1917_s19 = smov 112   ;;  %s1918_s23 = smov 104  }
  0x40   : > { %s2256_s22 = smov (!%p746_p6, %s2032_s22), 1  ;;  %821 = vmatpush.msra.mxu0 %v799_v14  ;;  %v1531_v29 = vld [vmem:[%s2219_s5] ss:$0 sm:$0xff]  ;;  %s1919_s25 = smov 120   ;;  %vm832_vm4 = vcmask 64512   ;;  %v827_v2 = vld [vmem:[#allocation6] sm:$0xff] }
  0x41   : > { %s1397_s2 = sshll.u32 %s2256_s22, 3  ;;  %v1532_v31 = vld [vmem:[%s2220_s6] ss:$0 sm:$0xff]  ;;  %s1920_s16 = smov 96   ;;  %vm1077_vm7 = vcmask 523264  }
  0x42   : > { %822 = vmatpush.msra.mxu0 %v798_v15  ;;  %s1921_s3 = smov 88  }
  0x44   : > { %s749_s1 = scalar_lea.vmem %s2251_s21, %s1397_s2 }
  0x45   : > { %v2147_v0 = vld [vmem:[%s749_s1] sm:$0xff]  ;;  %v1545_v3 = vpop.eup %1544 }
  0x46   : > { %v756_v1 = vsel %vm755_vm0, %v2147_v0, 0.0  ;;  %v760_v4 = vmul.f32 16.0, %v1545_v3  ;;  %vm764_vm1 = vweird.f32 %v1545_v3 }
  0x47   : > { %757 = vadd.xlane.f32.xlu0 %v756_v1 }
  0x48   : > { %v761_v5 = vsub.f32 1.0, %v760_v4 }
  0x4a   : > { %v762_v6 = vmul.f32 %v1545_v3, %v761_v5 }
  0x4c   : > { %v763_v7 = vadd.f32 %v1545_v3, %v762_v6 }
  0x4e   : > { %v2151_v8 = vsel %vm764_vm1, %v1545_v3, %v763_v7  ;;  %v828_v3 = vld [vmem:[#allocation6 + $0x8] sm:$0xff] }
  0x4f   : > { %979 = vmatpush.msrb.mxu0 %v828_v3 }
  0xba   : > { %v758_v9 = vpop.xlane.xlu0 %757 }
  0xbb   : > { %v766_v10 = vmul.f32 %v2151_v8, %v758_v9 }
  0xbd   : > { %v767_v11 = vsub.f32 %v2147_v0, %v766_v10  ;;  %v1534_v10 = vld [vmem:[#allocation7] ss:$0 sm:$0xff] }
  0xbf   : > { %v768_v12 = vmul.f32 %v767_v11, %v767_v11  ;;  %v791_v30 = vmul.f32 %v1531_v29, %v767_v11 }
  0xc1   : > { %v769_v13 = vsel %vm755_vm0, %v768_v12, 0.0 }
  0xc2   : > { %770 = vadd.xlane.f32.xlu0 %v769_v13 }
 0x135   : > { %v771_v16 = vpop.xlane.xlu0 %770 }
 0x136   : > { %v772_v17 = vmul.f32 0.06666667, %v771_v16 }
 0x138   : > { %1546 = vrsqrt.f32 %v772_v17  ;;  %vm780_vm2 = vcmp.eq.f32.partialorder %v772_v17, inf  ;;  %v783_v25 = vand.u32 2147483648, %v772_v17  ;;  %vm782_vm3 = vcmp.eq.f32.partialorder %v772_v17, 0.0 }
 0x13e   : > { %v1547_v18 = vpop.eup %1546 }
 0x13f   : > { %v774_v19 = vmul.f32 %v1547_v18, %v772_v17 }
 0x141   : > { %v775_v20 = vmul.f32 %v1547_v18, %v774_v19  ;;  %v1049_v19 = vld [vmem:[#allocation9 + $0x8] sm:$0xff] }
 0x143   : > { %v776_v21 = vmul.f32 0.5, %v775_v20  ;;  %v1048_v20 = vld [vmem:[#allocation9] sm:$0xff] }
 0x145   : > { %v777_v22 = vsub.f32 1.5, %v776_v21 }
 0x147   : > { %v778_v23 = vmul.f32 %v1547_v18, %v777_v22 }
 0x149   : > { %v779_v24 = vmul.f32 %v778_v23, %v772_v17 }
 0x14b   : > { %v781_v26 = vsel %vm780_vm2, %v772_v17, %v779_v24 }
 0x14c   : > { %v784_v27 = vsel %vm782_vm3, %v783_v25, %v781_v26 }
 0x14d   : > { %v785_v28 = vadd.f32 1e-06, %v784_v27 }
 0x14f   : > { %1548 = vrcp.f32 %v785_v28 }
 0x155   : > { %v1549_v32 = vpop.eup %1548 }
 0x156   : > { %v792_v33 = vmul.f32 %v1549_v32, %v791_v30 }
 0x158   : > { %v797_v34 = vadd.f32 %v1532_v31, %v792_v33  ;;  %v1535_v33 = vld [vmem:[%s2221_s7] ss:$0 sm:$0xff] }
 0x15a   : > { %1399 = vmatmul.msk.f32.vlgmr.msra.gmra.mxu0 %vm755_vm0, %v797_v34 }
 0x1d7   : > { %v824_v36 = vpop.f32.mrf.mxu0 }
 0x1d8   : > { %v825_v37 = vadd.f32 %v1533_v35, %v824_v36  ;;  %v1536_v35 = vld [vmem:[%s2222_s8] ss:$0 sm:$0xff] }
 0x1da   : > { %830 = vrot.lane.b32.xlu2 %v825_v37, %s1917_s19  ;;  %897 = vrot.lane.b32.xlu1 %v825_v37, %s1918_s23  ;;  %s2252_s19 = sld [smem:[#allocation31_spill]] }
 0x1e2   : > { %895 = vrot.lane.b32.xlu1 %v825_v37, %s1919_s25 }
 0x234   : > { %v831_v38 = vpop.permute.xlu2 %830 }
 0x235   : > { %1400 = vmatpush.xpose.msk.msra.mxu1 %vm832_vm4, %v831_v38 }
 0x238   : > { %1401 = vmatmul.msk.f32.vlgmr.msra.gmra.mxu1 %vm832_vm4, %v825_v37 }
 0x24c   : > { %v898_v39 = vpop.permute.xlu1 %897 }
 0x24d   : > { %1403 = vmatpush.xpose.msk.msra.mxu3 %vm832_vm4, %v898_v39  ;;  %v1537_v39 = vld [vmem:[#allocation10] ss:$0 sm:$0xff] }
 0x251   : > { %1071 = vmatpush.msrb.mxu3 %v1049_v19 }
 0x253   : > { %1072 = vmatpush.msrb.mxu3 %v1048_v20  ;;  %v1540_v20 = vld [vmem:[#allocation13] ss:$0 sm:$0xff] }
 0x254   : > { %v896_v40 = vpop.permute.xlu1 %895 }
 0x255   : > { %1404 = vmatmul.msk.f32.vlgmr.msra.gmra.mxu3 %vm832_vm4, %v896_v40 }
 0x2b5   : > { %v854_v41 = vpop.f32.mrf.mxu1 }
 0x2b6   : > { %v857_v42 = vmul.f32 0.35355338, %v854_v41 }
 0x2b8   : > { %v858_v43 = vsel %vm832_vm4, %v857_v42, -inf }
 0x2b9   : > { %859 = vmax.xlane.f32.xlu0 %v858_v43  ;;  %v1922_v43 = vmov 64.0  }
 0x2d8   : > { %v920_v44 = vpop.f32.mrf.mxu3 }
 0x2d9   : > { %v923_v45 = vmul.f32 0.35355338, %v920_v44 }
 0x2db   : > { %v924_v46 = vsel %vm832_vm4, %v923_v45, -inf }
 0x2dc   : > { %925 = vmax.xlane.f32.xlu2 %v924_v46 }
 0x2f4   : > { %869 = vrot.lane.b32.xlu2 %v825_v37, %s1920_s16  ;;  %s2253_s16 = sld [smem:[#allocation32_spill]] }
 0x32c   : > { %v860_v47 = vpop.xlane.xlu0 %859 }
 0x32d   : > { %v861_v48 = vsub.f32 %v857_v42, %v860_v47 }
 0x32f   : > { %v862_v49 = vmul.f32 1.442695, %v861_v48 }
 0x331   : > { %1550 = vpow2.f32 %v862_v49 }
 0x337   : > { %v1551_v50 = vpop.eup %1550 }
 0x338   : > { %v864_v51 = vsel %vm832_vm4, %v1551_v50, 0.0 }
 0x339   : > { %865 = vadd.xlane.f32.xlu0 %v864_v51 }
 0x34d   : > { %935 = vrot.lane.b32.xlu0 %v825_v37, %s1921_s3  ;;  %s753_s3 = scalar_lea.vmem %s2253_s16, %s1397_s2 }
 0x34f   : > { %v926_v52 = vpop.xlane.xlu2 %925 }
 0x350   : > { %v927_v53 = vsub.f32 %v923_v45, %v926_v52 }
 0x352   : > { %v928_v54 = vmul.f32 1.442695, %v927_v53 }
 0x354   : > { %1552 = vpow2.f32 %v928_v54 }
 0x357   : > { %v870_v55 = vpop.permute.xlu2 %869 }
 0x358   : > { %890 = vmatpush.msrb.mxu1 %v870_v55  ;;  %v1127_v55 = vld [vmem:[#allocation12 + $0x38] sm:$0xff] }
 0x35a   : > { %v1553_v56 = vpop.eup %1552  ;;  %1002 = vmatpush.msra.mxu1 %v827_v2 }
 0x35b   : > { %v930_v57 = vsel %vm832_vm4, %v1553_v56, 0.0 }
 0x35c   : > { %931 = vadd.xlane.f32.xlu1 %v930_v57  ;;  %v1125_v57 = vld [vmem:[#allocation12 + $0x28] sm:$0xff] }
 0x3ac   : > { %v866_v58 = vpop.xlane.xlu0 %865 }
 0x3ad   : > { %1554 = vrcp.f32 %v866_v58  ;;  %v1124_v58 = vld [vmem:[#allocation12 + $0x20] sm:$0xff] }
 0x3b3   : > { %v1555_v59 = vpop.eup %1554 }
 0x3b4   : > { %v868_v60 = vmul.f32 %v1555_v59, %v1551_v50  ;;  %v1123_v59 = vld [vmem:[#allocation12 + $0x18] sm:$0xff] }
 0x3b6   : > { %1402 = vmatmul.msk.f32.vlgmr.msrb.gmra.mxu1 %vm832_vm4, %v868_v60  ;;  %v1122_v60 = vld [vmem:[#allocation12 + $0x10] sm:$0xff] }
 0x3bf   : > { %v936_v61 = vpop.permute.xlu0 %935 }
 0x3c0   : > { %956 = vmatpush.msra.mxu2 %v936_v61  ;;  %v1121_v61 = vld [vmem:[#allocation12 + $0x8] sm:$0xff] }
 0x3c2   : > { %1143 = vmatpush.msrb.mxu2 %v1127_v55 }
 0x3cf   : > { %v932_v62 = vpop.xlane.xlu1 %931 }
 0x3d0   : > { %1556 = vrcp.f32 %v932_v62  ;;  %v1120_v62 = vld [vmem:[#allocation12] sm:$0xff] }
 0x3d6   : > { %v1557_v63 = vpop.eup %1556 }
 0x3d7   : > { %v934_v1 = vmul.f32 %v1557_v63, %v1553_v56  ;;  %v1126_v56 = vld [vmem:[#allocation12 + $0x30] sm:$0xff] }
 0x3d8   : > { %1144 = vmatpush.msrb.mxu2 %v1126_v56 }
 0x3d9   : > { %1405 = vmatmul.msk.f32.vlgmr.msra.gmra.mxu2 %vm832_vm4, %v934_v1 }
 0x3da   : > { %1145 = vmatpush.msrb.mxu2 %v1125_v57 }
 0x3dc   : > { %1146 = vmatpush.msrb.mxu2 %v1124_v58 }
 0x3de   : > { %1147 = vmatpush.msrb.mxu2 %v1123_v59 }
 0x3e0   : > { %1148 = vmatpush.msrb.mxu2 %v1122_v60 }
 0x3e2   : > { %1149 = vmatpush.msrb.mxu2 %v1121_v61 }
 0x3e4   : > { %1150 = vmatpush.msrb.mxu2 %v1120_v62 }
 0x433   : > { %v892_v4 = vpop.f32.mrf.mxu1 }
 0x434   : > { %1407 = vmatmul.msk.f32.vlgmr.msra.gmra.mxu1 %vm832_vm4, %v892_v4 }
 0x45c   : > { %v958_v5 = vpop.f32.mrf.mxu2 }
 0x45d   : > { %1406 = vmatmul.msk.f32.vlgmr.msrb.gmra.mxu0 %vm832_vm4, %v958_v5 }
 0x4b1   : > { %v1004_v6 = vpop.f32.mrf.mxu1 }
 0x4da   : > { %v981_v7 = vpop.f32.mrf.mxu0 }
 0x4db   : > { %v1005_v9 = vadd.f32 %v1004_v6, %v981_v7 }
 0x4dd   : > { %v1007_v11 = vadd.f32 %v1005_v9, %v2147_v0 }
 0x4df   : > { %v1012_v12 = vadd.f32 %v1534_v10, %v1007_v11 }
 0x4e1   : > { %v1013_v13 = vsel %vm755_vm0, %v1012_v12, 0.0 }
 0x4e2   : > { %1014 = vadd.xlane.f32.xlu0 %v1013_v13 }
 0x555   : > { %v1015_v14 = vpop.xlane.xlu0 %1014 }
 0x556   : > { %v1016_v15 = vmul.f32 %v1015_v14, %v2151_v8  ;;  %v1538_v14 = vld [vmem:[%s2225_s11] ss:$0 sm:$0xff] }
 0x558   : > { %v1017_v16 = vsub.f32 %v1012_v12, %v1016_v15 }
 0x55a   : > { %v1018_v17 = vmul.f32 %v1017_v16, %v1017_v16  ;;  %v1041_v34 = vmul.f32 %v1535_v33, %v1017_v16  ;;  %v1539_v16 = vld [vmem:[%s2226_s12] ss:$0 sm:$0xff] }
 0x55c   : > { %v1019_v18 = vsel %vm755_vm0, %v1018_v17, 0.0 }
 0x55d   : > { %1020 = vadd.xlane.f32.xlu1 %v1019_v18 }
 0x5d0   : > { %v1021_v21 = vpop.xlane.xlu1 %1020 }
 0x5d1   : > { %v1022_v22 = vmul.f32 0.06666667, %v1021_v21 }
 0x5d3   : > { %1558 = vrsqrt.f32 %v1022_v22  ;;  %vm1030_vm5 = vcmp.eq.f32.partialorder %v1022_v22, inf  ;;  %v1033_v29 = vand.u32 2147483648, %v1022_v22  ;;  %vm1032_vm6 = vcmp.eq.f32.partialorder %v1022_v22, 0.0 }
 0x5d9   : > { %v1559_v0 = vpop.eup %1558 }
 0x5da   : > { %v1024_v23 = vmul.f32 %v1559_v0, %v1022_v22 }
 0x5dc   : > { %v1025_v24 = vmul.f32 %v1559_v0, %v1024_v23 }
 0x5de   : > { %v1026_v25 = vmul.f32 0.5, %v1025_v24 }
 0x5e0   : > { %v1027_v26 = vsub.f32 1.5, %v1026_v25 }
 0x5e2   : > { %v1028_v27 = vmul.f32 %v1559_v0, %v1027_v26 }
 0x5e4   : > { %v1029_v28 = vmul.f32 %v1028_v27, %v1022_v22 }
 0x5e6   : > { %v1031_v30 = vsel %vm1030_vm5, %v1022_v22, %v1029_v28  ;;  %v1191_v28 = vld [vmem:[#allocation15 + $0x8] sm:$0xff] }
 0x5e7   : > { %v1034_v31 = vsel %vm1032_vm6, %v1033_v29, %v1031_v30  ;;  %v1190_v29 = vld [vmem:[#allocation15] sm:$0xff]  ;;  %1213 = vmatpush.msra.mxu0 %v1191_v28 }
 0x5e8   : > { %v1035_v32 = vadd.f32 1e-06, %v1034_v31 }
 0x5e9   : > { %1214 = vmatpush.msra.mxu0 %v1190_v29 }
 0x5ea   : > { %1560 = vrcp.f32 %v1035_v32 }
 0x5eb   : > { %1562 = vrcp.f32 %v1922_v43 }
 0x5f0   : > { %v1561_v36 = vpop.eup %1560 }
 0x5f1   : > { %v1042_v37 = vmul.f32 %v1561_v36, %v1041_v34  ;;  %v1563_v44 = vpop.eup %1562 }
 0x5f2   : > { %v1082_v45 = vmul.f32 64.0, %v1563_v44  ;;  %vm1086_vm8 = vweird.f32 %v1563_v44 }
 0x5f3   : > { %v1047_v38 = vadd.f32 %v1536_v35, %v1042_v37 }
 0x5f4   : > { %v1083_v46 = vsub.f32 1.0, %v1082_v45 }
 0x5f5   : > { %1408 = vmatmul.msk.f32.vlgmr.msrb.gmra.mxu3 %vm755_vm0, %v1047_v38 }
 0x5f6   : > { %v1084_v47 = vmul.f32 %v1563_v44, %v1083_v46 }
 0x5f8   : > { %v1085_v48 = vadd.f32 %v1563_v44, %v1084_v47 }
 0x5fa   : > { %v1087_v49 = vsel %vm1086_vm8, %v1563_v44, %v1085_v48  ;;  %v1542_v44 = vld [vmem:[%s2252_s19] ss:$0 sm:$0xff]  ;;  %v1543_v48 = vld [vmem:[#allocation16] ss:$0 sm:$0xff] }
 0x678   : > { %v1074_v40 = vpop.f32.mrf.mxu3 }
 0x679   : > { %v1075_v41 = vadd.f32 %v1537_v39, %v1074_v40 }
 0x67b   : > { %v1078_v42 = vsel %vm1077_vm7, %v1075_v41, 0.0 }
 0x67c   : > { %1079 = vadd.xlane.f32.xlu1 %v1078_v42  ;;  %v1541_v42 = vld [vmem:[%s2229_s15] ss:$0 sm:$0xff] }
 0x6ef   : > { %v1080_v50 = vpop.xlane.xlu1 %1079 }
 0x6f0   : > { %v1088_v51 = vmul.f32 %v1087_v49, %v1080_v50 }
 0x6f2   : > { %v1089_v52 = vsub.f32 %v1075_v41, %v1088_v51 }
 0x6f4   : > { %v1090_v53 = vmul.f32 %v1089_v52, %v1089_v52  ;;  %v1113_v15 = vmul.f32 %v1538_v14, %v1089_v52 }
 0x6f6   : > { %v1091_v54 = vsel %vm1077_vm7, %v1090_v53, 0.0 }
 0x6f7   : > { %1092 = vadd.xlane.f32.xlu2 %v1091_v54 }
 0x76a   : > { %v1093_v63 = vpop.xlane.xlu2 %1092 }
 0x76b   : > { %v1094_v1 = vmul.f32 0.015873017, %v1093_v63 }
 0x76d   : > { %1564 = vrsqrt.f32 %v1094_v1  ;;  %vm1102_vm9 = vcmp.eq.f32.partialorder %v1094_v1, inf  ;;  %v1105_v10 = vand.u32 2147483648, %v1094_v1  ;;  %vm1104_vm10 = vcmp.eq.f32.partialorder %v1094_v1, 0.0 }
 0x773   : > { %v1565_v2 = vpop.eup %1564 }
 0x774   : > { %v1096_v3 = vmul.f32 %v1565_v2, %v1094_v1 }
 0x776   : > { %v1097_v4 = vmul.f32 %v1565_v2, %v1096_v3 }
 0x778   : > { %v1098_v5 = vmul.f32 0.5, %v1097_v4 }
 0x77a   : > { %v1099_v6 = vsub.f32 1.5, %v1098_v5 }
 0x77c   : > { %v1100_v7 = vmul.f32 %v1565_v2, %v1099_v6 }
 0x77e   : > { %v1101_v9 = vmul.f32 %v1100_v7, %v1094_v1 }
 0x780   : > { %v1103_v11 = vsel %vm1102_vm9, %v1094_v1, %v1101_v9 }
 0x781   : > { %v1106_v12 = vsel %vm1104_vm10, %v1105_v10, %v1103_v11 }
 0x782   : > { %v1107_v13 = vadd.f32 1e-06, %v1106_v12 }
 0x784   : > { %1566 = vrcp.f32 %v1107_v13 }
 0x78a   : > { %v1567_v17 = vpop.eup %1566 }
 0x78b   : > { %v1114_v18 = vmul.f32 %v1567_v17, %v1113_v15 }
 0x78d   : > { %v1119_v19 = vadd.f32 %v1539_v16, %v1114_v18 }
 0x78f   : > { %1409 = vmatmul.msk.f32.vlgmr.msrb.gmra.mxu2 %vm1077_vm7, %v1119_v19 }
 0x812   : > { %v1152_v21 = vpop.f32.mrf.mxu2 }
 0x813   : > { %v1153_v22 = vadd.f32 %v1540_v20, %v1152_v21 }
 0x815   : > { %v1155_v0 = vsel %vm755_vm0, %v1153_v22, 0.0 }
 0x816   : > { %1156 = vadd.xlane.f32.xlu1 %v1155_v0 }
 0x889   : > { %v1157_v23 = vpop.xlane.xlu1 %1156 }
 0x88a   : > { %v1158_v24 = vmul.f32 %v1157_v23, %v2151_v8 }
 0x88c   : > { %v1159_v25 = vsub.f32 %v1153_v22, %v1158_v24 }
 0x88e   : > { %v1160_v26 = vmul.f32 %v1159_v25, %v1159_v25  ;;  %v1183_v43 = vmul.f32 %v1541_v42, %v1159_v25 }
 0x890   : > { %v1161_v27 = vsel %vm755_vm0, %v1160_v26, 0.0 }
 0x891   : > { %1162 = vadd.xlane.f32.xlu1 %v1161_v27 }
 0x904   : > { %v1163_v30 = vpop.xlane.xlu1 %1162 }
 0x905   : > { %v1164_v31 = vmul.f32 0.06666667, %v1163_v30 }
 0x907   : > { %1568 = vrsqrt.f32 %v1164_v31  ;;  %vm1172_vm11 = vcmp.eq.f32.partialorder %v1164_v31, inf  ;;  %v1175_v8 = vand.u32 2147483648, %v1164_v31  ;;  %vm1174_vm12 = vcmp.eq.f32.partialorder %v1164_v31, 0.0 }
 0x90d   : > { %v1569_v32 = vpop.eup %1568 }
 0x90e   : > { %v1166_v33 = vmul.f32 %v1569_v32, %v1164_v31 }
 0x910   : > { %v1167_v34 = vmul.f32 %v1569_v32, %v1166_v33 }
 0x912   : > { %v1168_v35 = vmul.f32 0.5, %v1167_v34 }
 0x914   : > { %v1169_v36 = vsub.f32 1.5, %v1168_v35 }
 0x916   : > { %v1170_v37 = vmul.f32 %v1569_v32, %v1169_v36 }
 0x918   : > { %v1171_v38 = vmul.f32 %v1170_v37, %v1164_v31 }
 0x91a   : > { %v1173_v39 = vsel %vm1172_vm11, %v1164_v31, %v1171_v38 }
 0x91b   : > { %v1176_v40 = vsel %vm1174_vm12, %v1175_v8, %v1173_v39 }
 0x91c   : > { %v1177_v41 = vadd.f32 1e-06, %v1176_v40 }
 0x91e   : > { %1570 = vrcp.f32 %v1177_v41 }
 0x924   : > { %v1571_v45 = vpop.eup %1570 }
 0x925   : > { %v1184_v46 = vmul.f32 %v1571_v45, %v1183_v43 }
 0x927   : > { %v1189_v47 = vadd.f32 %v1542_v44, %v1184_v46 }
 0x929   : > { %1410 = vmatmul.msk.f32.vlgmr.msra.gmra.mxu0 %vm755_vm0, %v1189_v47 }
 0x9a6   : > { %v1216_v49 = vpop.f32.mrf.mxu0 }
 0x9a7   : > { %v1217_v50 = vadd.f32 %v1543_v48, %v1216_v49 }
 0x9a9   : > { %v1219_v51 = vmax.f32 %v1217_v50, 0.0 }
 0x9ab   : > { %1220 = vst.msk [vmem:[%s753_s3] sm:$0xff] %vm832_vm4, %v1219_v51 }
 0x9ac PF: > { %s2254_s0 = sld [smem:[#allocation24_spill]] }
 0x9b2   : > { %s35_s0 = sadd.s32 1, %s2254_s0  }
 0x9b3   : > { %p32_p7 = scmp.ge.s32.totalorder %s35_s0, 4  }
 0x9b5   :  { %34 = sbr.rel (!%p32_p7) target bundleno = 15 (0xf), region = 167 }
 0x9ba   :  { %1240 = vsyncpa [#allocation3], 1 }
 0x9bb   :  { %1242 = vsyncpa [#allocation3 + $0x1], 1 }
 0x9bc   :  { %1243 = vsyncpa [#allocation5], 1 }
 0x9bd   :  { %1244 = vsyncpa [#allocation8], 1 }
 0x9be   :  { %1245 = vsyncpa [#allocation11], 1 }
 0x9bf   :  { %1246 = vsyncpa [#allocation14], 1 }
 0x9c0   :  { %1247 = vsyncpa [#allocation17], 1 }

// kernel: _lambda_.3
= control target key start
LH: loop header
LB: loop body
LE: loop exit
PB: predicated region body
PF: predicated region fallthrough
CT: control target
= control target key end

     0   :  { %s2317_s0 = inlined_call_operand.hbm [shape: f32[2,8,32], index: 0, kind: input, shape index: {}]   ;;  %s2318_s1 = inlined_call_operand.vmem [shape: f32[32,96], index: 1, kind: input, shape index: {}]   ;;  %s2319_s2 = inlined_call_operand.hbm [shape: f32[1,96], index: 2, kind: input, shape index: {}]   ;;  %s2320_s3 = inlined_call_operand.hbm [shape: f32[32,32], index: 3, kind: input, shape index: {}]   ;;  %s2321_s4 = inlined_call_operand.hbm [shape: f32[1,32], index: 4, kind: input, shape index: {}]   ;;  %s2322_s5 = inlined_call_operand.vmem [shape: f32[1,32], index: 5, kind: input, shape index: {}, may-alias: {5,7,15}]   ;;  %s2323_s6 = inlined_call_operand.vmem [shape: f32[1,32], index: 6, kind: input, shape index: {}, may-alias: {6,8,16}]   ;;  %s2324_s7 = inlined_call_operand.vmem [shape: f32[1,32], index: 7, kind: input, shape index: {}, may-alias: {5,7,15}]   ;;  %s2325_s8 = inlined_call_operand.vmem [shape: f32[1,32], index: 8, kind: input, shape index: {}, may-alias: {6,8,16}]   ;;  %s2326_s9 = inlined_call_operand.hbm [shape: f32[32,128], index: 9, kind: input, shape index: {}]   ;;  %s2327_s10 = inlined_call_operand.hbm [shape: f32[1,128], index: 10, kind: input, shape index: {}]   ;;  %s2328_s11 = inlined_call_operand.vmem [shape: f32[1,128], index: 11, kind: input, shape index: {}]   ;;  %s2329_s12 = inlined_call_operand.vmem [shape: f32[1,128], index: 12, kind: input, shape index: {}]   ;;  %s2330_s13 = inlined_call_operand.hbm [shape: f32[128,32], index: 13, kind: input, shape index: {}]   ;;  %s2331_s14 = inlined_call_operand.hbm [shape: f32[1,32], index: 14, kind: input, shape index: {}]   ;;  %s2332_s15 = inlined_call_operand.vmem [shape: f32[1,32], index: 15, kind: input, shape index: {}, may-alias: {5,7,15}]   ;;  %s2333_s16 = inlined_call_operand.vmem [shape: f32[1,32], index: 16, kind: input, shape index: {}, may-alias: {6,8,16}]   ;;  %s2334_s17 = inlined_call_operand.hbm [shape: f32[32,16], index: 17, kind: input, shape index: {}]   ;;  %s2335_s18 = inlined_call_operand.hbm [shape: f32[1,16], index: 18, kind: input, shape index: {}]   ;;  %s2336_s19 = inlined_call_operand.vmem [shape: f32[2,8,16], index: 19, kind: output, shape index: {}]  }
   0x1   :  { %2339 = sst [smem:[#allocation24_spill]] %s2317_s0 }
   0x2   :  { %2340 = sst [smem:[#allocation25_spill]] %s2318_s1 }
   0x3   :  { %2341 = sst [smem:[#allocation26_spill]] %s2319_s2 }
   0x4   :  { %2342 = sst [smem:[#allocation27_spill]] %s2320_s3 }
   0x5   :  { %2343 = sst [smem:[#allocation28_spill]] %s2321_s4 }
   0x6   :  { %2344 = sst [smem:[#allocation29_spill]] %s2325_s8 }
   0x7   :  { %2345 = sst [smem:[#allocation30_spill]] %s2327_s10 }
   0x8   :  { %2346 = sst [smem:[#allocation31_spill]] %s2328_s11 }
   0x9   :  { %2347 = sst [smem:[#allocation32_spill]] %s2329_s12 }
   0xa   :  { %2348 = sst [smem:[#allocation33_spill]] %s2332_s15 }
   0xb   :  { %2349 = sst [smem:[#allocation34_spill]] %s2333_s16 }
   0xc   :  { %2350 = sst [smem:[#allocation35_spill]] %s2336_s19 }
   0xd   :  { %24 = vsyncpa [#allocation3], 0 }
   0xe   :  { %26 = vsyncpa [#allocation3 + $0x1], 0 }
   0xf   :  { %27 = vsyncpa [#allocation5], 0 }
  0x10   :  { %28 = vsyncpa [#allocation8], 0 }
  0x11   :  { %29 = vsyncpa [#allocation11], 0 }
  0x12   :  { %30 = vsyncpa [#allocation14], 0 }
  0x13   :  { %31 = vsyncpa [#allocation17], 0  ;;  %s2081_s0 = smov 0   ;;  %s2083_s30 = smov 0  }
  0x14   :  { %s2085_s20 = smov 0   ;;  %s2087_s21 = smov 0  }
  0x15 LB: > { %s2351_s2 = sld [smem:[#allocation26_spill]]  ;;  %s2105_s24 = sadd.s32 4294967295, %s1961_s21   ;;  %s1961_s21 = sphi %s2087_s21, %s2370_s21   ;;  %s1957_s20 = sphi %s2085_s20, %s2369_s20   ;;  %s1953_s30 = sphi %s2083_s30, %s2368_s30   ;;  %s1949_s0 = sphi %s2081_s0, %s2367_s0  }
  0x16   : > { %p1389_p0 = scmp.ge.s32.totalorder %s1961_s21, 1  ;;  %p58_p1 = scmp.eq.s32.totalorder %s2105_s24, 0 }
  0x17   : > { %p472_p2 = scmp.lt.s32.totalorder %s1961_s21, 3  ;;  %s1963_s3 = smov [#allocation4]  }
  0x18   : > { %s489_s26 = sshll.u32 %s1963_s3, 4  ;;  %s2353_s4 = sld [smem:[#allocation28_spill]]  ;;  %s490_s26 = int_to_ptr.vmem [resolvable:$true] %s489_s26 }
  0x19   : > { %p2110_p3 = pnand %p1389_p0, %p472_p2  ;;  %s1964_s22 = smov [#allocation7]  }
  0x1a   : > { %s2355_s10 = sld [smem:[#allocation30_spill]]  ;;  %s1965_s15 = smov [#allocation10]  }
  0x1b   : > { %s487_s23 = sshll.u32 %s2351_s2, 4  ;;  %p1465_p4 = pneg %p2110_p3  ;;  %s488_s23 = int_to_ptr.hbm [resolvable:$true] %s487_s23 }
  0x1c   : > { %s515_s2 = sshll.u32 %s1964_s22, 4  ;;  %s553_s12 = sshll.u32 %s1965_s15, 4  ;;  %s516_s2 = int_to_ptr.vmem [resolvable:$true] %s515_s2  ;;  %s554_s12 = int_to_ptr.vmem [resolvable:$true] %s553_s12 }
  0x1d   : > { %p2121_p5 = pnand %p1465_p4, %p58_p1  ;;  %s1966_s22 = smov [#allocation13]  }
  0x1e   : > { %s513_s29 = sshll.u32 %s2353_s4, 4  ;;  %s583_s4 = sshll.u32 %s2331_s14, 4  ;;  %s514_s29 = int_to_ptr.hbm [resolvable:$true] %s513_s29  ;;  %s584_s4 = int_to_ptr.hbm [resolvable:$true] %s583_s4 }
  0x1f   : > { %1468 = dma.hbm_to_vmem [thread:$0]  (!%p2121_p5), %s488_s23, 16, %s490_s26, [#allocation5]  }
  0x20   : > { %s551_s16 = sshll.u32 %s2355_s10, 4  ;;  %s585_s19 = sshll.u32 %s1966_s22, 4  ;;  %s552_s16 = int_to_ptr.hbm [resolvable:$true] %s551_s16  ;;  %s586_s19 = int_to_ptr.vmem [resolvable:$true] %s585_s19 }
  0x21   : > { %1474 = dma.hbm_to_vmem [thread:$0]  (!%p2121_p5), %s514_s29, 16, %s516_s2, [#allocation8]  }
  0x22   : > { %1480 = dma.hbm_to_vmem [thread:$0]  (!%p2121_p5), %s552_s16, 16, %s554_s12, [#allocation11]  }
  0x23   : > { %s2356_s11 = sld [smem:[#allocation27_spill]]  ;;  %s1967_s23 = smov [#allocation6]  }
  0x24   : > { %1486 = dma.hbm_to_vmem [thread:$0]  (!%p2121_p5), %s584_s4, 16, %s586_s19, [#allocation14]  }
  0x25   : > { %s500_s26 = sshll.u32 %s1967_s23, 4  ;;  %s536_s2 = sshll.u32 %s2326_s9, 4  ;;  %s501_s26 = int_to_ptr.vmem [resolvable:$true] %s500_s26  ;;  %s537_s2 = int_to_ptr.hbm [resolvable:$true] %s536_s2 }
  0x26   : > { %s1968_s12 = smov 128   ;;  %s1969_s16 = smov 8  }
  0x27   : > { %s1970_s10 = smov [#allocation9]   ;;  %s568_s4 = sshll.u32 %s2330_s13, 4  ;;  %s569_s4 = int_to_ptr.hbm [resolvable:$true] %s568_s4 }
  0x28   : > { %s600_s3 = sshll.u32 %s2334_s17, 4  ;;  %s1971_s23 = smov [#allocation12]   ;;  %s601_s3 = int_to_ptr.hbm [resolvable:$true] %s600_s3 }
  0x29   : > { %s498_s8 = sshll.u32 %s2356_s11, 4  ;;  %s538_s11 = sshll.u32 %s1970_s10, 4  ;;  %s499_s8 = int_to_ptr.hbm [resolvable:$true] %s498_s8  ;;  %s539_s11 = int_to_ptr.vmem [resolvable:$true] %s538_s11 }
  0x2a   : > { %1471 = dma.hbm_to_vmem [thread:$0]  (!%p2121_p5), %s499_s8, 512, %s501_s26, [#allocation5], %s1968_s12, %s1968_s12, %s1969_s16  }
  0x2b   : > { %1477 = dma.hbm_to_vmem [thread:$0]  (!%p2121_p5), %s537_s2, 512, %s539_s11, [#allocation8], %s1968_s12, %s1968_s12, %s1969_s16  }
  0x2c   : > { %s570_s8 = sshll.u32 %s1971_s23, 4  ;;  %s1972_s26 = smov [#allocation15]   ;;  %s571_s8 = int_to_ptr.vmem [resolvable:$true] %s570_s8 }
  0x2d   : > { %1483 = dma.hbm_to_vmem [thread:$0]  (!%p2121_p5), %s569_s4, 2048, %s571_s8, [#allocation11], %s1968_s12, %s1968_s12, %s1969_s16  }
  0x2e   : > { %s602_s15 = sshll.u32 %s1972_s26, 4  ;;  %s615_s10 = sshll.u32 %s2335_s18, 4  ;;  %s603_s15 = int_to_ptr.vmem [resolvable:$true] %s602_s15  ;;  %s616_s10 = int_to_ptr.hbm [resolvable:$true] %s615_s10 }
  0x2f   : > { %1489 = dma.hbm_to_vmem [thread:$0]  (!%p2121_p5), %s601_s3, 512, %s603_s15, [#allocation14], %s1968_s12, %s1968_s12, %s1969_s16  }
  0x30   : > { %s1973_s11 = smov [#allocation16]   ;;  %s2165_s28 = sadd.s32 1, %s1961_s21  }
  0x31   : > { %s617_s27 = sshll.u32 %s1973_s11, 4  ;;  %s41_s4 = ssub.s32 %s1961_s21, %s2165_s28  ;;  %s618_s27 = int_to_ptr.vmem [resolvable:$true] %s617_s27 }
  0x32   : > { %1492 = dma.hbm_to_vmem [thread:$0]  (!%p2121_p5), %s616_s10, 16, %s618_s27, [#allocation17]  }
  0x33   : > { %s44_s22 = sadd.s32 1, %s1957_s20  ;;  %p42_p6 = scmp.eq.s32.totalorder %s41_s4, 0 }
  0x34   : > { %p51_p7 = scmp.ne.s32.totalorder %s1957_s20, %s1953_s30  ;;  %p52_p8 = scmp.eq.s32.totalorder %s1961_s21, 0 }
  0x35   : > { %p57_p9 = scmp.ne.s32.totalorder %s1953_s30, %s1949_s0  ;;  %p1506_p12 = scmp.lt.s32.totalorder %s1961_s21, 2 }
  0x36   : > { %s2176_s19 = scalar_select %p42_p6, %s1957_s20, %s44_s22  }
  0x37   : > { %p53_p10 = por %p52_p8, %p51_p7  ;;  %p2180_p11 = por %p58_p1, %p57_p9 }
  0x38   : > { %s628_s1 = sand.u32 1, %s1957_s20   ;;  %s1401_s3 = sshll.u32 %s1961_s21, 3 }
  0x39   : > { %s1400_s16 = sshll.u32 %s628_s1, 3  ;;  %s2358_s26 = sld [smem:[#allocation24_spill]] }
  0x3a   : > { %s632_s29 = scalar_lea.vmem [#allocation2], %s1400_s16  ;;  %p2190_p13 = pnand %p1506_p12, %p53_p10 }
  0x3b   : > { %s640_s2 = sshll.u32 %s632_s29, 4  ;;  %s629_s11 = scalar_lea.sflag [#allocation3], %s628_s1  ;;  %s641_s2 = int_to_ptr.vmem [resolvable:$true] %s640_s2 }
  0x3c   : > { %p1881_p2 = pneg %p2190_p13 }
  0x3f   : > { %s636_s15 = scalar_lea.hbm %s2358_s26, %s1401_s3  ;;  %s1884_s16 = scalar_lea.hbm %s2358_s26, 16 }
  0x40   : > { %s638_s10 = sshll.u32 %s636_s15, 4  ;;  %s639_s10 = int_to_ptr.hbm [resolvable:$true] %s638_s10 }
  0x41   : > { %s1877_s27 = sshra.s32 %s639_s10, 4  ;;  %s1878_s27 = int_to_ptr.hbm [resolvable:$true] %s1877_s27 }
  0x42   : > { %s1879_s4 = scalar_lea.hbm %s1878_s27, 8  ;;  %p1885_p6 = scmp.lt.s32.totalorder %s1878_s27, %s2358_s26 }
  0x43   : > { %p1880_p0 = scmp.ne.s32.totalorder %s1878_s27, %s1879_s4  ;;  %p1886_p7 = scmp.lt.s32.totalorder %s1884_s16, %s1879_s4 }
  0x45   : > { %p1882_p4 = pnand %p1881_p2, %p1880_p0  ;;  %p1887_p8 = por %p1886_p7, %p1885_p6 }
  0x47   : > { %p1883_p5 = pneg %p1882_p4 }
  0x49   : > { %p1888_p9 = pnand %p1887_p8, %p1883_p5 }
  0x4b   : > { %1891 = shalt.err (!%p1888_p9)
}
  0x4c   : > { %1496 = dma.hbm_to_vmem [thread:$0]  (!%p2190_p13), %s639_s10, 128, %s641_s2, %s629_s11  }
  0x4d   : > { %649 = sbr.rel (%p2110_p3) target bundleno = 2872 (0xb38), region = 96  ;;  %s651_s1 = sand.u32 (!%p2110_p3), 1, %s1953_s30  }
  0x4e   : > { %s1403_s8 = sshll.u32 (!%p2110_p3), %s651_s1, 3  ;;  %s652_s15 = scalar_lea.sflag (!%p2110_p3), [#allocation3], %s651_s1 }
  0x4f   : > { %s655_s29 = scalar_lea.vmem (!%p2110_p3), [#allocation2], %s1403_s8 }
  0x52   : > { %1924 = dma.done.wait (%p2180_p11), %s652_s15, 128  }
  0x53   : > { %1926 = vsyncadd (%p2180_p11), %s652_s15, 4294967168 }
  0x54   : > { %1928 = dma.done.wait (%p58_p1), [#allocation5], 528  }
  0x55   : > { %1930 = vsyncadd (%p58_p1), [#allocation5], 4294966768 }
  0x56   : > { %1932 = dma.done.wait (%p58_p1), [#allocation8], 528  }
  0x57   : > { %1934 = vsyncadd (%p58_p1), [#allocation8], 4294966768 }
  0x58   : > { %1936 = dma.done.wait (%p58_p1), [#allocation11], 2064  }
  0x59   : > { %1938 = vsyncadd (%p58_p1), [#allocation11], 4294965232 }
  0x5a   : > { %1940 = dma.done.wait (%p58_p1), [#allocation14], 528  }
  0x5b   : > { %1942 = vsyncadd (%p58_p1), [#allocation14], 4294966768 }
  0x5c   : > { %1944 = dma.done.wait (%p58_p1), [#allocation17], 16  }
  0x5d   : > { %1946 = vsyncadd (%p58_p1), [#allocation17], 4294967280  ;;  %vm760_vm0 = vcmask 261120   ;;  %v2231_v0 = vld [vmem:[%s655_s29] sm:$0xff]  ;;  %v1974_v2 = vmov 32.0   ;;  %s2360_s2 = sld [smem:[#allocation25_spill]] }
  0x5e   : > { %v761_v1 = vsel %vm760_vm0, %v2231_v0, 0.0  ;;  %1579 = vrcp.f32 %v1974_v2  ;;  %v1566_v31 = vld [vmem:[%s2322_s5] ss:$0 sm:$0xff]  ;;  %v1568_v37 = vld [vmem:[#allocation4] ss:$0 sm:$0xff]  ;;  %s1975_s1 = smov 80  }
  0x5f   : > { %762 = vadd.xlane.f32.xlu0 %v761_v1  ;;  %v1567_v33 = vld [vmem:[%s2323_s6] ss:$0 sm:$0xff]  ;;  %s1976_s8 = smov 64   ;;  %s1977_s15 = smov 96   ;;  %vm841_vm4 = vcmask 130048   ;;  %vm867_vm5 = vcmask 64512  }
  0x60   : > { %s1978_s29 = smov 48   ;;  %s1979_s25 = smov 112   ;;  %v835_v55 = vld [vmem:[#allocation6 + $0x8] sm:$0xff]  ;;  %v834_v57 = vld [vmem:[#allocation6] sm:$0xff] }
  0x61   : > { %s2361_s27 = sld [smem:[#allocation29_spill]]  ;;  %p755_p1 = scmp.lt.s32.totalorder %s2105_s24, 1 }
  0x62   : > { %s2362_s22 = sld [smem:[#allocation31_spill]] }
  0x63   : > { %v806_v14 = vld [vmem:[%s2360_s2 + $0x18] sm:$0xff]  ;;  %v805_v15 = vld [vmem:[%s2360_s2 + $0x10] sm:$0xff]  ;;  %v804_v16 = vld [vmem:[%s2360_s2 + $0x8] sm:$0xff]  ;;  %s2363_s23 = sld [smem:[#allocation32_spill]]  ;;  %s2372_s24 = smov (!%p755_p1, %s2105_s24), 1 }
  0x64   : > { %v1580_v3 = vpop.eup %1579  ;;  %826 = vmatpush.msra.mxu0 %v806_v14  ;;  %v803_v17 = vld [vmem:[%s2360_s2] sm:$0xff]  ;;  %v1569_v14 = vld [vmem:[#allocation7] ss:$0 sm:$0xff]  ;;  %s2365_s12 = sld [smem:[#allocation34_spill]]  ;;  %s1413_s10 = sshll.u32 %s2372_s24, 3 }
  0x65   : > { %v765_v4 = vmul.f32 32.0, %v1580_v3  ;;  %vm769_vm1 = vweird.f32 %v1580_v3 }
  0x66   : > { %827 = vmatpush.msra.mxu0 %v805_v15 }
  0x67   : > { %v766_v5 = vsub.f32 1.0, %v765_v4  ;;  %v837_v4 = vld [vmem:[#allocation6 + $0x18] sm:$0xff] }
  0x68   : > { %828 = vmatpush.msra.mxu0 %v804_v16 }
  0x69   : > { %v767_v6 = vmul.f32 %v1580_v3, %v766_v5  ;;  %v836_v5 = vld [vmem:[#allocation6 + $0x10] sm:$0xff] }
  0x6a   : > { %829 = vmatpush.msra.mxu0 %v803_v17 }
  0x6b   : > { %v768_v7 = vadd.f32 %v1580_v3, %v767_v6 }
  0x6d   : > { %v2235_v8 = vsel %vm769_vm1, %v1580_v3, %v768_v7 }
  0xd2   : > { %v763_v9 = vpop.xlane.xlu0 %762 }
  0xd3   : > { %v771_v10 = vmul.f32 %v2235_v8, %v763_v9 }
  0xd5   : > { %v772_v11 = vsub.f32 %v2231_v0, %v771_v10 }
  0xd7   : > { %v773_v12 = vmul.f32 %v772_v11, %v772_v11  ;;  %v796_v32 = vmul.f32 %v1566_v31, %v772_v11 }
  0xd9   : > { %v774_v13 = vsel %vm760_vm0, %v773_v12, 0.0 }
  0xda   : > { %775 = vadd.xlane.f32.xlu0 %v774_v13 }
 0x14d   : > { %v776_v18 = vpop.xlane.xlu0 %775 }
 0x14e   : > { %v777_v19 = vmul.f32 0.032258064, %v776_v18 }
 0x150   : > { %1581 = vrsqrt.f32 %v777_v19  ;;  %vm785_vm2 = vcmp.eq.f32.partialorder %v777_v19, inf  ;;  %v788_v27 = vand.u32 2147483648, %v777_v19  ;;  %vm787_vm3 = vcmp.eq.f32.partialorder %v777_v19, 0.0 }
 0x156   : > { %v1582_v20 = vpop.eup %1581 }
 0x157   : > { %v779_v21 = vmul.f32 %v1582_v20, %v777_v19 }
 0x159   : > { %v780_v22 = vmul.f32 %v1582_v20, %v779_v21 }
 0x15b   : > { %v781_v23 = vmul.f32 0.5, %v780_v22 }
 0x15d   : > { %v782_v24 = vsub.f32 1.5, %v781_v23  ;;  %v1061_v23 = vld [vmem:[#allocation9 + $0x18] sm:$0xff] }
 0x15f   : > { %v783_v25 = vmul.f32 %v1582_v20, %v782_v24  ;;  %v1060_v24 = vld [vmem:[#allocation9 + $0x10] sm:$0xff] }
 0x161   : > { %v784_v26 = vmul.f32 %v783_v25, %v777_v19  ;;  %v1059_v25 = vld [vmem:[#allocation9 + $0x8] sm:$0xff] }
 0x163   : > { %v786_v28 = vsel %vm785_vm2, %v777_v19, %v784_v26  ;;  %v1058_v26 = vld [vmem:[#allocation9] sm:$0xff] }
 0x164   : > { %v789_v29 = vsel %vm787_vm3, %v788_v27, %v786_v28 }
 0x165   : > { %v790_v30 = vadd.f32 1e-06, %v789_v29 }
 0x167   : > { %1583 = vrcp.f32 %v790_v30 }
 0x16d   : > { %v1584_v34 = vpop.eup %1583 }
 0x16e   : > { %v797_v35 = vmul.f32 %v1584_v34, %v796_v32 }
 0x170   : > { %v802_v36 = vadd.f32 %v1567_v33, %v797_v35 }
 0x172   : > { %1414 = vmatmul.msk.f32.vlgmr.msra.gmra.mxu0 %vm760_vm0, %v802_v36 }
 0x1ef   : > { %v831_v38 = vpop.f32.mrf.mxu0 }
 0x1f0   : > { %v832_v39 = vadd.f32 %v1568_v37, %v831_v38 }
 0x1f2   : > { %907 = vrot.lane.b32.xlu0 %v832_v39, %s1975_s1  ;;  %879 = vrot.lane.b32.xlu2 %v832_v39, %s1976_s8 }
 0x1f3   : > { %839 = vrot.lane.b32.xlu1 %v832_v39, %s1977_s15  ;;  %s2364_s15 = sld [smem:[#allocation33_spill]] }
 0x24c   : > { %v880_v40 = vpop.permute.xlu2 %879 }
 0x24d   : > { %900 = vmatpush.msra.mxu3 %v880_v40 }
 0x264   : > { %v908_v41 = vpop.permute.xlu0 %907 }
 0x265   : > { %v840_v42 = vpop.permute.xlu1 %839  ;;  %1418 = vmatpush.xpose.msk.msrb.mxu3 %vm841_vm4, %v908_v41  ;;  %v1571_v41 = vld [vmem:[%s2361_s27] ss:$0 sm:$0xff]  ;;  %s2366_s27 = sld [smem:[#allocation35_spill]] }
 0x266   : > { %1415 = vmatpush.xpose.msk.msra.mxu1 %vm841_vm4, %v840_v42 }
 0x269   : > { %1416 = vmatmul.msk.f32.vlgmr.msra.gmra.mxu1 %vm841_vm4, %v832_v39 }
 0x26a   : > { %988 = vmatpush.msrb.mxu1 %v837_v4  ;;  %v1136_v4 = vld [vmem:[#allocation12 + $0x38] sm:$0xff] }
 0x26b   : > { %s758_s4 = scalar_lea.vmem %s2366_s27, %s1413_s10 }
 0x26c   : > { %989 = vmatpush.msrb.mxu1 %v836_v5  ;;  %v1135_v5 = vld [vmem:[#allocation12 + $0x30] sm:$0xff] }
 0x2e6   : > { %v863_v43 = vpop.f32.mrf.mxu1 }
 0x2e7   : > { %v866_v44 = vmul.f32 0.25, %v863_v43 }
 0x2e9   : > { %v868_v45 = vsel %vm867_vm5, %v866_v44, -inf }
 0x2ea   : > { %869 = vmax.xlane.f32.xlu1 %v868_v45  ;;  %v1572_v45 = vld [vmem:[#allocation10] ss:$0 sm:$0xff] }
 0x303   : > { %945 = vrot.lane.b32.xlu1 %v832_v39, %s1978_s29 }
 0x35d   : > { %v870_v46 = vpop.xlane.xlu1 %869 }
 0x35e   : > { %v871_v47 = vsub.f32 %v866_v44, %v870_v46 }
 0x360   : > { %v872_v48 = vmul.f32 1.442695, %v871_v47 }
 0x362   : > { %1585 = vpow2.f32 %v872_v48  ;;  %v1980_v48 = vmov 128.0  }
 0x368   : > { %v1586_v49 = vpop.eup %1585 }
 0x369   : > { %v874_v50 = vsel %vm867_vm5, %v1586_v49, 0.0 }
 0x36a   : > { %875 = vadd.xlane.f32.xlu2 %v874_v50 }
 0x375   : > { %v946_v51 = vpop.permute.xlu1 %945 }
 0x376   : > { %966 = vmatpush.msrb.mxu0 %v946_v51 }
 0x378   : > { %1081 = vmatpush.msra.mxu0 %v1061_v23 }
 0x37a   : > { %1082 = vmatpush.msra.mxu0 %v1060_v24 }
 0x37c   : > { %1083 = vmatpush.msra.mxu0 %v1059_v25 }
 0x37e   : > { %1084 = vmatpush.msra.mxu0 %v1058_v26  ;;  %v1573_v26 = vld [vmem:[%s2362_s22] ss:$0 sm:$0xff] }
 0x382   : > { %905 = vrot.lane.b32.xlu2 %v832_v39, %s1979_s25  ;;  %v1570_v39 = vld [vmem:[%s2324_s7] ss:$0 sm:$0xff] }
 0x3dd   : > { %v876_v52 = vpop.xlane.xlu2 %875 }
 0x3de   : > { %1587 = vrcp.f32 %v876_v52 }
 0x3e4   : > { %v1588_v53 = vpop.eup %1587 }
 0x3e5   : > { %v878_v54 = vmul.f32 %v1588_v53, %v1586_v49  ;;  %v906_v56 = vpop.permute.xlu2 %905 }
 0x3e7   : > { %1417 = vmatmul.msk.f32.vlgmr.msra.gmra.mxu3 %vm867_vm5, %v878_v54 }
 0x3e8   : > { %1011 = vmatpush.msra.mxu3 %v835_v55 }
 0x3ea   : > { %1012 = vmatpush.msra.mxu3 %v834_v57 }
 0x3ef   : > { %1419 = vmatmul.msk.f32.vlgmr.msrb.gmra.mxu3 %vm841_vm4, %v906_v56 }
 0x46a   : > { %v902_v58 = vpop.f32.mrf.mxu3 }
 0x46b   : > { %1422 = vmatmul.msk.f32.vlgmr.msra.gmra.mxu3 %vm841_vm4, %v902_v58 }
 0x472   : > { %v930_v59 = vpop.f32.mrf.mxu3 }
 0x473   : > { %v933_v60 = vmul.f32 0.25, %v930_v59  ;;  %v1144_v59 = vld [vmem:[#allocation12 + $0x78] sm:$0xff] }
 0x474   : > { %1149 = vmatpush.msra.mxu2 %v1144_v59 }
 0x475   : > { %v934_v61 = vsel %vm867_vm5, %v933_v60, -inf }
 0x476   : > { %935 = vmax.xlane.f32.xlu0 %v934_v61  ;;  %v1142_v61 = vld [vmem:[#allocation12 + $0x68] sm:$0xff] }
 0x4e9   : > { %v936_v62 = vpop.xlane.xlu0 %935 }
 0x4ea   : > { %v937_v63 = vsub.f32 %v933_v60, %v936_v62  ;;  %v1143_v60 = vld [vmem:[#allocation12 + $0x70] sm:$0xff]  ;;  %v1141_v62 = vld [vmem:[#allocation12 + $0x60] sm:$0xff] }
 0x4eb   : > { %1150 = vmatpush.msra.mxu2 %v1143_v60 }
 0x4ec   : > { %v938_v1 = vmul.f32 1.442695, %v937_v63  ;;  %v1140_v63 = vld [vmem:[#allocation12 + $0x58] sm:$0xff] }
 0x4ed   : > { %1151 = vmatpush.msra.mxu2 %v1142_v61 }
 0x4ee   : > { %1589 = vpow2.f32 %v938_v1  ;;  %v1014_v11 = vpop.f32.mrf.mxu3  ;;  %v1139_v1 = vld [vmem:[#allocation12 + $0x50] sm:$0xff] }
 0x4ef   : > { %1152 = vmatpush.msra.mxu2 %v1141_v62  ;;  %v1578_v62 = vld [vmem:[#allocation16] ss:$0 sm:$0xff] }
 0x4f1   : > { %1153 = vmatpush.msra.mxu2 %v1140_v63 }
 0x4f3   : > { %1154 = vmatpush.msra.mxu2 %v1139_v1 }
 0x4f4   : > { %v1590_v2 = vpop.eup %1589 }
 0x4f5   : > { %v940_v3 = vsel %vm867_vm5, %v1590_v2, 0.0 }
 0x4f6   : > { %941 = vadd.xlane.f32.xlu2 %v940_v3  ;;  %v1137_v3 = vld [vmem:[#allocation12 + $0x40] sm:$0xff] }
 0x569   : > { %v942_v6 = vpop.xlane.xlu2 %941 }
 0x56a   : > { %1591 = vrcp.f32 %v942_v6  ;;  %v1134_v6 = vld [vmem:[#allocation12 + $0x28] sm:$0xff] }
 0x570   : > { %v1592_v7 = vpop.eup %1591 }
 0x571   : > { %v944_v9 = vmul.f32 %v1592_v7, %v1590_v2  ;;  %v1138_v2 = vld [vmem:[#allocation12 + $0x48] sm:$0xff]  ;;  %v1133_v7 = vld [vmem:[#allocation12 + $0x20] sm:$0xff] }
 0x572   : > { %1155 = vmatpush.msra.mxu2 %v1138_v2 }
 0x573   : > { %1420 = vmatmul.msk.f32.vlgmr.msrb.gmra.mxu0 %vm867_vm5, %v944_v9  ;;  %v1132_v9 = vld [vmem:[#allocation12 + $0x18] sm:$0xff] }
 0x574   : > { %1156 = vmatpush.msra.mxu2 %v1137_v3 }
 0x576   : > { %1157 = vmatpush.msra.mxu2 %v1136_v4 }
 0x578   : > { %1158 = vmatpush.msra.mxu2 %v1135_v5 }
 0x57a   : > { %1159 = vmatpush.msra.mxu2 %v1134_v6 }
 0x57c   : > { %1160 = vmatpush.msra.mxu2 %v1133_v7 }
 0x57e   : > { %1161 = vmatpush.msra.mxu2 %v1132_v9 }
 0x5f0   : > { %v968_v10 = vpop.f32.mrf.mxu0 }
 0x5f1   : > { %1421 = vmatmul.msk.f32.vlgmr.msrb.gmra.mxu1 %vm841_vm4, %v968_v10  ;;  %v1131_v10 = vld [vmem:[#allocation12 + $0x10] sm:$0xff] }
 0x5f2   : > { %1162 = vmatpush.msra.mxu2 %v1131_v10 }
 0x66e   : > { %v991_v12 = vpop.f32.mrf.mxu1 }
 0x66f   : > { %v1015_v13 = vadd.f32 %v1014_v11, %v991_v12  ;;  %v1130_v11 = vld [vmem:[#allocation12 + $0x8] sm:$0xff]  ;;  %v1129_v12 = vld [vmem:[#allocation12] sm:$0xff] }
 0x670   : > { %1163 = vmatpush.msra.mxu2 %v1130_v11 }
 0x671   : > { %v1017_v15 = vadd.f32 %v1015_v13, %v2231_v0 }
 0x672   : > { %1164 = vmatpush.msra.mxu2 %v1129_v12 }
 0x673   : > { %v1022_v16 = vadd.f32 %v1569_v14, %v1017_v15 }
 0x675   : > { %v1023_v17 = vsel %vm760_vm0, %v1022_v16, 0.0 }
 0x676   : > { %1024 = vadd.xlane.f32.xlu1 %v1023_v17 }
 0x6e9   : > { %v1025_v18 = vpop.xlane.xlu1 %1024 }
 0x6ea   : > { %v1026_v19 = vmul.f32 %v1025_v18, %v2235_v8 }
 0x6ec   : > { %v1027_v20 = vsub.f32 %v1022_v16, %v1026_v19 }
 0x6ee   : > { %v1028_v21 = vmul.f32 %v1027_v20, %v1027_v20  ;;  %v1051_v40 = vmul.f32 %v1570_v39, %v1027_v20 }
 0x6f0   : > { %v1029_v22 = vsel %vm760_vm0, %v1028_v21, 0.0 }
 0x6f1   : > { %1030 = vadd.xlane.f32.xlu0 %v1029_v22 }
 0x764   : > { %v1031_v0 = vpop.xlane.xlu0 %1030 }
 0x765   : > { %v1032_v27 = vmul.f32 0.032258064, %v1031_v0 }
 0x767   : > { %1593 = vrsqrt.f32 %v1032_v27  ;;  %vm1040_vm6 = vcmp.eq.f32.partialorder %v1032_v27, inf  ;;  %v1043_v35 = vand.u32 2147483648, %v1032_v27  ;;  %vm1042_vm7 = vcmp.eq.f32.partialorder %v1032_v27, 0.0 }
 0x76d   : > { %v1594_v28 = vpop.eup %1593 }
 0x76e   : > { %v1034_v29 = vmul.f32 %v1594_v28, %v1032_v27 }
 0x770   : > { %v1035_v30 = vmul.f32 %v1594_v28, %v1034_v29 }
 0x772   : > { %v1036_v31 = vmul.f32 0.5, %v1035_v30 }
 0x774   : > { %v1037_v32 = vsub.f32 1.5, %v1036_v31  ;;  %v1575_v31 = vld [vmem:[#allocation13] ss:$0 sm:$0xff] }
 0x776   : > { %v1038_v33 = vmul.f32 %v1594_v28, %v1037_v32 }
 0x778   : > { %v1039_v34 = vmul.f32 %v1038_v33, %v1032_v27 }
 0x77a   : > { %v1041_v36 = vsel %vm1040_vm6, %v1032_v27, %v1039_v34  ;;  %v1574_v27 = vld [vmem:[%s2363_s23] ss:$0 sm:$0xff] }
 0x77b   : > { %v1044_v37 = vsel %vm1042_vm7, %v1043_v35, %v1041_v36 }
 0x77c   : > { %v1045_v38 = vadd.f32 1e-06, %v1044_v37 }
 0x77e   : > { %1595 = vrcp.f32 %v1045_v38 }
 0x77f   : > { %1597 = vrcp.f32 %v1980_v48 }
 0x784   : > { %v1596_v42 = vpop.eup %1595 }
 0x785   : > { %v1052_v43 = vmul.f32 %v1596_v42, %v1051_v40  ;;  %v1598_v49 = vpop.eup %1597  ;;  %v1207_v40 = vld [vmem:[#allocation15 + $0x18] sm:$0xff]  ;;  %v1205_v42 = vld [vmem:[#allocation15 + $0x8] sm:$0xff] }
 0x786   : > { %v1092_v50 = vmul.f32 128.0, %v1598_v49  ;;  %vm1096_vm8 = vweird.f32 %v1598_v49  ;;  %1227 = vmatpush.msra.mxu1 %v1207_v40 }
 0x787   : > { %v1057_v44 = vadd.f32 %v1571_v41, %v1052_v43  ;;  %v1206_v41 = vld [vmem:[#allocation15 + $0x10] sm:$0xff]  ;;  %v1204_v43 = vld [vmem:[#allocation15] sm:$0xff] }
 0x788   : > { %v1093_v51 = vsub.f32 1.0, %v1092_v50  ;;  %1228 = vmatpush.msra.mxu1 %v1206_v41 }
 0x789   : > { %1423 = vmatmul.msk.f32.vlgmr.msra.gmra.mxu0 %vm760_vm0, %v1057_v44 }
 0x78a   : > { %v1094_v52 = vmul.f32 %v1598_v49, %v1093_v51  ;;  %1229 = vmatpush.msra.mxu1 %v1205_v42 }
 0x78c   : > { %v1095_v53 = vadd.f32 %v1598_v49, %v1094_v52  ;;  %1230 = vmatpush.msra.mxu1 %v1204_v43 }
 0x78e   : > { %v1097_v54 = vsel %vm1096_vm8, %v1598_v49, %v1095_v53 }
 0x806   : > { %v1086_v46 = vpop.f32.mrf.mxu0 }
 0x807   : > { %v1087_v47 = vadd.f32 %v1572_v45, %v1086_v46 }
 0x809   : > { %1089 = vadd.xlane.f32.xlu2 %v1087_v47 }
 0x87c   : > { %v1090_v55 = vpop.xlane.xlu2 %1089 }
 0x87d   : > { %v1098_v56 = vmul.f32 %v1097_v54, %v1090_v55 }
 0x87f   : > { %v1099_v57 = vsub.f32 %v1087_v47, %v1098_v56  ;;  %v1576_v56 = vld [vmem:[%s2364_s15] ss:$0 sm:$0xff] }
 0x881   : > { %v1100_v58 = vmul.f32 %v1099_v57, %v1099_v57  ;;  %v1122_v0 = vmul.f32 %v1573_v26, %v1099_v57 }
 0x883   : > { %1101 = vadd.xlane.f32.xlu0 %v1100_v58  ;;  %v1577_v58 = vld [vmem:[%s2365_s12] ss:$0 sm:$0xff] }
 0x8f6   : > { %v1102_v13 = vpop.xlane.xlu0 %1101 }
 0x8f7   : > { %v1103_v14 = vmul.f32 0.007874016, %v1102_v13 }
 0x8f9   : > { %1599 = vrsqrt.f32 %v1103_v14  ;;  %vm1111_vm9 = vcmp.eq.f32.partialorder %v1103_v14, inf  ;;  %v1114_v22 = vand.u32 2147483648, %v1103_v14  ;;  %vm1113_vm10 = vcmp.eq.f32.partialorder %v1103_v14, 0.0 }
 0x8ff   : > { %v1600_v15 = vpop.eup %1599 }
 0x900   : > { %v1105_v16 = vmul.f32 %v1600_v15, %v1103_v14 }
 0x902   : > { %v1106_v17 = vmul.f32 %v1600_v15, %v1105_v16 }
 0x904   : > { %v1107_v18 = vmul.f32 0.5, %v1106_v17 }
 0x906   : > { %v1108_v19 = vsub.f32 1.5, %v1107_v18 }
 0x908   : > { %v1109_v20 = vmul.f32 %v1600_v15, %v1108_v19 }
 0x90a   : > { %v1110_v21 = vmul.f32 %v1109_v20, %v1103_v14 }
 0x90c   : > { %v1112_v23 = vsel %vm1111_vm9, %v1103_v14, %v1110_v21 }
 0x90d   : > { %v1115_v24 = vsel %vm1113_vm10, %v1114_v22, %v1112_v23 }
 0x90e   : > { %v1116_v25 = vadd.f32 1e-06, %v1115_v24 }
 0x910   : > { %1601 = vrcp.f32 %v1116_v25 }
 0x916   : > { %v1602_v28 = vpop.eup %1601 }
 0x917   : > { %v1123_v29 = vmul.f32 %v1602_v28, %v1122_v0 }
 0x919   : > { %v1128_v30 = vadd.f32 %v1574_v27, %v1123_v29 }
 0x91b   : > { %1165 = vmatmul.f32.vlgmr.msra.gmra.mxu2 %v1128_v30 }
 0x99e   : > { %v1166_v32 = vpop.f32.mrf.mxu2 }
 0x99f   : > { %v1167_v33 = vadd.f32 %v1575_v31, %v1166_v32 }
 0x9a1   : > { %v1169_v34 = vsel %vm760_vm0, %v1167_v33, 0.0 }
 0x9a2   : > { %1170 = vadd.xlane.f32.xlu2 %v1169_v34 }
 0xa15   : > { %v1171_v35 = vpop.xlane.xlu2 %1170 }
 0xa16   : > { %v1172_v36 = vmul.f32 %v1171_v35, %v2235_v8 }
 0xa18   : > { %v1173_v37 = vsub.f32 %v1167_v33, %v1172_v36 }
 0xa1a   : > { %v1174_v38 = vmul.f32 %v1173_v37, %v1173_v37  ;;  %v1197_v57 = vmul.f32 %v1576_v56, %v1173_v37 }
 0xa1c   : > { %v1175_v39 = vsel %vm760_vm0, %v1174_v38, 0.0 }
 0xa1d   : > { %1176 = vadd.xlane.f32.xlu0 %v1175_v39 }
 0xa90   : > { %v1177_v44 = vpop.xlane.xlu0 %1176 }
 0xa91   : > { %v1178_v45 = vmul.f32 0.032258064, %v1177_v44 }
 0xa93   : > { %1603 = vrsqrt.f32 %v1178_v45  ;;  %vm1186_vm11 = vcmp.eq.f32.partialorder %v1178_v45, inf  ;;  %v1189_v52 = vand.u32 2147483648, %v1178_v45  ;;  %vm1188_vm12 = vcmp.eq.f32.partialorder %v1178_v45, 0.0 }
 0xa99   : > { %v1604_v46 = vpop.eup %1603 }
 0xa9a   : > { %v1180_v47 = vmul.f32 %v1604_v46, %v1178_v45 }
 0xa9c   : > { %v1181_v48 = vmul.f32 %v1604_v46, %v1180_v47 }
 0xa9e   : > { %v1182_v8 = vmul.f32 0.5, %v1181_v48 }
 0xaa0   : > { %v1183_v49 = vsub.f32 1.5, %v1182_v8 }
 0xaa2   : > { %v1184_v50 = vmul.f32 %v1604_v46, %v1183_v49 }
 0xaa4   : > { %v1185_v51 = vmul.f32 %v1184_v50, %v1178_v45 }
 0xaa6   : > { %v1187_v53 = vsel %vm1186_vm11, %v1178_v45, %v1185_v51 }
 0xaa7   : > { %v1190_v54 = vsel %vm1188_vm12, %v1189_v52, %v1187_v53 }
 0xaa8   : > { %v1191_v55 = vadd.f32 1e-06, %v1190_v54 }
 0xaaa   : > { %1605 = vrcp.f32 %v1191_v55 }
 0xab0   : > { %v1606_v59 = vpop.eup %1605 }
 0xab1   : > { %v1198_v60 = vmul.f32 %v1606_v59, %v1197_v57 }
 0xab3   : > { %v1203_v61 = vadd.f32 %v1577_v58, %v1198_v60 }
 0xab5   : > { %1424 = vmatmul.msk.f32.vlgmr.msra.gmra.mxu1 %vm760_vm0, %v1203_v61 }
 0xb32   : > { %v1232_v63 = vpop.f32.mrf.mxu1 }
 0xb33   : > { %v1233_v1 = vadd.f32 %v1578_v62, %v1232_v63 }
 0xb35   : > { %v1235_v2 = vmax.f32 %v1233_v1, 0.0 }
 0xb37   : > { %1236 = vst.msk [vmem:[%s758_s4] sm:$0xff] %vm841_vm4, %v1235_v2 }
 0xb38 PF: > { %p34_p3 = scmp.ge.s32.totalorder %s2165_s28, 4   ;;  %s2367_s0 = smov %s1953_s30 }
 0xb39   : > { %s2368_s30 = smov %s1957_s20  ;;  %s2369_s20 = smov %s2176_s19 }
 0xb3a   : > { %s2370_s21 = smov %s2165_s28  ;;  %36 = sbr.rel (!%p34_p3) target bundleno = 21 (0x15), region = 172 }
 0xb3f   :  { %1256 = vsyncpa [#allocation3], 1 }
 0xb40   :  { %1258 = vsyncpa [#allocation3 + $0x1], 1 }
 0xb41   :  { %1259 = vsyncpa [#allocation5], 1 }
 0xb42   :  { %1260 = vsyncpa [#allocation8], 1 }
 0xb43   :  { %1261 = vsyncpa [#allocation11], 1 }
 0xb44   :  { %1262 = vsyncpa [#allocation14], 1 }
 0xb45   :  { %1263 = vsyncpa [#allocation17], 1 }

// kernel: _lambda_.5
= control target key start
LH: loop header
LB: loop body
LE: loop exit
PB: predicated region body
PF: predicated region fallthrough
CT: control target
= control target key end

     0   :  { %s2067_s0 = inlined_call_operand.vmem [shape: f32[2,8,8], index: 0, kind: input, shape index: {}]   ;;  %s2068_s1 = inlined_call_operand.vmem [shape: f32[8,24], index: 1, kind: input, shape index: {}]   ;;  %s2069_s2 = inlined_call_operand.vmem [shape: f32[1,24], index: 2, kind: input, shape index: {}]   ;;  %s2070_s3 = inlined_call_operand.vmem [shape: f32[8,8], index: 3, kind: input, shape index: {}]   ;;  %s2071_s4 = inlined_call_operand.vmem [shape: f32[1,8], index: 4, kind: input, shape index: {}]   ;;  %s2072_s5 = inlined_call_operand.vmem [shape: f32[1,8], index: 5, kind: input, shape index: {}, may-alias: {5,7,15}]   ;;  %s2073_s6 = inlined_call_operand.vmem [shape: f32[1,8], index: 6, kind: input, shape index: {}, may-alias: {6,8,16}]   ;;  %s2074_s7 = inlined_call_operand.vmem [shape: f32[1,8], index: 7, kind: input, shape index: {}, may-alias: {5,7,15}]   ;;  %s2075_s8 = inlined_call_operand.vmem [shape: f32[1,8], index: 8, kind: input, shape index: {}, may-alias: {6,8,16}]   ;;  %s2076_s9 = inlined_call_operand.hbm [shape: f32[8,32], index: 9, kind: input, shape index: {}]   ;;  %s2077_s10 = inlined_call_operand.hbm [shape: f32[1,32], index: 10, kind: input, shape index: {}]   ;;  %s2078_s11 = inlined_call_operand.vmem [shape: f32[1,32], index: 11, kind: input, shape index: {}]   ;;  %s2079_s12 = inlined_call_operand.vmem [shape: f32[1,32], index: 12, kind: input, shape index: {}]   ;;  %s2080_s13 = inlined_call_operand.hbm [shape: f32[32,8], index: 13, kind: input, shape index: {}]   ;;  %s2081_s14 = inlined_call_operand.hbm [shape: f32[1,8], index: 14, kind: input, shape index: {}]   ;;  %s2082_s15 = inlined_call_operand.vmem [shape: f32[1,8], index: 15, kind: input, shape index: {}, may-alias: {5,7,15}]   ;;  %s2083_s16 = inlined_call_operand.vmem [shape: f32[1,8], index: 16, kind: input, shape index: {}, may-alias: {6,8,16}]   ;;  %s2084_s17 = inlined_call_operand.hbm [shape: f32[8,8], index: 17, kind: input, shape index: {}]   ;;  %s2085_s18 = inlined_call_operand.hbm [shape: f32[1,8], index: 18, kind: input, shape index: {}]   ;;  %s2086_s19 = inlined_call_operand.hbm [shape: f32[2,8,8], index: 19, kind: output, shape index: {}]  }
   0x1   :  { %2095 = sst [smem:[#allocation26_spill]] %s2067_s0 }
   0x2   :  { %2096 = sst [smem:[#allocation27_spill]] %s2068_s1 }
   0x3   :  { %2097 = sst [smem:[#allocation28_spill]] %s2069_s2 }
   0x4   :  { %2098 = sst [smem:[#allocation29_spill]] %s2070_s3 }
   0x5   :  { %2099 = sst [smem:[#allocation30_spill]] %s2076_s9 }
   0x6   :  { %2100 = sst [smem:[#allocation31_spill]] %s2077_s10 }
   0x7   :  { %2101 = sst [smem:[#allocation32_spill]] %s2081_s14 }
   0x8   :  { %24 = vsyncpa [#allocation3], 0 }
   0x9   :  { %25 = vsyncpa [#allocation6], 0 }
   0xa   :  { %26 = vsyncpa [#allocation9], 0 }
   0xb   :  { %27 = vsyncpa [#allocation12], 0 }
   0xc   :  { %28 = vsyncpa [#allocation4], 0 }
   0xd   :  { %30 = vsyncpa [#allocation4 + $0x1], 0  ;;  %s1850_s0 = smov 0   ;;  %s1852_s30 = smov 0  }
   0xe   :  { %s1854_s20 = smov 0   ;;  %s1856_s21 = smov 0  }
   0xf LB: > { %2102 = sst [smem:[#allocation19_spill]] %s1721_s0  ;;  %s1871_s1 = sadd.s32 4294967295, %s1733_s21   ;;  %s1733_s21 = sphi %s1856_s21, %s2124_s21   ;;  %s1729_s20 = sphi %s1854_s20, %s2126_s20   ;;  %s1725_s30 = sphi %s1852_s30, %s2128_s30   ;;  %s1721_s0 = sphi %s1850_s0, %s2127_s0  }
  0x10   : > { %2103 = sst [smem:[#allocation20_spill]] %s1729_s20  ;;  %s1289_s22 = sadd.s32 4294967294, %s1733_s21  }
  0x11   : > { %2104 = sst [smem:[#allocation21_spill]] %s1733_s21  ;;  %s1875_s2 = sadd.s32 1, %s1733_s21  }
  0x12   : > { %2105 = sst [smem:[#allocation22_spill]] %s1875_s2  ;;  %s447_s23 = sadd.s32 1, %s1729_s20 }
  0x13   : > { %s444_s24 = ssub.s32 %s1733_s21, %s1875_s2  ;;  %p457_p0 = scmp.ne.s32.totalorder %s1729_s20, %s1725_s30 }
  0x14   : > { %p445_p1 = scmp.eq.s32.totalorder %s444_s24, 0  ;;  %p458_p2 = scmp.eq.s32.totalorder %s1871_s1, 1 }
  0x15   : > { %p463_p3 = scmp.ne.s32.totalorder %s1725_s30, %s1721_s0  ;;  %p464_p4 = scmp.eq.s32.totalorder %s1289_s22, 1 }
  0x16   : > { %s1886_s25 = scalar_select %p445_p1, %s1729_s20, %s447_s23  }
  0x17   : > { %p1888_p5 = por %p458_p2, %p457_p0  ;;  %p1892_p6 = por %p464_p4, %p463_p3 }
  0x18   : > { %2106 = sst [smem:[#allocation23_spill]] %s1886_s25  ;;  %p1290_p7 = scmp.ge.s32.totalorder %s1733_s21, 1 }
  0x19   : > { %s2107_s3 = scalar_select %p1888_p5, 1, 0 }
  0x1a   : > { %s2109_s26 = scalar_select %p1892_p6, 1, 0 }
  0x1b   : > { %2108 = sst [smem:[#allocation24_spill]] %s2107_s3  ;;  %p471_p8 = scmp.lt.s32.totalorder %s1733_s21, 3 }
  0x1c   : > { %2110 = sst [smem:[#allocation25_spill]] %s2109_s26  ;;  %p1374_p9 = scmp.eq.s32.totalorder %s1871_s1, 0 }
  0x1d   : > { %p1899_p10 = pnand %p1290_p7, %p471_p8  ;;  %s2112_s10 = sld [smem:[#allocation31_spill]] }
  0x1e   : > { %s1735_s23 = smov [#allocation5]   ;;  %s2113_s14 = sld [smem:[#allocation32_spill]] }
  0x1f   : > { %p1351_p11 = pneg %p1899_p10  ;;  %s521_s24 = sshll.u32 %s1735_s23, 4  ;;  %s522_s24 = int_to_ptr.vmem [resolvable:$true] %s521_s24 }
  0x20   : > { %s2115_s9 = sld [smem:[#allocation30_spill]]  ;;  %s1736_s0 = smov [#allocation8]  }
  0x21   : > { %p1913_p12 = pnand %p1374_p9, %p1351_p11  ;;  %s553_s23 = sshll.u32 %s1736_s0, 4  ;;  %s554_s23 = int_to_ptr.vmem [resolvable:$true] %s553_s23 }
  0x22   : > { %s1737_s21 = smov [#allocation2]   ;;  %s1738_s28 = smov [#allocation7]  }
  0x23   : > { %s519_s22 = sshll.u32 %s2112_s10, 4  ;;  %s509_s3 = sshll.u32 %s1737_s21, 4  ;;  %s520_s22 = int_to_ptr.hbm [resolvable:$true] %s519_s22  ;;  %s510_s3 = int_to_ptr.vmem [resolvable:$true] %s509_s3 }
  0x24   : > { %s551_s2 = sshll.u32 %s2113_s14, 4  ;;  %s536_s14 = sshll.u32 %s2080_s13, 4  ;;  %s552_s2 = int_to_ptr.hbm [resolvable:$true] %s551_s2  ;;  %s537_s14 = int_to_ptr.hbm [resolvable:$true] %s536_s14 }
  0x25   : > { %1357 = dma.hbm_to_vmem [thread:$0]  (!%p1913_p12), %s520_s22, 16, %s522_s24, [#allocation6]  }
  0x26   : > { %s507_s10 = sshll.u32 %s2115_s9, 4  ;;  %s538_s0 = sshll.u32 %s1738_s28, 4  ;;  %s508_s10 = int_to_ptr.hbm [resolvable:$true] %s507_s10  ;;  %s539_s0 = int_to_ptr.vmem [resolvable:$true] %s538_s0 }
  0x27   : > { %1363 = dma.hbm_to_vmem [thread:$0]  (!%p1913_p12), %s552_s2, 16, %s554_s23, [#allocation9]  }
  0x28   : > { %1354 = dma.hbm_to_vmem [thread:$0]  (!%p1913_p12), %s508_s10, 128, %s510_s3, [#allocation3]  }
  0x29   : > { %s1739_s22 = smov 128   ;;  %s1740_s24 = smov 8  }
  0x2a   : > { %1360 = dma.hbm_to_vmem [thread:$0]  (!%p1913_p12), %s537_s14, 512, %s539_s0, [#allocation6], %s1739_s22, %s1739_s22, %s1740_s24  }
  0x2b   : > { %s569_s23 = sshll.u32 %s2084_s17, 4  ;;  %s1741_s20 = smov [#allocation10]   ;;  %s570_s23 = int_to_ptr.hbm [resolvable:$true] %s569_s23 }
  0x2c   : > { %s571_s21 = sshll.u32 %s1741_s20, 4  ;;  %s581_s10 = sshll.u32 %s2085_s18, 4  ;;  %s572_s21 = int_to_ptr.vmem [resolvable:$true] %s571_s21  ;;  %s582_s10 = int_to_ptr.hbm [resolvable:$true] %s581_s10 }
  0x2d   : > { %1366 = dma.hbm_to_vmem [thread:$0]  (!%p1913_p12), %s570_s23, 128, %s572_s21, [#allocation9]  }
  0x2e   : > { %s1742_s3 = smov [#allocation11]   ;;  %603 = sbr.rel (%p1899_p10) target bundleno = 2485 (0x9b5), region = 96 }
  0x2f   : > { %s583_s28 = sshll.u32 %s1742_s3, 4  ;;  %s584_s28 = int_to_ptr.vmem [resolvable:$true] %s583_s28 }
  0x30   : > { %1369 = dma.hbm_to_vmem [thread:$0]  (!%p1913_p12), %s582_s10, 16, %s584_s28, [#allocation12]  }
  0x33   : > { %1700 = dma.done.wait (%p1374_p9), [#allocation3], 128  }
  0x34   : > { %1702 = vsyncadd (%p1374_p9), [#allocation3], 4294967168 }
  0x35   : > { %1704 = dma.done.wait (%p1374_p9), [#allocation6], 528  }
  0x36   : > { %1706 = vsyncadd (%p1374_p9), [#allocation6], 4294966768 }
  0x37   : > { %1708 = dma.done.wait (%p1374_p9), [#allocation9], 144  }
  0x38   : > { %1710 = vsyncadd (%p1374_p9), [#allocation9], 4294967152 }
  0x39   : > { %1712 = dma.done.wait (%p1374_p9), [#allocation12], 16  }
  0x3a   : > { %1714 = vsyncadd (%p1374_p9), [#allocation12], 4294967280  ;;  %p684_p13 = scmp.lt.s32.totalorder %s1871_s1, 1  ;;  %s2116_s0 = sld [smem:[#allocation26_spill]]  ;;  %vm689_vm0 = vcmask 64512   ;;  %v1743_v2 = vmov 8.0  }
  0x3b   : > { %1447 = vrcp.f32 %v1743_v2  ;;  %s2117_s29 = sld [smem:[#allocation27_spill]]  ;;  %v1434_v28 = vld [vmem:[%s2072_s5] ss:$0 sm:$0xff]  ;;  %s1746_s26 = smov 124   ;;  %vm764_vm4 = vcmask 31744   ;;  %vm898_vm5 = vcmask 1043456  }
  0x3c   : > { %s685_s9 = scalar_select %p684_p13, %s1871_s1, 1  ;;  %v1435_v30 = vld [vmem:[%s2073_s6] ss:$0 sm:$0xff]  ;;  %vm1015_vm8 = vcmask 261120  }
  0x3d   : > { %s2118_s28 = sld [smem:[#allocation28_spill]]  ;;  %s1747_s27 = smov 108  }
  0x3e   : > { %s1306_s14 = sshll.u32 %s685_s9, 3  ;;  %s1744_s9 = smov 120  }
  0x3f   : > { %s2119_s2 = sld [smem:[#allocation29_spill]]  ;;  %s681_s24 = sand.u32 1, %s1725_s30  }
  0x40   : > { %s687_s22 = scalar_lea.vmem %s2116_s0, %s1306_s14  ;;  %s1745_s14 = smov 116  }
  0x41   : > { %v1964_v0 = vld [vmem:[%s687_s22] sm:$0xff]  ;;  %v1448_v3 = vpop.eup %1447  ;;  %s1748_s0 = smov 112  }
  0x42   : > { %v690_v1 = vsel %vm689_vm0, %v1964_v0, 0.0  ;;  %v694_v4 = vmul.f32 8.0, %v1448_v3  ;;  %vm698_vm1 = vweird.f32 %v1448_v3  ;;  %v732_v14 = vld [vmem:[%s2117_s29] sm:$0xff]  ;;  %s1322_s29 = sshll.u32 %s1871_s1, 3 }
  0x43   : > { %691 = vadd.xlane.f32.xlu0 %v690_v1  ;;  %755 = vmatpush.msra.mxu0 %v732_v14  ;;  %v1436_v34 = vld [vmem:[%s2118_s28] ss:$0 sm:$0xff]  ;;  %s1165_s25 = scalar_lea.hbm %s2086_s19, %s1322_s29 }
  0x44   : > { %v695_v5 = vsub.f32 1.0, %v694_v4  ;;  %s1169_s28 = sshll.u32 %s1165_s25, 4  ;;  %s1170_s28 = int_to_ptr.hbm [resolvable:$true] %s1169_s28 }
  0x45   : > { %v760_v1 = vld [vmem:[%s2119_s2] sm:$0xff]  ;;  %s1305_s2 = sshll.u32 %s681_s24, 3 }
  0x46   : > { %v696_v6 = vmul.f32 %v1448_v3, %v695_v5  ;;  %v894_v2 = vrot.slane %v760_v1, 4  ;;  %s683_s10 = scalar_lea.vmem [#allocation13], %s1305_s2 }
  0x47   : > { %s1167_s3 = sshll.u32 %s683_s10, 4  ;;  %s1168_s3 = int_to_ptr.vmem [resolvable:$true] %s1167_s3 }
  0x48   : > { %v697_v7 = vadd.f32 %v1448_v3, %v696_v6 }
  0x4a   : > { %v1968_v8 = vsel %vm698_vm1, %v1448_v3, %v697_v7 }
  0xb6   : > { %v692_v9 = vpop.xlane.xlu0 %691 }
  0xb7   : > { %v700_v10 = vmul.f32 %v1968_v8, %v692_v9  ;;  %v1437_v9 = vld [vmem:[%s2071_s4] ss:$0 sm:$0xff] }
  0xb9   : > { %v701_v11 = vsub.f32 %v1964_v0, %v700_v10 }
  0xbb   : > { %v702_v12 = vmul.f32 %v701_v11, %v701_v11  ;;  %v725_v29 = vmul.f32 %v1434_v28, %v701_v11 }
  0xbd   : > { %v703_v13 = vsel %vm689_vm0, %v702_v12, 0.0 }
  0xbe   : > { %704 = vadd.xlane.f32.xlu0 %v703_v13 }
 0x131   : > { %v705_v15 = vpop.xlane.xlu0 %704 }
 0x132   : > { %v706_v16 = vmul.f32 0.14285715, %v705_v15 }
 0x134   : > { %1449 = vrsqrt.f32 %v706_v16  ;;  %vm714_vm2 = vcmp.eq.f32.partialorder %v706_v16, inf  ;;  %v717_v24 = vand.u32 2147483648, %v706_v16  ;;  %vm716_vm3 = vcmp.eq.f32.partialorder %v706_v16, 0.0 }
 0x13a   : > { %v1450_v17 = vpop.eup %1449 }
 0x13b   : > { %v708_v18 = vmul.f32 %v1450_v17, %v706_v16 }
 0x13d   : > { %v709_v19 = vmul.f32 %v1450_v17, %v708_v18  ;;  %v987_v18 = vld [vmem:[#allocation2] sm:$0xff] }
 0x13f   : > { %v710_v20 = vmul.f32 0.5, %v709_v19 }
 0x141   : > { %v711_v21 = vsub.f32 1.5, %v710_v20 }
 0x143   : > { %v712_v22 = vmul.f32 %v1450_v17, %v711_v21 }
 0x145   : > { %v713_v23 = vmul.f32 %v712_v22, %v706_v16 }
 0x147   : > { %v715_v25 = vsel %vm714_vm2, %v706_v16, %v713_v23 }
 0x148   : > { %v718_v26 = vsel %vm716_vm3, %v717_v24, %v715_v25 }
 0x149   : > { %v719_v27 = vadd.f32 1e-06, %v718_v26 }
 0x14b   : > { %1451 = vrcp.f32 %v719_v27 }
 0x151   : > { %v1452_v31 = vpop.eup %1451 }
 0x152   : > { %v726_v32 = vmul.f32 %v1452_v31, %v725_v29  ;;  %v1438_v31 = vld [vmem:[%s2074_s7] ss:$0 sm:$0xff] }
 0x154   : > { %v731_v33 = vadd.f32 %v1435_v30, %v726_v32 }
 0x156   : > { %1307 = vmatmul.msk.f32.vlgmr.msra.gmra.mxu0 %vm689_vm0, %v731_v33  ;;  %v1439_v33 = vld [vmem:[%s2075_s8] ss:$0 sm:$0xff] }
 0x1d3   : > { %v757_v35 = vpop.f32.mrf.mxu0 }
 0x1d4   : > { %v758_v36 = vadd.f32 %v1436_v34, %v757_v35 }
 0x1d6   : > { %762 = vrot.lane.b32.xlu2 %v758_v36, %s1744_s9  ;;  %829 = vrot.lane.b32.xlu1 %v758_v36, %s1745_s14  ;;  %s1155_s9 = scalar_lea.sflag [#allocation4], %s681_s24  ;;  %s1669_s14 = sshra.s32 %s1170_s28, 4  ;;  %s1670_s14 = int_to_ptr.hbm [resolvable:$true] %s1669_s14 }
 0x1d7   : > { %s1671_s1 = scalar_lea.hbm %s1670_s14, 8  ;;  %p1676_p3 = scmp.lt.s32.totalorder %s1670_s14, %s2086_s19 }
 0x1d8   : > { %p1672_p0 = scmp.ne.s32.totalorder %s1670_s14, %s1671_s1 }
 0x1da   : > { %p1673_p1 = pnand %p1672_p0, %p1888_p5 }
 0x1dc   : > { %p1674_p2 = pneg %p1673_p1 }
 0x1de   : > { %827 = vrot.lane.b32.xlu1 %v758_v36, %s1746_s26 }
 0x230   : > { %v763_v37 = vpop.permute.xlu2 %762 }
 0x231   : > { %1308 = vmatpush.xpose.msk.msra.mxu1 %vm764_vm4, %v763_v37  ;;  %v1440_v37 = vld [vmem:[#allocation5] ss:$0 sm:$0xff] }
 0x234   : > { %1309 = vmatmul.msk.f32.vlgmr.msra.gmra.mxu1 %vm764_vm4, %v758_v36 }
 0x235   : > { %1316 = vmatpush.msk.msrb.mxu1 %vm898_vm5, %v760_v1 }
 0x248   : > { %v830_v38 = vpop.permute.xlu1 %829 }
 0x249   : > { %1311 = vmatpush.xpose.msk.msra.mxu3 %vm764_vm4, %v830_v38 }
 0x24d   : > { %1010 = vmatpush.msrb.mxu3 %v987_v18 }
 0x250   : > { %v828_v39 = vpop.permute.xlu1 %827 }
 0x251   : > { %1312 = vmatmul.msk.f32.vlgmr.msra.gmra.mxu3 %vm764_vm4, %v828_v39 }
 0x2b1   : > { %v786_v40 = vpop.f32.mrf.mxu1 }
 0x2b2   : > { %v789_v41 = vmul.f32 0.5, %v786_v40 }
 0x2b4   : > { %v790_v42 = vsel %vm689_vm0, %v789_v41, -inf }
 0x2b5   : > { %791 = vmax.xlane.f32.xlu2 %v790_v42 }
 0x2cd   : > { %867 = vrot.lane.b32.xlu2 %v758_v36, %s1747_s27 }
 0x2d4   : > { %v852_v43 = vpop.f32.mrf.mxu3 }
 0x2d5   : > { %v855_v44 = vmul.f32 0.5, %v852_v43 }
 0x2d7   : > { %v856_v45 = vsel %vm689_vm0, %v855_v44, -inf }
 0x2d8   : > { %857 = vmax.xlane.f32.xlu0 %v856_v45 }
 0x328   : > { %v792_v46 = vpop.xlane.xlu2 %791 }
 0x329   : > { %v793_v47 = vsub.f32 %v789_v41, %v792_v46  ;;  %v1749_v41 = vmov 32.0  }
 0x32b   : > { %v794_v48 = vmul.f32 1.442695, %v793_v47 }
 0x32d   : > { %1453 = vpow2.f32 %v794_v48 }
 0x330   : > { %v868_v49 = vpop.permute.xlu2 %867 }
 0x331   : > { %888 = vmatpush.msrb.mxu0 %v868_v49 }
 0x333   : > { %v1454_v50 = vpop.eup %1453 }
 0x334   : > { %v796_v51 = vsel %vm689_vm0, %v1454_v50, 0.0 }
 0x335   : > { %797 = vadd.xlane.f32.xlu1 %v796_v51 }
 0x34b   : > { %v858_v52 = vpop.xlane.xlu0 %857 }
 0x34c   : > { %v859_v53 = vsub.f32 %v855_v44, %v858_v52 }
 0x34e   : > { %v860_v54 = vmul.f32 1.442695, %v859_v53  ;;  %v1061_v53 = vld [vmem:[#allocation7 + $0x18] sm:$0xff] }
 0x34f   : > { %1081 = vmatpush.msra.mxu0 %v1061_v53 }
 0x350   : > { %1455 = vpow2.f32 %v860_v54  ;;  %v1060_v54 = vld [vmem:[#allocation7 + $0x10] sm:$0xff] }
 0x351   : > { %1082 = vmatpush.msra.mxu0 %v1060_v54 }
 0x356   : > { %v1456_v55 = vpop.eup %1455 }
 0x357   : > { %v862_v56 = vsel %vm689_vm0, %v1456_v55, 0.0 }
 0x358   : > { %863 = vadd.xlane.f32.xlu0 %v862_v56  ;;  %v1058_v56 = vld [vmem:[#allocation7] sm:$0xff] }
 0x36c   : > { %801 = vrot.lane.b32.xlu0 %v758_v36, %s1748_s0  ;;  %s1675_s0 = scalar_lea.hbm %s2086_s19, 16 }
 0x36d   : > { %p1677_p4 = scmp.lt.s32.totalorder %s1675_s0, %s1671_s1 }
 0x36f   : > { %p1678_p7 = por %p1677_p4, %p1676_p3 }
 0x371   : > { %p1679_p8 = pnand %p1678_p7, %p1674_p2 }
 0x3a8   : > { %v798_v59 = vpop.xlane.xlu1 %797 }
 0x3cb   : > { %v864_v57 = vpop.xlane.xlu0 %863 }
 0x3cc   : > { %1457 = vrcp.f32 %v864_v57 }
 0x3cd   : > { %1459 = vrcp.f32 %v798_v59 }
 0x3d2   : > { %v1458_v58 = vpop.eup %1457 }
 0x3d3   : > { %v866_v60 = vmul.f32 %v1458_v58, %v1456_v55  ;;  %v1460_v61 = vpop.eup %1459  ;;  %v1059_v55 = vld [vmem:[#allocation7 + $0x8] sm:$0xff] }
 0x3d4   : > { %v800_v63 = vmul.f32 %v1460_v61, %v1454_v50  ;;  %1083 = vmatpush.msra.mxu0 %v1059_v55 }
 0x3d5   : > { %1313 = vmatmul.msk.f32.vlgmr.msrb.gmra.mxu0 %vm689_vm0, %v866_v60 }
 0x3d6   : > { %1084 = vmatpush.msra.mxu0 %v1058_v56 }
 0x3de   : > { %v802_v62 = vpop.permute.xlu0 %801 }
 0x3df   : > { %822 = vmatpush.msra.mxu2 %v802_v62 }
 0x3e0   : > { %1310 = vmatmul.msk.f32.vlgmr.msra.gmra.mxu2 %vm689_vm0, %v800_v63 }
 0x3e1   : > { %1314 = vmatpush.msk.msrb.mxu2 %vm898_vm5, %v894_v2 }
 0x452   : > { %v890_v3 = vpop.f32.mrf.mxu0 }
 0x453   : > { %1315 = vmatmul.msk.f32.vlgmr.msrb.gmra.mxu2 %vm764_vm4, %v890_v3 }
 0x463   : > { %v824_v4 = vpop.f32.mrf.mxu2 }
 0x464   : > { %1317 = vmatmul.msk.f32.vlgmr.msrb.gmra.mxu1 %vm764_vm4, %v824_v4 }
 0x4d6   : > { %v918_v5 = vpop.f32.mrf.mxu2 }
 0x4e1   : > { %v943_v6 = vpop.f32.mrf.mxu1 }
 0x4e2   : > { %v944_v7 = vadd.f32 %v943_v6, %v918_v5 }
 0x4e4   : > { %v946_v10 = vadd.f32 %v944_v7, %v1964_v0  ;;  %v1441_v7 = vld [vmem:[%s2078_s11] ss:$0 sm:$0xff] }
 0x4e6   : > { %v951_v11 = vadd.f32 %v1437_v9, %v946_v10  ;;  %v1442_v10 = vld [vmem:[%s2079_s12] ss:$0 sm:$0xff] }
 0x4e8   : > { %v952_v12 = vsel %vm689_vm0, %v951_v11, 0.0 }
 0x4e9   : > { %953 = vadd.xlane.f32.xlu0 %v952_v12 }
 0x55c   : > { %v954_v13 = vpop.xlane.xlu0 %953 }
 0x55d   : > { %v955_v14 = vmul.f32 %v954_v13, %v1968_v8 }
 0x55f   : > { %v956_v15 = vsub.f32 %v951_v11, %v955_v14  ;;  %v1443_v14 = vld [vmem:[#allocation8] ss:$0 sm:$0xff] }
 0x561   : > { %v957_v16 = vmul.f32 %v956_v15, %v956_v15  ;;  %v980_v32 = vmul.f32 %v1438_v31, %v956_v15 }
 0x563   : > { %v958_v17 = vsel %vm689_vm0, %v957_v16, 0.0 }
 0x564   : > { %959 = vadd.xlane.f32.xlu1 %v958_v17 }
 0x5d7   : > { %v960_v19 = vpop.xlane.xlu1 %959 }
 0x5d8   : > { %v961_v20 = vmul.f32 0.14285715, %v960_v19 }
 0x5da   : > { %1461 = vrsqrt.f32 %v961_v20  ;;  %vm969_vm6 = vcmp.eq.f32.partialorder %v961_v20, inf  ;;  %v972_v27 = vand.u32 2147483648, %v961_v20  ;;  %vm971_vm7 = vcmp.eq.f32.partialorder %v961_v20, 0.0 }
 0x5e0   : > { %v1462_v21 = vpop.eup %1461 }
 0x5e1   : > { %v963_v22 = vmul.f32 %v1462_v21, %v961_v20 }
 0x5e3   : > { %v964_v0 = vmul.f32 %v1462_v21, %v963_v22 }
 0x5e5   : > { %v965_v23 = vmul.f32 0.5, %v964_v0  ;;  %v1124_v0 = vld [vmem:[#allocation10] sm:$0xff] }
 0x5e6   : > { %1147 = vmatpush.msra.mxu2 %v1124_v0 }
 0x5e7   : > { %v966_v24 = vsub.f32 1.5, %v965_v23 }
 0x5e9   : > { %v967_v25 = vmul.f32 %v1462_v21, %v966_v24 }
 0x5eb   : > { %v968_v26 = vmul.f32 %v967_v25, %v961_v20 }
 0x5ed   : > { %v970_v28 = vsel %vm969_vm6, %v961_v20, %v968_v26 }
 0x5ee   : > { %v973_v29 = vsel %vm971_vm7, %v972_v27, %v970_v28 }
 0x5ef   : > { %v974_v30 = vadd.f32 1e-06, %v973_v29 }
 0x5f1   : > { %1463 = vrcp.f32 %v974_v30 }
 0x5f2   : > { %1465 = vrcp.f32 %v1749_v41  ;;  %v1446_v41 = vld [vmem:[#allocation11] ss:$0 sm:$0xff] }
 0x5f7   : > { %v1464_v34 = vpop.eup %1463 }
 0x5f8   : > { %v981_v35 = vmul.f32 %v1464_v34, %v980_v32  ;;  %v1466_v42 = vpop.eup %1465 }
 0x5f9   : > { %v1020_v43 = vmul.f32 32.0, %v1466_v42  ;;  %vm1024_vm9 = vweird.f32 %v1466_v42 }
 0x5fa   : > { %v986_v36 = vadd.f32 %v1439_v33, %v981_v35  ;;  %v1444_v35 = vld [vmem:[%s2082_s15] ss:$0 sm:$0xff] }
 0x5fb   : > { %v1021_v44 = vsub.f32 1.0, %v1020_v43 }
 0x5fc   : > { %1318 = vmatmul.msk.f32.vlgmr.msrb.gmra.mxu3 %vm689_vm0, %v986_v36 }
 0x5fd   : > { %v1022_v45 = vmul.f32 %v1466_v42, %v1021_v44 }
 0x5ff   : > { %v1023_v46 = vadd.f32 %v1466_v42, %v1022_v45 }
 0x601   : > { %v1025_v47 = vsel %vm1024_vm9, %v1466_v42, %v1023_v46 }
 0x67f   : > { %v1012_v38 = vpop.f32.mrf.mxu3 }
 0x680   : > { %v1013_v39 = vadd.f32 %v1440_v37, %v1012_v38  ;;  %v1445_v37 = vld [vmem:[%s2083_s16] ss:$0 sm:$0xff] }
 0x682   : > { %v1016_v40 = vsel %vm1015_vm8, %v1013_v39, 0.0 }
 0x683   : > { %1017 = vadd.xlane.f32.xlu1 %v1016_v40 }
 0x6f6   : > { %v1018_v48 = vpop.xlane.xlu1 %1017 }
 0x6f7   : > { %v1026_v49 = vmul.f32 %v1025_v47, %v1018_v48 }
 0x6f9   : > { %v1027_v50 = vsub.f32 %v1013_v39, %v1026_v49 }
 0x6fb   : > { %v1028_v51 = vmul.f32 %v1027_v50, %v1027_v50  ;;  %v1051_v9 = vmul.f32 %v1441_v7, %v1027_v50 }
 0x6fd   : > { %v1029_v52 = vsel %vm1015_vm8, %v1028_v51, 0.0 }
 0x6fe   : > { %1030 = vadd.xlane.f32.xlu2 %v1029_v52 }
 0x771   : > { %v1031_v57 = vpop.xlane.xlu2 %1030 }
 0x772   : > { %v1032_v58 = vmul.f32 0.032258064, %v1031_v57 }
 0x774   : > { %1467 = vrsqrt.f32 %v1032_v58  ;;  %vm1040_vm10 = vcmp.eq.f32.partialorder %v1032_v58, inf  ;;  %v1043_v3 = vand.u32 2147483648, %v1032_v58  ;;  %vm1042_vm11 = vcmp.eq.f32.partialorder %v1032_v58, 0.0 }
 0x77a   : > { %v1468_v59 = vpop.eup %1467 }
 0x77b   : > { %v1034_v60 = vmul.f32 %v1468_v59, %v1032_v58 }
 0x77d   : > { %v1035_v61 = vmul.f32 %v1468_v59, %v1034_v60 }
 0x77f   : > { %v1036_v62 = vmul.f32 0.5, %v1035_v61 }
 0x781   : > { %v1037_v63 = vsub.f32 1.5, %v1036_v62 }
 0x783   : > { %v1038_v1 = vmul.f32 %v1468_v59, %v1037_v63 }
 0x785   : > { %v1039_v2 = vmul.f32 %v1038_v1, %v1032_v58 }
 0x787   : > { %v1041_v4 = vsel %vm1040_vm10, %v1032_v58, %v1039_v2 }
 0x788   : > { %v1044_v5 = vsel %vm1042_vm11, %v1043_v3, %v1041_v4 }
 0x789   : > { %v1045_v6 = vadd.f32 1e-06, %v1044_v5 }
 0x78b   : > { %1469 = vrcp.f32 %v1045_v6 }
 0x791   : > { %v1470_v11 = vpop.eup %1469 }
 0x792   : > { %v1052_v12 = vmul.f32 %v1470_v11, %v1051_v9 }
 0x794   : > { %v1057_v13 = vadd.f32 %v1442_v10, %v1052_v12 }
 0x796   : > { %1319 = vmatmul.msk.f32.vlgmr.msra.gmra.mxu0 %vm1015_vm8, %v1057_v13 }
 0x813   : > { %v1086_v15 = vpop.f32.mrf.mxu0 }
 0x814   : > { %v1087_v16 = vadd.f32 %v1443_v14, %v1086_v15 }
 0x816   : > { %v1089_v17 = vsel %vm689_vm0, %v1087_v16, 0.0 }
 0x817   : > { %1090 = vadd.xlane.f32.xlu1 %v1089_v17 }
 0x88a   : > { %v1091_v18 = vpop.xlane.xlu1 %1090 }
 0x88b   : > { %v1092_v19 = vmul.f32 %v1091_v18, %v1968_v8 }
 0x88d   : > { %v1093_v20 = vsub.f32 %v1087_v16, %v1092_v19 }
 0x88f   : > { %v1094_v21 = vmul.f32 %v1093_v20, %v1093_v20  ;;  %v1117_v36 = vmul.f32 %v1444_v35, %v1093_v20 }
 0x891   : > { %v1095_v22 = vsel %vm689_vm0, %v1094_v21, 0.0 }
 0x892   : > { %1096 = vadd.xlane.f32.xlu1 %v1095_v22 }
 0x905   : > { %v1097_v23 = vpop.xlane.xlu1 %1096 }
 0x906   : > { %v1098_v24 = vmul.f32 0.14285715, %v1097_v23 }
 0x908   : > { %1471 = vrsqrt.f32 %v1098_v24  ;;  %vm1106_vm12 = vcmp.eq.f32.partialorder %v1098_v24, inf  ;;  %v1109_v8 = vand.u32 2147483648, %v1098_v24  ;;  %vm1108_vm13 = vcmp.eq.f32.partialorder %v1098_v24, 0.0 }
 0x90e   : > { %v1472_v25 = vpop.eup %1471 }
 0x90f   : > { %v1100_v26 = vmul.f32 %v1472_v25, %v1098_v24 }
 0x911   : > { %v1101_v27 = vmul.f32 %v1472_v25, %v1100_v26 }
 0x913   : > { %v1102_v28 = vmul.f32 0.5, %v1101_v27 }
 0x915   : > { %v1103_v29 = vsub.f32 1.5, %v1102_v28 }
 0x917   : > { %v1104_v30 = vmul.f32 %v1472_v25, %v1103_v29 }
 0x919   : > { %v1105_v31 = vmul.f32 %v1104_v30, %v1098_v24 }
 0x91b   : > { %v1107_v32 = vsel %vm1106_vm12, %v1098_v24, %v1105_v31 }
 0x91c   : > { %v1110_v33 = vsel %vm1108_vm13, %v1109_v8, %v1107_v32 }
 0x91d   : > { %v1111_v34 = vadd.f32 1e-06, %v1110_v33 }
 0x91f   : > { %1473 = vrcp.f32 %v1111_v34 }
 0x925   : > { %v1474_v38 = vpop.eup %1473 }
 0x926   : > { %v1118_v39 = vmul.f32 %v1474_v38, %v1117_v36 }
 0x928   : > { %v1123_v40 = vadd.f32 %v1445_v37, %v1118_v39 }
 0x92a   : > { %1320 = vmatmul.msk.f32.vlgmr.msra.gmra.mxu2 %vm689_vm0, %v1123_v40 }
 0x9ad   : > { %v1149_v42 = vpop.f32.mrf.mxu2 }
 0x9ae   : > { %v1150_v43 = vadd.f32 %v1446_v41, %v1149_v42 }
 0x9b0   : > { %v1152_v44 = vmax.f32 %v1150_v43, 0.0 }
 0x9b2   : > { %1153 = vst.msk [vmem:[%s683_s10] sm:$0xff] %vm689_vm0, %v1152_v44 }
 0x9b3   : > { %1682 = shalt.err (!%p1679_p8)
}
 0x9b4   : > { %1349 = dma.vmem_to_hbm [thread:$0]  (%p1888_p5), %s1168_s3, 128, %s1170_s28, %s1155_s9  }
 0x9b5 PF: > { %s2121_s24 = sld [smem:[#allocation21_spill]] }
 0x9b6   : > { %s2122_s29 = sld [smem:[#allocation19_spill]] }
 0x9bb   : > { %p1386_p9 = scmp.ge.s32.totalorder %s2121_s24, 2 }
 0x9bc   : > { %s1181_s20 = sand.u32 1, %s2122_s29  }
 0x9bd   : > { %p1371_p10 = pnand %p1386_p9, %p1892_p6  ;;  %s1182_s25 = scalar_lea.sflag [#allocation4], %s1181_s20 }
 0x9bf   : > { %p1372_p11 = pneg %p1371_p10 }
 0x9c1   : > { %1716 = dma.done.wait (%p1372_p11), %s1182_s25, 128  }
 0x9c2   : > { %1718 = vsyncadd (%p1372_p11), %s1182_s25, 4294967168  ;;  %s2124_s21 = sld [smem:[#allocation22_spill]]  ;;  %s2127_s0 = smov %s1725_s30 }
 0x9c3   : > { %s2125_s10 = sld [smem:[#allocation20_spill]] }
 0x9c4   : > { %s2126_s20 = sld [smem:[#allocation23_spill]] }
 0x9c8   : > { %p33_p12 = scmp.ge.s32.totalorder %s2124_s21, 4  }
 0x9c9   : > { %s2128_s30 = smov %s2125_s10 }
 0x9ca   :  { %35 = sbr.rel (!%p33_p12) target bundleno = 15 (0xf), region = 156 }
 0x9cf   :  { %1188 = vsyncpa [#allocation3], 1 }
 0x9d0   :  { %1190 = vsyncpa [#allocation3 + $0x1], 1 }
 0x9d1   :  { %1191 = vsyncpa [#allocation6], 1 }
 0x9d2   :  { %1192 = vsyncpa [#allocation9], 1 }
 0x9d3   :  { %1193 = vsyncpa [#allocation12], 1 }
 0x9d4   :  { %1194 = vsyncpa [#allocation4], 1 }
 0x9d5   :  { %1196 = vsyncpa [#allocation4 + $0x1], 1 }

</bundles_post_ra>
